<compile_context>
chip_gen: v6e
topology: v6e:2x2x1
jax: 0.10.0
libtpu: 0.0.40
codegen_flags: <defaults>
</compile_context>

<pallas_src>
import functools

import jax
import jax.numpy as jnp
from jax.experimental import pallas as pl
from jax.experimental.pallas import tpu as pltpu


def _round_up(x, m):
    return ((x + m - 1) // m) * m


def dense_moe_kernel(x_ref, wr_ref, br_ref, w1_ref, b1_ref, w2_ref, b2_ref,
                     o_ref, gates_ref, acc_ref, *, n_experts, top_k):
    e = pl.program_id(1)

    # ---- once per token tile: router, top-k mask, gates; zero accumulator ----
    @pl.when(e == 0)
    def _init():
        x = x_ref[...]                                           # (TM, D) f32
        logits = jnp.dot(x, wr_ref[...],
                         preferred_element_type=jnp.float32) + br_ref[...]  # (TM, E)

        # iterative argmax top-k with first-index tie-break (matches torch.topk)
        col = jax.lax.broadcasted_iota(jnp.int32, logits.shape, 1)
        neg_inf = jnp.float32(-jnp.inf)
        mask = jnp.zeros(logits.shape, dtype=jnp.bool_)
        work = logits
        for _ in range(top_k):
            m = jnp.max(work, axis=-1, keepdims=True)
            is_max = work == m
            cand = jnp.where(is_max, col, jnp.int32(n_experts))
            first = jnp.min(cand, axis=-1, keepdims=True)
            sel = col == first
            mask = jnp.logical_or(mask, sel)
            work = jnp.where(sel, neg_inf, work)

        # masked softmax over experts (non-selected -> exactly 0 weight)
        masked = jnp.where(mask, logits, neg_inf)
        mx = jnp.max(masked, axis=-1, keepdims=True)
        ex = jnp.exp(masked - mx)
        gates_ref[...] = ex / jnp.sum(ex, axis=-1, keepdims=True)   # (TM, E)

        acc_ref[...] = jnp.zeros_like(acc_ref)

    # ---- current expert: bf16 matmuls, f32 accumulation ----
    x_bf = x_ref[...].astype(jnp.bfloat16)                       # (TM, D)
    w1 = w1_ref[0]                                               # (D, H) bf16
    w2 = w2_ref[0]                                               # (H, D) bf16
    b1 = b1_ref[0]                                               # (1, H) f32
    b2 = b2_ref[0]                                               # (1, D) f32

    h = jnp.dot(x_bf, w1, preferred_element_type=jnp.float32) + b1
    h = jnp.maximum(h, 0.0)                                      # ReLU
    o = jnp.dot(h.astype(jnp.bfloat16), w2,
                preferred_element_type=jnp.float32) + b2         # (TM, D)

    # gate for this expert: pick column e from the cached gates
    col = jax.lax.broadcasted_iota(jnp.int32, gates_ref.shape, 1)
    ge = jnp.sum(jnp.where(col == e, gates_ref[...], 0.0),
                 axis=-1, keepdims=True)                         # (TM, 1)
    acc_ref[...] += ge * o

    # ---- last expert: write back the f32 accumulator ----
    @pl.when(e == n_experts - 1)
    def _store():
        o_ref[...] = acc_ref[...].astype(o_ref.dtype)


def dense_moe(x, params, *, n_experts, top_k, tm=256):
    """x: [B, S, D] float32 -> [B, S, D] float32."""
    assert 1 <= top_k <= n_experts
    B, S, D = x.shape
    T = B * S
    wr, br, w1, b1, w2, b2 = params
    H = w1.shape[-1]

    # large token tile; shrink / pad for small T (tile rows stay multiple of 8)
    tm = min(tm, _round_up(T, 8))
    T_pad = _round_up(T, tm)

    x_flat = x.reshape(T, D)
    if T_pad != T:
        x_flat = jnp.pad(x_flat, ((0, T_pad - T), (0, 0)))

    # cast expert weights to bf16 up front: halves weight DMA + VMEM footprint
    w1_bf = w1.astype(jnp.bfloat16)
    w2_bf = w2.astype(jnp.bfloat16)

    kernel = functools.partial(dense_moe_kernel,
                               n_experts=n_experts, top_k=top_k)

    out_flat = pl.pallas_call(
        kernel,
        out_shape=jax.ShapeDtypeStruct((T_pad, D), jnp.float32),
        grid_spec=pltpu.PrefetchScalarGridSpec(
            num_scalar_prefetch=0,
            grid=(T_pad // tm, n_experts),                 # (token tiles, experts)
            in_specs=[
                pl.BlockSpec((tm, D), lambda i, e: (i, 0)),           # x tile
                pl.BlockSpec((D, n_experts), lambda i, e: (0, 0)),    # router W
                pl.BlockSpec((1, n_experts), lambda i, e: (0, 0)),    # router b
                pl.BlockSpec((1, D, H), lambda i, e: (e, 0, 0)),      # W1[e] (bf16)
                pl.BlockSpec((1, 1, H), lambda i, e: (e, 0, 0)),      # b1[e]
                pl.BlockSpec((1, H, D), lambda i, e: (e, 0, 0)),      # W2[e] (bf16)
                pl.BlockSpec((1, 1, D), lambda i, e: (e, 0, 0)),      # b2[e]
            ],
            out_specs=pl.BlockSpec((tm, D), lambda i, e: (i, 0)),
            scratch_shapes=[
                pltpu.VMEM((tm, n_experts), jnp.float32),   # cached gates
                pltpu.VMEM((tm, D), jnp.float32),           # f32 accumulator
            ],
        ),
        compiler_params=pltpu.CompilerParams(
            dimension_semantics=("parallel", "arbitrary"),
            vmem_limit_bytes=64 * 1024 * 1024,
        ),
    )(x_flat, wr, br, w1_bf, b1, w2_bf, b2)
    return out_flat[:T].reshape(B, S, D)


def reference_moe(x, params, *, n_experts, top_k):
    """Plain-JAX f32 reference matching the PyTorch forward."""
    wr, br, w1, b1, w2, b2 = params
    hi = jax.lax.Precision.HIGHEST
    logits = jnp.dot(x, wr, precision=hi) + br[0]               # (B,S,E)
    topv, _ = jax.lax.top_k(logits, top_k)
    thresh = topv[..., -1:]
    mask = logits >= thresh            # ties: can select >top_k; negligible for random f32
    gates = jax.nn.softmax(jnp.where(mask, logits, -jnp.inf), axis=-1)
    out = jnp.zeros_like(x)
    for ei in range(n_experts):
        h = jnp.maximum(jnp.dot(x, w1[ei], precision=hi) + b1[ei], 0.0)
        o = jnp.dot(h, w2[ei], precision=hi) + b2[ei]
        out = out + gates[..., ei:ei + 1] * o
    return out


if __name__ == "__main__":
    # Small but lane-aligned shapes: D, H multiples of 128 keep loads/stores dense.
    B, S, D = 2, 128, 128
    N_EXPERTS, TOP_K = 4, 2
    H = 4 * D

    key = jax.random.PRNGKey(0)
    ks = jax.random.split(key, 8)
    scale = 0.05
    x = jax.random.normal(ks[0], (B, S, D), dtype=jnp.float32)
    wr = scale * jax.random.normal(ks[1], (D, N_EXPERTS), dtype=jnp.float32)
    br = scale * jax.random.normal(ks[2], (1, N_EXPERTS), dtype=jnp.float32)
    w1 = scale * jax.random.normal(ks[3], (N_EXPERTS, D, H), dtype=jnp.float32)
    b1 = scale * jax.random.normal(ks[4], (N_EXPERTS, 1, H), dtype=jnp.float32)
    w2 = scale * jax.random.normal(ks[5], (N_EXPERTS, H, D), dtype=jnp.float32)
    b2 = scale * jax.random.normal(ks[6], (N_EXPERTS, 1, D), dtype=jnp.float32)
    params = (wr, br, w1, b1, w2, b2)

    out = dense_moe(x, params, n_experts=N_EXPERTS, top_k=TOP_K)
    out = jax.block_until_ready(out)

    ref = reference_moe(x, params, n_experts=N_EXPERTS, top_k=TOP_K)
    assert out.shape == (B, S, D)
    # Tolerance relaxed vs f32 reference: expert matmuls use bf16 inputs with
    # f32 accumulation (router/top-k/gates are exact f32).
    assert jnp.allclose(out, ref, rtol=3e-2, atol=3e-2), "mismatch vs reference"

    print("KERNEL_OK")
</pallas_src>

<mosaic_0001>
module attributes {stable_mosaic.version = 11 : i64} {
  func.func @dense_moe_kernel(%arg0: i32, %arg1: i32, %arg2: memref<256x128xf32, #tpu.memory_space<vmem>>, %arg3: memref<128x4xf32, #tpu.memory_space<vmem>>, %arg4: memref<1x4xf32, #tpu.memory_space<vmem>>, %arg5: memref<1x128x512xbf16, #tpu.memory_space<vmem>>, %arg6: memref<1x1x512xf32, #tpu.memory_space<vmem>>, %arg7: memref<1x512x128xbf16, #tpu.memory_space<vmem>>, %arg8: memref<1x1x128xf32, #tpu.memory_space<vmem>>, %arg9: memref<256x128xf32, #tpu.memory_space<vmem>>, %arg10: memref<256x4xf32, #tpu.memory_space<vmem>>, %arg11: memref<256x128xf32, #tpu.memory_space<vmem>>) attributes {dimension_semantics = [#tpu.dimension_semantics<parallel>, #tpu.dimension_semantics<arbitrary>], iteration_bounds = array<i64: 1, 4>, scalar_prefetch = 0 : i64, scratch_operands = 2 : i64, tpu.core_type = #tpu.core_type<tc>, window_params = [{transform_indices = @transform_0, window_bounds = array<i64: 256, 128>}, {pipeline_mode = #tpu.pipeline_mode<synchronous>, transform_indices = @transform_1, window_bounds = array<i64: 128, 4>}, {pipeline_mode = #tpu.pipeline_mode<synchronous>, transform_indices = @transform_2, window_bounds = array<i64: 1, 4>}, {transform_indices = @transform_3, window_bounds = array<i64: 1, 128, 512>}, {transform_indices = @transform_4, window_bounds = array<i64: 1, 1, 512>}, {transform_indices = @transform_5, window_bounds = array<i64: 1, 512, 128>}, {transform_indices = @transform_6, window_bounds = array<i64: 1, 1, 128>}, {transform_indices = @transform_7, window_bounds = array<i64: 256, 128>}]} {
    %c0_i32 = arith.constant 0 : i32
    %0 = arith.cmpi eq, %arg1, %c0_i32 : i32
    %1 = arith.extui %0 : i1 to i32
    %c0_i32_0 = arith.constant 0 : i32
    %2 = arith.cmpi ne, %1, %c0_i32_0 : i32
    scf.if %2 {
      %c0_25 = arith.constant 0 : index
      %c0_26 = arith.constant 0 : index
      %38 = vector.load %arg2[%c0_25, %c0_26] : memref<256x128xf32, #tpu.memory_space<vmem>>, vector<256x128xf32>
      %c0_27 = arith.constant 0 : index
      %c0_28 = arith.constant 0 : index
      %39 = vector.load %arg3[%c0_27, %c0_28] : memref<128x4xf32, #tpu.memory_space<vmem>>, vector<128x4xf32>
      %cst_29 = arith.constant dense<0.000000e+00> : vector<256x4xf32>
      %40 = tpu.matmul %38, %39, %cst_29 {dimension_numbers = #tpu.dot_dimension_numbers<[1], [0], [0], [1], [0, 0, 1, 1], [], []>} : vector<256x128xf32>, vector<128x4xf32>, vector<256x4xf32> -> vector<256x4xf32>
      %c0_30 = arith.constant 0 : index
      %c0_31 = arith.constant 0 : index
      %41 = vector.load %arg4[%c0_30, %c0_31] : memref<1x4xf32, #tpu.memory_space<vmem>>, vector<1x4xf32>
      %42 = vector.broadcast %41 : vector<1x4xf32> to vector<256x4xf32>
      %43 = arith.addf %40, %42 : vector<256x4xf32>
      %44 = tpu.iota {dimensions = array<i32: 1>} : vector<256x4xi32>
      %false = arith.constant false
      %45 = vector.broadcast %false : i1 to vector<256x4xi1>
      %cst_32 = arith.constant dense<0xFF800000> : vector<256xf32>
      %46 = vector.multi_reduction <maximumf>, %43, %cst_32 [1] : vector<256x4xf32> to vector<256xf32>
      %47 = vector.shape_cast %46 : vector<256xf32> to vector<256x1xf32>
      %48 = vector.broadcast %47 : vector<256x1xf32> to vector<256x4xf32>
      %49 = arith.cmpf oeq, %43, %48 : vector<256x4xf32>
      %c4_i32 = arith.constant 4 : i32
      %50 = vector.broadcast %c4_i32 : i32 to vector<256x4xi32>
      %51 = arith.select %49, %44, %50 : vector<256x4xi1>, vector<256x4xi32>
      %cst_33 = arith.constant dense<2147483647> : vector<256xi32>
      %52 = vector.multi_reduction <minsi>, %51, %cst_33 [1] : vector<256x4xi32> to vector<256xi32>
      %53 = vector.shape_cast %52 : vector<256xi32> to vector<256x1xi32>
      %54 = vector.broadcast %53 : vector<256x1xi32> to vector<256x4xi32>
      %55 = arith.cmpi eq, %44, %54 : vector<256x4xi32>
      %56 = arith.ori %45, %55 : vector<256x4xi1>
      %cst_34 = arith.constant 0xFF800000 : f32
      %57 = vector.broadcast %cst_34 : f32 to vector<256x4xf32>
      %58 = arith.select %55, %57, %43 : vector<256x4xi1>, vector<256x4xf32>
      %cst_35 = arith.constant dense<0xFF800000> : vector<256xf32>
      %59 = vector.multi_reduction <maximumf>, %58, %cst_35 [1] : vector<256x4xf32> to vector<256xf32>
      %60 = vector.shape_cast %59 : vector<256xf32> to vector<256x1xf32>
      %61 = vector.broadcast %60 : vector<256x1xf32> to vector<256x4xf32>
      %62 = arith.cmpf oeq, %58, %61 : vector<256x4xf32>
      %c4_i32_36 = arith.constant 4 : i32
      %63 = vector.broadcast %c4_i32_36 : i32 to vector<256x4xi32>
      %64 = arith.select %62, %44, %63 : vector<256x4xi1>, vector<256x4xi32>
      %cst_37 = arith.constant dense<2147483647> : vector<256xi32>
      %65 = vector.multi_reduction <minsi>, %64, %cst_37 [1] : vector<256x4xi32> to vector<256xi32>
      %66 = vector.shape_cast %65 : vector<256xi32> to vector<256x1xi32>
      %67 = vector.broadcast %66 : vector<256x1xi32> to vector<256x4xi32>
      %68 = arith.cmpi eq, %44, %67 : vector<256x4xi32>
      %69 = arith.ori %56, %68 : vector<256x4xi1>
      %cst_38 = arith.constant 0xFF800000 : f32
      %70 = vector.broadcast %cst_38 : f32 to vector<256x4xf32>
      %71 = arith.select %69, %43, %70 : vector<256x4xi1>, vector<256x4xf32>
      %cst_39 = arith.constant dense<0xFF800000> : vector<256xf32>
      %72 = vector.multi_reduction <maximumf>, %71, %cst_39 [1] : vector<256x4xf32> to vector<256xf32>
      %73 = vector.shape_cast %72 : vector<256xf32> to vector<256x1xf32>
      %74 = vector.broadcast %73 : vector<256x1xf32> to vector<256x4xf32>
      %75 = arith.subf %71, %74 : vector<256x4xf32>
      %76 = math.exp %75 : vector<256x4xf32>
      %cst_40 = arith.constant dense<0.000000e+00> : vector<256xf32>
      %77 = vector.multi_reduction <add>, %76, %cst_40 [1] : vector<256x4xf32> to vector<256xf32>
      %78 = vector.shape_cast %77 : vector<256xf32> to vector<256x1xf32>
      %79 = vector.broadcast %78 : vector<256x1xf32> to vector<256x4xf32>
      %80 = arith.divf %76, %79 : vector<256x4xf32>
      %c0_41 = arith.constant 0 : index
      %c0_42 = arith.constant 0 : index
      %81 = vector.load %arg10[%c0_41, %c0_42] : memref<256x4xf32, #tpu.memory_space<vmem>>, vector<256x4xf32>
      tpu.vector_store %arg10[%c0_41, %c0_42], %80 {strides = array<i32>} : memref<256x4xf32, #tpu.memory_space<vmem>>, vector<256x4xf32>,
      %cst_43 = arith.constant 0.000000e+00 : f32
      %82 = vector.broadcast %cst_43 : f32 to vector<256x128xf32>
      %c0_44 = arith.constant 0 : index
      %c0_45 = arith.constant 0 : index
      %83 = vector.load %arg11[%c0_44, %c0_45] : memref<256x128xf32, #tpu.memory_space<vmem>>, vector<256x128xf32>
      tpu.vector_store %arg11[%c0_44, %c0_45], %82 {strides = array<i32>} : memref<256x128xf32, #tpu.memory_space<vmem>>, vector<256x128xf32>,
    } else {
    }
    %c0 = arith.constant 0 : index
    %c0_1 = arith.constant 0 : index
    %3 = vector.load %arg2[%c0, %c0_1] : memref<256x128xf32, #tpu.memory_space<vmem>>, vector<256x128xf32>
    %4 = arith.truncf %3 : vector<256x128xf32> to vector<256x128xbf16>
    %c0_2 = arith.constant 0 : index
    %c0_3 = arith.constant 0 : index
    %c0_4 = arith.constant 0 : index
    %5 = vector.load %arg5[%c0_2, %c0_3, %c0_4] : memref<1x128x512xbf16, #tpu.memory_space<vmem>>, vector<1x128x512xbf16>
    %6 = vector.shape_cast %5 : vector<1x128x512xbf16> to vector<128x512xbf16>
    %c0_5 = arith.constant 0 : index
    %c0_6 = arith.constant 0 : index
    %c0_7 = arith.constant 0 : index
    %7 = vector.load %arg7[%c0_5, %c0_6, %c0_7] : memref<1x512x128xbf16, #tpu.memory_space<vmem>>, vector<1x512x128xbf16>
    %8 = vector.shape_cast %7 : vector<1x512x128xbf16> to vector<512x128xbf16>
    %c0_8 = arith.constant 0 : index
    %c0_9 = arith.constant 0 : index
    %c0_10 = arith.constant 0 : index
    %9 = vector.load %arg6[%c0_8, %c0_9, %c0_10] : memref<1x1x512xf32, #tpu.memory_space<vmem>>, vector<1x1x512xf32>
    %10 = vector.shape_cast %9 : vector<1x1x512xf32> to vector<1x512xf32>
    %c0_11 = arith.constant 0 : index
    %c0_12 = arith.constant 0 : index
    %c0_13 = arith.constant 0 : index
    %11 = vector.load %arg8[%c0_11, %c0_12, %c0_13] : memref<1x1x128xf32, #tpu.memory_space<vmem>>, vector<1x1x128xf32>
    %12 = vector.shape_cast %11 : vector<1x1x128xf32> to vector<1x128xf32>
    %cst = arith.constant dense<0.000000e+00> : vector<256x512xf32>
    %13 = tpu.matmul %4, %6, %cst {dimension_numbers = #tpu.dot_dimension_numbers<[1], [0], [0], [1], [0, 0, 1, 1], [], []>} : vector<256x128xbf16>, vector<128x512xbf16>, vector<256x512xf32> -> vector<256x512xf32>
    %14 = vector.broadcast %10 : vector<1x512xf32> to vector<256x512xf32>
    %15 = arith.addf %13, %14 : vector<256x512xf32>
    %cst_14 = arith.constant 0.000000e+00 : f32
    %16 = vector.broadcast %cst_14 : f32 to vector<256x512xf32>
    %17 = arith.maximumf %15, %16 : vector<256x512xf32>
    %18 = arith.truncf %17 : vector<256x512xf32> to vector<256x512xbf16>
    %cst_15 = arith.constant dense<0.000000e+00> : vector<256x128xf32>
    %19 = tpu.matmul %18, %8, %cst_15 {dimension_numbers = #tpu.dot_dimension_numbers<[1], [0], [0], [1], [0, 0, 1, 1], [], []>} : vector<256x512xbf16>, vector<512x128xbf16>, vector<256x128xf32> -> vector<256x128xf32>
    %20 = vector.broadcast %12 : vector<1x128xf32> to vector<256x128xf32>
    %21 = arith.addf %19, %20 : vector<256x128xf32>
    %22 = tpu.iota {dimensions = array<i32: 1>} : vector<256x4xi32>
    %23 = vector.broadcast %arg1 : i32 to vector<256x4xi32>
    %24 = arith.cmpi eq, %22, %23 : vector<256x4xi32>
    %c0_16 = arith.constant 0 : index
    %c0_17 = arith.constant 0 : index
    %25 = vector.load %arg10[%c0_16, %c0_17] : memref<256x4xf32, #tpu.memory_space<vmem>>, vector<256x4xf32>
    %cst_18 = arith.constant 0.000000e+00 : f32
    %26 = vector.broadcast %cst_18 : f32 to vector<256x4xf32>
    %27 = arith.select %24, %25, %26 : vector<256x4xi1>, vector<256x4xf32>
    %cst_19 = arith.constant dense<0.000000e+00> : vector<256xf32>
    %28 = vector.multi_reduction <add>, %27, %cst_19 [1] : vector<256x4xf32> to vector<256xf32>
    %29 = vector.shape_cast %28 : vector<256xf32> to vector<256x1xf32>
    %c0_20 = arith.constant 0 : index
    %c0_21 = arith.constant 0 : index
    %30 = vector.load %arg11[%c0_20, %c0_21] : memref<256x128xf32, #tpu.memory_space<vmem>>, vector<256x128xf32>
    %31 = vector.broadcast %29 : vector<256x1xf32> to vector<256x128xf32>
    %32 = arith.mulf %31, %21 : vector<256x128xf32>
    %33 = arith.addf %30, %32 : vector<256x128xf32>
    %c0_22 = arith.constant 0 : index
    %c0_23 = arith.constant 0 : index
    %34 = vector.load %arg11[%c0_22, %c0_23] : memref<256x128xf32, #tpu.memory_space<vmem>>, vector<256x128xf32>
    tpu.vector_store %arg11[%c0_22, %c0_23], %33 {strides = array<i32>} : memref<256x128xf32, #tpu.memory_space<vmem>>, vector<256x128xf32>,
    %c3_i32 = arith.constant 3 : i32
    %35 = arith.cmpi eq, %arg1, %c3_i32 : i32
    %36 = arith.extui %35 : i1 to i32
    %c0_i32_24 = arith.constant 0 : i32
    %37 = arith.cmpi ne, %36, %c0_i32_24 : i32
    scf.if %37 {
      %c0_25 = arith.constant 0 : index
      %c0_26 = arith.constant 0 : index
      %38 = vector.load %arg11[%c0_25, %c0_26] : memref<256x128xf32, #tpu.memory_space<vmem>>, vector<256x128xf32>
      %c0_27 = arith.constant 0 : index
      %c0_28 = arith.constant 0 : index
      %39 = vector.load %arg9[%c0_27, %c0_28] : memref<256x128xf32, #tpu.memory_space<vmem>>, vector<256x128xf32>
      tpu.vector_store %arg9[%c0_27, %c0_28], %38 {strides = array<i32>} : memref<256x128xf32, #tpu.memory_space<vmem>>, vector<256x128xf32>,
    } else {
    }
    return
  }
  func.func @transform_0(%arg0: i32, %arg1: i32) -> (i32, i32) {
    %c0_i32 = arith.constant 0 : i32
    %c0_i32_0 = arith.constant 0 : i32
    return %arg0, %c0_i32 : i32, i32
  }
  func.func @transform_1(%arg0: i32, %arg1: i32) -> (i32, i32) {
    %c0_i32 = arith.constant 0 : i32
    %c0_i32_0 = arith.constant 0 : i32
    %c0_i32_1 = arith.constant 0 : i32
    return %c0_i32, %c0_i32_0 : i32, i32
  }
  func.func @transform_2(%arg0: i32, %arg1: i32) -> (i32, i32) {
    %c0_i32 = arith.constant 0 : i32
    %c0_i32_0 = arith.constant 0 : i32
    %c0_i32_1 = arith.constant 0 : i32
    return %c0_i32, %c0_i32_0 : i32, i32
  }
  func.func @transform_3(%arg0: i32, %arg1: i32) -> (i32, i32, i32) {
    %c0_i32 = arith.constant 0 : i32
    %c0_i32_0 = arith.constant 0 : i32
    %c0_i32_1 = arith.constant 0 : i32
    return %arg1, %c0_i32, %c0_i32_0 : i32, i32, i32
  }
  func.func @transform_4(%arg0: i32, %arg1: i32) -> (i32, i32, i32) {
    %c0_i32 = arith.constant 0 : i32
    %c0_i32_0 = arith.constant 0 : i32
    %c0_i32_1 = arith.constant 0 : i32
    return %arg1, %c0_i32, %c0_i32_0 : i32, i32, i32
  }
  func.func @transform_5(%arg0: i32, %arg1: i32) -> (i32, i32, i32) {
    %c0_i32 = arith.constant 0 : i32
    %c0_i32_0 = arith.constant 0 : i32
    %c0_i32_1 = arith.constant 0 : i32
    return %arg1, %c0_i32, %c0_i32_0 : i32, i32, i32
  }
  func.func @transform_6(%arg0: i32, %arg1: i32) -> (i32, i32, i32) {
    %c0_i32 = arith.constant 0 : i32
    %c0_i32_0 = arith.constant 0 : i32
    %c0_i32_1 = arith.constant 0 : i32
    return %arg1, %c0_i32, %c0_i32_0 : i32, i32, i32
  }
  func.func @transform_7(%arg0: i32, %arg1: i32) -> (i32, i32) {
    %c0_i32 = arith.constant 0 : i32
    %c0_i32_0 = arith.constant 0 : i32
    return %arg0, %c0_i32 : i32, i32
  }
}

</mosaic_0001>

<bundles_post_ra>
// kernel: tpu_custom_call.1
= control target key start
LH: loop header
LB: loop body
LE: loop exit
PB: predicated region body
PF: predicated region fallthrough
CT: control target
= control target key end

     0   :  { %12 = vsyncpa [#allocation5], 0  ;;  %s8073_s0 = inlined_call_operand.hbm [shape: f32[256,128], index: 0, kind: input, shape index: {}]   ;;  %s8074_s1 = inlined_call_operand.vmem [shape: f32[128,4], index: 1, kind: input, shape index: {}]   ;;  %s8075_s2 = inlined_call_operand.vmem [shape: f32[1,4], index: 2, kind: input, shape index: {}]   ;;  %s8076_s3 = inlined_call_operand.hbm [shape: bf16[4,128,512], index: 3, kind: input, shape index: {}]   ;;  %s8077_s4 = inlined_call_operand.vmem [shape: f32[4,1,512], index: 4, kind: input, shape index: {}]   ;;  %s8078_s5 = inlined_call_operand.hbm [shape: bf16[4,512,128], index: 5, kind: input, shape index: {}]   ;;  %s8079_s6 = inlined_call_operand.vmem [shape: f32[4,1,128], index: 6, kind: input, shape index: {}]   ;;  %s8080_s7 = inlined_call_operand.hbm [shape: f32[256,128], index: 7, kind: output, shape index: {}]  }
   0x1   :  { %13 = vsyncpa [#allocation8], 0 }
   0x2   :  { %15 = vsyncpa [#allocation8 + $0x1], 0 }
   0x3   :  { %16 = vsyncpa [#allocation6], 0  ;;  %s5442_s24 = smov 0   ;;  %s5444_s25 = smov 0  }
   0x4   :  { %s5446_s26 = smov 0   ;;  %s5448_s27 = smov 0  }
   0x5   :  { %s5450_s28 = smov 0   ;;  %s5452_s29 = smov 0  }
   0x6 LB: > { %s31_s30 = sadd.s32 1, %s5382_s28  ;;  %s109_s8 = sadd.s32 1, %s5374_s26  ;;  %s5386_s29 = sphi %s5452_s29, %s22_s29   ;;  %s5382_s28 = sphi %s5450_s28, %s8461_s28   ;;  %s5378_s27 = sphi %s5448_s27, %s8460_s27   ;;  %s5374_s26 = sphi %s5446_s26, %s8459_s26   ;;  %s5370_s25 = sphi %s5444_s25, %s8458_s25   ;;  %s5366_s24 = sphi %s5442_s24, %s8457_s24  }
   0x7   : > { %p32_p0 = scmp.ge.s32.totalorder %s31_s30, 4  ;;  %p116_p1 = scmp.ne.s32.totalorder %s5374_s26, %s5370_s25 }
   0x8   : > { %p117_p2 = scmp.eq.s32.totalorder %s5386_s29, 0  ;;  %p4950_p4 = scmp.lt.s32.totalorder %s5386_s29, 4 }
   0x9   : > { %s8463_s30 = smov (%p32_p0, %s31_s30), 0  ;;  %s272_s10 = sand.u32 1, %s5386_s29  }
   0xa   : > { %p118_p3 = por %p117_p2, %p116_p1  ;;  %s106_s9 = ssub.s32 %s5382_s28, %s8463_s30 }
   0xb   : > { %p107_p5 = scmp.eq.s32.totalorder %s106_s9, 0  ;;  %s274_s11 = sand.u32 1, %s5374_s26  }
   0xc   : > { %s4540_s12 = sshll.u32 %s5382_s28, 12  ;;  %s4457_s14 = sshll.u32 %s274_s11, 8 }
   0xd   : > { %s5486_s13 = scalar_select %p107_p5, %s5374_s26, %s109_s8  }
   0xe   : > { %s282_s17 = scalar_lea.hbm %s8076_s3, %s4540_s12  ;;  %p5493_p6 = pnand %p4950_p4, %p118_p3 }
   0xf   : > { %s276_s19 = scalar_lea.vmem [#allocation7], %s4457_s14  ;;  %s5497_s21 = scalar_lea.sflag [#allocation8], %s272_s10 }
  0x10   : > { %s283_s20 = sshll.u32 %s276_s19, 4  ;;  %p5224_p7 = pneg %p5493_p6  ;;  %s284_s20 = int_to_ptr.vmem [resolvable:$true] %s283_s20 }
  0x11   : > { %s5235_s22 = scalar_lea.vmem %s284_s20, 4096  ;;  %s5388_s23 = smov [#allocation7]  }
  0x12   : > { %p5236_p8 = scmp.ne.s32.totalorder %s284_s20, %s5235_s22  ;;  %s5240_s8 = sshll.u32 %s5388_s23, 4  ;;  %s5241_s8 = int_to_ptr.vmem [resolvable:$false] %s5240_s8 }
  0x13   : > { %s5242_s9 = scalar_lea.vmem %s5241_s8, 8192  ;;  %p5243_p11 = scmp.lt.s32.totalorder %s284_s20, %s5241_s8 }
  0x14   : > { %p5238_p9 = pnand %p5236_p8, %p5224_p7  ;;  %p5244_p12 = scmp.lt.s32.totalorder %s5242_s9, %s5235_s22 }
  0x16   : > { %p5239_p10 = pneg %p5238_p9  ;;  %p5245_p13 = por %p5244_p12, %p5243_p11 }
  0x18   : > { %p5246_p0 = pnand %p5245_p13, %p5239_p10 }
  0x1a   : > { %5249 = shalt.err (!%p5246_p0)
}
  0x1b   : > { %s5389_s11 = smov 256   ;;  %s5390_s10 = smov 16  }
  0x1c   : > { %4945 = dma.hbm_to_vmem [thread:$0]  (!%p5493_p6), %s282_s17, 4096, %s284_s20, %s5497_s21, %s5389_s11, %s5389_s11, %s5390_s10  }
  0x1d   : > { %s5512_s19 = scalar_lea.hbm %s8078_s5, %s4540_s12  ;;  %s304_s22 = scalar_lea.vmem [#allocation9], %s4457_s14 }
  0x1e   : > { %s311_s23 = sshll.u32 %s304_s22, 4  ;;  %s5517_s8 = sadd.s32 4294967295, %s5386_s29   ;;  %s5514_s23 = int_to_ptr.vmem [resolvable:$true] %s311_s23 }
  0x1f   : > { %p122_p1 = scmp.ne.s32.totalorder %s5370_s25, %s5366_s24  ;;  %p123_p2 = scmp.eq.s32.totalorder %s5517_s8, 0 }
  0x20   : > { %p4454_p3 = scmp.ge.s32.totalorder %s5386_s29, 1  ;;  %p237_p4 = scmp.lt.s32.totalorder %s5386_s29, 5 }
  0x21   : > { %p5526_p5 = por %p123_p2, %p122_p1  ;;  %s5391_s17 = smov [#allocation4]  }
  0x22   : > { %p5530_p8 = pnand %p4454_p3, %p237_p4  ;;  %s252_s20 = sshll.u32 %s5391_s17, 4  ;;  %s5536_s20 = int_to_ptr.vmem [resolvable:$true] %s252_s20 }
  0x23   : > { %s5263_s9 = scalar_lea.vmem %s5514_s23, 4096  ;;  %s5392_s11 = smov [#allocation9]  }
  0x24   : > { %p4938_p9 = pneg %p5530_p8  ;;  %p5264_p11 = scmp.ne.s32.totalorder %s5514_s23, %s5263_s9 }
  0x25   : > { %s5268_s10 = sshll.u32 %s5392_s11, 4  ;;  %s5269_s10 = int_to_ptr.vmem [resolvable:$false] %s5268_s10 }
  0x26   : > { %p5540_p10 = pnand %p4938_p9, %p123_p2  ;;  %p5266_p12 = pnand %p5264_p11, %p5224_p7 }
  0x27   : > { %s5270_s15 = scalar_lea.vmem %s5269_s10, 8192  ;;  %p5271_p0 = scmp.lt.s32.totalorder %s5514_s23, %s5269_s10 }
  0x28   : > { %p5267_p13 = pneg %p5266_p12  ;;  %p5272_p1 = scmp.lt.s32.totalorder %s5270_s15, %s5263_s9 }
  0x2a   : > { %p5273_p3 = por %p5272_p1, %p5271_p0 }
  0x2c   : > { %p5274_p4 = pnand %p5273_p3, %p5267_p13 }
  0x2e   : > { %5277 = shalt.err (!%p5274_p4)
}
  0x2f   : > { %s5393_s16 = smov 64   ;;  %s5394_s22 = smov 4  }
  0x30   : > { %4948 = dma.hbm_to_vmem [thread:$0]  (!%p5493_p6), %s5512_s19, 4096, %s5514_s23, %s5497_s21, %s5393_s16, %s5393_s16, %s5394_s22  }
  0x31   : > { %p5280_p7 = pneg %p5540_p10  ;;  %s5289_s17 = scalar_lea.vmem %s5536_s20, 4096 }
  0x32   : > { %p5290_p9 = scmp.ne.s32.totalorder %s5536_s20, %s5289_s17  ;;  %p5297_p13 = scmp.lt.s32.totalorder %s5536_s20, %s5536_s20 }
  0x33   : > { %p5298_p0 = scmp.lt.s32.totalorder %s5289_s17, %s5289_s17 }
  0x34   : > { %p5292_p11 = pnand %p5290_p9, %p5280_p7 }
  0x35   : > { %p5299_p1 = por %p5298_p0, %p5297_p13 }
  0x36   : > { %p5293_p12 = pneg %p5292_p11 }
  0x38   : > { %p5300_p3 = pnand %p5299_p1, %p5293_p12 }
  0x3a   : > { %5303 = shalt.err (!%p5300_p3)
}
  0x3b   : > { %s5395_s9 = smov 128   ;;  %s5396_s11 = smov 8  }
  0x3c   : > { %4941 = dma.hbm_to_vmem [thread:$0]  (!%p5540_p10), %s8073_s0, 4096, %s5536_s20, [#allocation5], %s5395_s9, %s5395_s9, %s5396_s11  }
  0x3d   : > { %329 = sbr.rel (%p5530_p8) target bundleno = 2151 (0x867), region = 48 }
  0x42   : > { %5353 = dma.done.wait (%p123_p2), [#allocation5], 4096  }
  0x43   : > { %5355 = vsyncadd (%p123_p2), [#allocation5], 4294963200  ;;  %s335_s21 = sand.u32 1, %s5517_s8   ;;  %s337_s19 = sand.u32 1, %s5370_s25  }
  0x44   : > { %s4465_s23 = sshll.u32 %s337_s19, 8  ;;  %s336_s24 = scalar_lea.sflag [#allocation8], %s335_s21 }
  0x45   : > { %s5575_s15 = scalar_lea.vmem [#allocation7], %s4465_s23 }
  0x46   : > { %5357 = dma.done.wait (%p5526_p5), %s336_s24, 8192  }
  0x47   : > { %5359 = vsyncadd (%p5526_p5), %s336_s24, 4294959104  ;;  %p387_p6 = scmp.lt.s32.totalorder %s5378_s27, 3  ;;  %s5595_s18 = scalar_lea.vmem [#allocation9], %s4465_s23 }
  0x48   : > { %p4468_p2 = scmp.ne.s32.totalorder %s5378_s27, 0 }
  0x49   : > { %s5583_s14 = scalar_select %p387_p6, %s5378_s27, 3 }
  0x4a   : > { %399 = sbr.rel (%p4468_p2) target bundleno = 1548 (0x60c), region = 64 }
  0x4b   : > { %s4467_s20 = sshll.u32 %s5583_s14, 2  ;;  %s393_s17 = scalar_lea.vmem %s8079_s6, %s5583_s14 }
  0x4c   : > { %s5593_s10 = scalar_lea.vmem %s8077_s4, %s4467_s20 }
  0x4f   : > { %v447_v0 = vld [vmem:[%s8074_s1 + $0x78] sm:$0xff]  ;;  %v446_v1 = vld [vmem:[%s8074_s1 + $0x70] sm:$0xff]  ;;  %v445_v2 = vld [vmem:[%s8074_s1 + $0x68] sm:$0xff]  ;;  %vm682_vm0 = vcmask 31744  }
  0x50   : > { %4814 = vmatprep.subr.mxu0 %v447_v0  ;;  %4894 = vmatprep.subr.mxu1 %v447_v0  ;;  %v444_v3 = vld [vmem:[%s8074_s1 + $0x60] sm:$0xff]  ;;  %v443_v4 = vld [vmem:[%s8074_s1 + $0x58] sm:$0xff]  ;;  %v442_v5 = vld [vmem:[%s8074_s1 + $0x50] sm:$0xff] }
  0x51   : > { %4815 = vmatpush3.msra.mxu0 %v447_v0  ;;  %4910 = vmatpush3.msra.mxu1 %v447_v0  ;;  %v441_v6 = vld [vmem:[%s8074_s1 + $0x48] sm:$0xff]  ;;  %v440_v7 = vld [vmem:[%s8074_s1 + $0x40] sm:$0xff]  ;;  %v439_v8 = vld [vmem:[%s8074_s1 + $0x38] sm:$0xff] }
  0x52   : > { %4816 = vmatprep.subr.mxu0 %v446_v1  ;;  %4895 = vmatprep.subr.mxu1 %v446_v1  ;;  %v438_v9 = vld [vmem:[%s8074_s1 + $0x30] sm:$0xff]  ;;  %v437_v10 = vld [vmem:[%s8074_s1 + $0x28] sm:$0xff]  ;;  %v436_v11 = vld [vmem:[%s8074_s1 + $0x20] sm:$0xff] }
  0x53   : > { %4817 = vmatpush3.msra.mxu0 %v446_v1  ;;  %4911 = vmatpush3.msra.mxu1 %v446_v1  ;;  %v435_v12 = vld [vmem:[%s8074_s1 + $0x18] sm:$0xff]  ;;  %v434_v13 = vld [vmem:[%s8074_s1 + $0x10] sm:$0xff]  ;;  %v433_v14 = vld [vmem:[%s8074_s1 + $0x8] sm:$0xff] }
  0x54   : > { %4818 = vmatprep.subr.mxu0 %v445_v2  ;;  %4896 = vmatprep.subr.mxu1 %v445_v2  ;;  %v432_v15 = vld [vmem:[%s8074_s1] sm:$0xff]  ;;  %v401_v18 = vld [vmem:[#allocation4 + $0x8] sm:$0xff]  ;;  %v402_v20 = vld [vmem:[#allocation4 + $0x10] sm:$0xff] }
  0x55   : > { %4819 = vmatpush3.msra.mxu0 %v445_v2  ;;  %4912 = vmatpush3.msra.mxu1 %v445_v2  ;;  %v400_v16 = vld [vmem:[#allocation4] sm:$0xff]  ;;  %v417_v19 = vld [vmem:[#allocation4 + $0x88] sm:$0xff]  ;;  %v418_v21 = vld [vmem:[#allocation4 + $0x90] sm:$0xff] }
  0x56   : > { %4820 = vmatprep.subr.mxu0 %v444_v3  ;;  %4897 = vmatprep.subr.mxu1 %v444_v3  ;;  %v416_v17 = vld [vmem:[#allocation4 + $0x80] sm:$0xff]  ;;  %v403_v22 = vld [vmem:[#allocation4 + $0x18] sm:$0xff]  ;;  %v405_v26 = vld [vmem:[#allocation4 + $0x28] sm:$0xff] }
  0x57   : > { %4821 = vmatpush3.msra.mxu0 %v444_v3  ;;  %4913 = vmatpush3.msra.mxu1 %v444_v3  ;;  %v419_v23 = vld [vmem:[#allocation4 + $0x98] sm:$0xff]  ;;  %v404_v24 = vld [vmem:[#allocation4 + $0x20] sm:$0xff]  ;;  %v421_v27 = vld [vmem:[#allocation4 + $0xa8] sm:$0xff] }
  0x58   : > { %4822 = vmatprep.subr.mxu0 %v443_v4  ;;  %4898 = vmatprep.subr.mxu1 %v443_v4  ;;  %v420_v25 = vld [vmem:[#allocation4 + $0xa0] sm:$0xff]  ;;  %v406_v28 = vld [vmem:[#allocation4 + $0x30] sm:$0xff]  ;;  %v407_v30 = vld [vmem:[#allocation4 + $0x38] sm:$0xff] }
  0x59   : > { %4823 = vmatpush3.msra.mxu0 %v443_v4  ;;  %4914 = vmatpush3.msra.mxu1 %v443_v4  ;;  %v422_v29 = vld [vmem:[#allocation4 + $0xb0] sm:$0xff]  ;;  %v423_v31 = vld [vmem:[#allocation4 + $0xb8] sm:$0xff]  ;;  %v408_v32 = vld [vmem:[#allocation4 + $0x40] sm:$0xff] }
  0x5a   : > { %4824 = vmatprep.subr.mxu0 %v442_v5  ;;  %4899 = vmatprep.subr.mxu1 %v442_v5  ;;  %v424_v33 = vld [vmem:[#allocation4 + $0xc0] sm:$0xff]  ;;  %v409_v34 = vld [vmem:[#allocation4 + $0x48] sm:$0xff]  ;;  %v410_v36 = vld [vmem:[#allocation4 + $0x50] sm:$0xff] }
  0x5b   : > { %4825 = vmatpush3.msra.mxu0 %v442_v5  ;;  %4915 = vmatpush3.msra.mxu1 %v442_v5  ;;  %v425_v35 = vld [vmem:[#allocation4 + $0xc8] sm:$0xff]  ;;  %v426_v37 = vld [vmem:[#allocation4 + $0xd0] sm:$0xff]  ;;  %v411_v38 = vld [vmem:[#allocation4 + $0x58] sm:$0xff] }
  0x5c   : > { %4826 = vmatprep.subr.mxu0 %v441_v6  ;;  %4900 = vmatprep.subr.mxu1 %v441_v6  ;;  %v427_v39 = vld [vmem:[#allocation4 + $0xd8] sm:$0xff]  ;;  %v412_v40 = vld [vmem:[#allocation4 + $0x60] sm:$0xff]  ;;  %v413_v42 = vld [vmem:[#allocation4 + $0x68] sm:$0xff] }
  0x5d   : > { %4827 = vmatpush3.msra.mxu0 %v441_v6  ;;  %4916 = vmatpush3.msra.mxu1 %v441_v6  ;;  %v428_v41 = vld [vmem:[#allocation4 + $0xe0] sm:$0xff]  ;;  %v429_v43 = vld [vmem:[#allocation4 + $0xe8] sm:$0xff]  ;;  %v414_v44 = vld [vmem:[#allocation4 + $0x70] sm:$0xff] }
  0x5e   : > { %4828 = vmatprep.subr.mxu0 %v440_v7  ;;  %4901 = vmatprep.subr.mxu1 %v440_v7  ;;  %v430_v45 = vld [vmem:[#allocation4 + $0xf0] sm:$0xff]  ;;  %v415_v46 = vld [vmem:[#allocation4 + $0x78] sm:$0xff]  ;;  %v5649_v48 = vld [vmem:[%s8075_s2] ss:$0 sm:$0xff] }
  0x5f   : > { %4829 = vmatpush3.msra.mxu0 %v440_v7  ;;  %4917 = vmatpush3.msra.mxu1 %v440_v7  ;;  %v431_v47 = vld [vmem:[#allocation4 + $0xf8] sm:$0xff] }
  0x60   : > { %4830 = vmatprep.subr.mxu0 %v439_v8  ;;  %4902 = vmatprep.subr.mxu1 %v439_v8 }
  0x61   : > { %4831 = vmatpush3.msra.mxu0 %v439_v8  ;;  %4918 = vmatpush3.msra.mxu1 %v439_v8 }
  0x62   : > { %4832 = vmatprep.subr.mxu0 %v438_v9  ;;  %4903 = vmatprep.subr.mxu1 %v438_v9 }
  0x63   : > { %4833 = vmatpush3.msra.mxu0 %v438_v9  ;;  %4919 = vmatpush3.msra.mxu1 %v438_v9 }
  0x64   : > { %4834 = vmatprep.subr.mxu0 %v437_v10  ;;  %4904 = vmatprep.subr.mxu1 %v437_v10 }
  0x65   : > { %4835 = vmatpush3.msra.mxu0 %v437_v10  ;;  %4920 = vmatpush3.msra.mxu1 %v437_v10 }
  0x66   : > { %4836 = vmatprep.subr.mxu0 %v436_v11  ;;  %4905 = vmatprep.subr.mxu1 %v436_v11 }
  0x67   : > { %4837 = vmatpush3.msra.mxu0 %v436_v11  ;;  %4921 = vmatpush3.msra.mxu1 %v436_v11 }
  0x68   : > { %4838 = vmatprep.subr.mxu0 %v435_v12  ;;  %4906 = vmatprep.subr.mxu1 %v435_v12 }
  0x69   : > { %4839 = vmatpush3.msra.mxu0 %v435_v12  ;;  %4922 = vmatpush3.msra.mxu1 %v435_v12 }
  0x6a   : > { %4840 = vmatprep.subr.mxu0 %v434_v13  ;;  %4907 = vmatprep.subr.mxu1 %v434_v13 }
  0x6b   : > { %4841 = vmatpush3.msra.mxu0 %v434_v13  ;;  %4923 = vmatpush3.msra.mxu1 %v434_v13 }
  0x6c   : > { %4842 = vmatprep.subr.mxu0 %v433_v14  ;;  %4908 = vmatprep.subr.mxu1 %v433_v14 }
  0x6d   : > { %4843 = vmatpush3.msra.mxu0 %v433_v14  ;;  %4924 = vmatpush3.msra.mxu1 %v433_v14 }
  0x6e   : > { %4844 = vmatprep.subr.mxu0 %v432_v15  ;;  %4909 = vmatprep.subr.mxu1 %v432_v15 }
  0x6f   : > { %4845 = vmatpush3.msra.mxu0 %v432_v15  ;;  %4925 = vmatpush3.msra.mxu1 %v432_v15 }
  0x70   : > { %4846 = vmatprep.mubr.f32.mxu0 %v400_v16  ;;  %4870 = vmatprep.mubr.f32.mxu1 %v416_v17 }
  0x71   : > { %4847 = vmatmul.mubr.f32.vlgmr.msra.gmra.mxu0 %v401_v18  ;;  %4871 = vmatmul.mubr.f32.vlgmr.msra.gmra.mxu1 %v417_v19 }
  0x72   : > { %4849 = vmatprep.mubr.f32.mxu0 %v402_v20  ;;  %4873 = vmatprep.mubr.f32.mxu1 %v418_v21 }
  0x75   : > { %4850 = vmatmul.mubr.f32.gmra.mxu0 %v403_v22  ;;  %4874 = vmatmul.mubr.f32.gmra.mxu1 %v419_v23 }
  0x76   : > { %4852 = vmatprep.mubr.f32.mxu0 %v404_v24  ;;  %4876 = vmatprep.mubr.f32.mxu1 %v420_v25 }
  0x79   : > { %4853 = vmatmul.mubr.f32.gmra.mxu0 %v405_v26  ;;  %4877 = vmatmul.mubr.f32.gmra.mxu1 %v421_v27 }
  0x7a   : > { %4855 = vmatprep.mubr.f32.mxu0 %v406_v28  ;;  %4879 = vmatprep.mubr.f32.mxu1 %v422_v29 }
  0x7d   : > { %4856 = vmatmul.mubr.f32.gmra.mxu0 %v407_v30  ;;  %4880 = vmatmul.mubr.f32.gmra.mxu1 %v423_v31 }
  0x7e   : > { %4858 = vmatprep.mubr.f32.mxu0 %v408_v32  ;;  %4882 = vmatprep.mubr.f32.mxu1 %v424_v33 }
  0x81   : > { %4859 = vmatmul.mubr.f32.gmra.mxu0 %v409_v34  ;;  %4883 = vmatmul.mubr.f32.gmra.mxu1 %v425_v35 }
  0x82   : > { %4861 = vmatprep.mubr.f32.mxu0 %v410_v36  ;;  %4885 = vmatprep.mubr.f32.mxu1 %v426_v37 }
  0x85   : > { %4862 = vmatmul.mubr.f32.gmra.mxu0 %v411_v38  ;;  %4886 = vmatmul.mubr.f32.gmra.mxu1 %v427_v39 }
  0x86   : > { %4864 = vmatprep.mubr.f32.mxu0 %v412_v40  ;;  %4888 = vmatprep.mubr.f32.mxu1 %v428_v41 }
  0x89   : > { %4865 = vmatmul.mubr.f32.gmra.mxu0 %v413_v42  ;;  %4889 = vmatmul.mubr.f32.gmra.mxu1 %v429_v43 }
  0x8a   : > { %4867 = vmatprep.mubr.f32.mxu0 %v414_v44  ;;  %4891 = vmatprep.mubr.f32.mxu1 %v430_v45 }
  0x8d   : > { %4868 = vmatmul.mubr.f32.gmra.mxu0 %v415_v46  ;;  %4892 = vmatmul.mubr.f32.gmra.mxu1 %v431_v47 }
 0x131   : > { %v4848_v49 = vpop.f32.mrf.mxu0  ;;  %v4872_v50 = vpop.f32.mrf.mxu1 }
 0x132   : > { %v5652_v51 = vadd.f32 %v4848_v49, %v5649_v48  ;;  %v5655_v52 = vadd.f32 %v4872_v50, %v5649_v48 }
 0x133   : > { %v521_v53 = vpop.f32.mrf.mxu0  ;;  %v601_v54 = vpop.f32.mrf.mxu1 }
 0x134   : > { %8227 = vst [vmem:[#allocation14_spill] sm:$0xff] %v5652_v51  ;;  %8228 = vst [vmem:[#allocation15_spill] sm:$0xff] %v5655_v52  ;;  %v5658_v55 = vadd.f32 %v5649_v48, %v521_v53  ;;  %v734_v56 = vsel %vm682_vm0, %v5655_v52, -inf  ;;  %v686_v57 = vsel %vm682_vm0, %v5652_v51, -inf  ;;  %v5671_v63 = vadd.f32 %v5649_v48, %v601_v54 }
 0x135   : > { %735 = vmax.xlane.f32.xlu1 %v734_v56  ;;  %687 = vmax.xlane.f32.xlu0 %v686_v57  ;;  %v4851_v58 = vpop.f32.mrf.mxu0  ;;  %v4875_v59 = vpop.f32.mrf.mxu1 }
 0x136   : > { %8229 = vst [vmem:[#allocation16_spill] sm:$0xff] %v5658_v55  ;;  %v5665_v60 = vadd.f32 %v4851_v58, %v5649_v48  ;;  %v5668_v61 = vadd.f32 %v4875_v59, %v5649_v48  ;;  %8232 = vst [vmem:[#allocation19_spill] sm:$0xff] %v5671_v63  ;;  %v683_v1 = vsel %vm682_vm0, %v5658_v55, -inf  ;;  %v731_v9 = vsel %vm682_vm0, %v5671_v63, -inf }
 0x137   : > { %v531_v62 = vpop.f32.mrf.mxu0  ;;  %v611_v2 = vpop.f32.mrf.mxu1 }
 0x138   : > { %8230 = vst [vmem:[#allocation17_spill] sm:$0xff] %v5665_v60  ;;  %8231 = vst [vmem:[#allocation18_spill] sm:$0xff] %v5668_v61  ;;  %v692_v0 = vsel %vm682_vm0, %v5665_v60, -inf  ;;  %v740_v4 = vsel %vm682_vm0, %v5668_v61, -inf  ;;  %v5680_v7 = vadd.f32 %v5649_v48, %v531_v62  ;;  %v5683_v8 = vadd.f32 %v5649_v48, %v611_v2 }
 0x139   : > { %693 = vmax.xlane.f32.xlu1 %v692_v0  ;;  %684 = vmax.xlane.f32.xlu0 %v683_v1  ;;  %v4854_v3 = vpop.f32.mrf.mxu0  ;;  %v4878_v6 = vpop.f32.mrf.mxu1 }
 0x13a   : > { %8233 = vst [vmem:[#allocation20_spill] sm:$0xff] %v5680_v7  ;;  %8234 = vst [vmem:[#allocation21_spill] sm:$0xff] %v5683_v8  ;;  %v5688_v10 = vadd.f32 %v4854_v3, %v5649_v48  ;;  %v689_v14 = vsel %vm682_vm0, %v5680_v7, -inf  ;;  %v737_v15 = vsel %vm682_vm0, %v5683_v8, -inf  ;;  %v5698_v16 = vadd.f32 %v4878_v6, %v5649_v48 }
 0x13b   : > { %v541_v5 = vpop.f32.mrf.mxu0  ;;  %v621_v12 = vpop.f32.mrf.mxu1 }
 0x13c   : > { %8235 = vst [vmem:[#allocation22_spill] sm:$0xff] %v5688_v10  ;;  %v5691_v11 = vadd.f32 %v5649_v48, %v541_v5  ;;  %8237 = vst [vmem:[#allocation24_spill] sm:$0xff] %v5698_v16  ;;  %v5701_v17 = vadd.f32 %v5649_v48, %v621_v12  ;;  %v698_v18 = vsel %vm682_vm0, %v5688_v10, -inf  ;;  %v746_v24 = vsel %vm682_vm0, %v5698_v16, -inf }
 0x13d   : > { %741 = vmax.xlane.f32.xlu1 %v740_v4  ;;  %732 = vmax.xlane.f32.xlu0 %v731_v9  ;;  %v4857_v13 = vpop.f32.mrf.mxu0  ;;  %v4881_v21 = vpop.f32.mrf.mxu1 }
 0x13e   : > { %8236 = vst [vmem:[#allocation23_spill] sm:$0xff] %v5691_v11  ;;  %8238 = vst [vmem:[#allocation25_spill] sm:$0xff] %v5701_v17  ;;  %v695_v19 = vsel %vm682_vm0, %v5691_v11, -inf  ;;  %v5708_v22 = vadd.f32 %v4857_v13, %v5649_v48  ;;  %v743_v25 = vsel %vm682_vm0, %v5701_v17, -inf  ;;  %v5718_v28 = vadd.f32 %v4881_v21, %v5649_v48 }
 0x13f   : > { %v551_v20 = vpop.f32.mrf.mxu0  ;;  %v631_v26 = vpop.f32.mrf.mxu1 }
 0x140   : > { %8239 = vst [vmem:[#allocation26_spill] sm:$0xff] %v5708_v22  ;;  %v5711_v23 = vadd.f32 %v5649_v48, %v551_v20  ;;  %8241 = vst [vmem:[#allocation28_spill] sm:$0xff] %v5718_v28  ;;  %v5721_v29 = vadd.f32 %v5649_v48, %v631_v26  ;;  %v704_v30 = vsel %vm682_vm0, %v5708_v22, -inf  ;;  %v752_v36 = vsel %vm682_vm0, %v5718_v28, -inf }
 0x141   : > { %690 = vmax.xlane.f32.xlu1 %v689_v14  ;;  %738 = vmax.xlane.f32.xlu0 %v737_v15  ;;  %v4860_v27 = vpop.f32.mrf.mxu0  ;;  %v4884_v33 = vpop.f32.mrf.mxu1 }
 0x142   : > { %8240 = vst [vmem:[#allocation27_spill] sm:$0xff] %v5711_v23  ;;  %8242 = vst [vmem:[#allocation29_spill] sm:$0xff] %v5721_v29  ;;  %v701_v31 = vsel %vm682_vm0, %v5711_v23, -inf  ;;  %v5728_v34 = vadd.f32 %v4860_v27, %v5649_v48  ;;  %v749_v37 = vsel %vm682_vm0, %v5721_v29, -inf  ;;  %v5738_v40 = vadd.f32 %v4884_v33, %v5649_v48 }
 0x143   : > { %v561_v32 = vpop.f32.mrf.mxu0  ;;  %v641_v38 = vpop.f32.mrf.mxu1 }
 0x144   : > { %8243 = vst [vmem:[#allocation30_spill] sm:$0xff] %v5728_v34  ;;  %v5731_v35 = vadd.f32 %v5649_v48, %v561_v32  ;;  %8245 = vst [vmem:[#allocation32_spill] sm:$0xff] %v5738_v40  ;;  %v5741_v41 = vadd.f32 %v5649_v48, %v641_v38  ;;  %v710_v42 = vsel %vm682_vm0, %v5728_v34, -inf  ;;  %v758_v49 = vsel %vm682_vm0, %v5738_v40, -inf }
 0x145   : > { %699 = vmax.xlane.f32.xlu1 %v698_v18  ;;  %696 = vmax.xlane.f32.xlu0 %v695_v19  ;;  %v4863_v39 = vpop.f32.mrf.mxu0  ;;  %v4887_v45 = vpop.f32.mrf.mxu1 }
 0x146   : > { %8244 = vst [vmem:[#allocation31_spill] sm:$0xff] %v5731_v35  ;;  %8246 = vst [vmem:[#allocation33_spill] sm:$0xff] %v5741_v41  ;;  %v707_v43 = vsel %vm682_vm0, %v5731_v35, -inf  ;;  %v5748_v46 = vadd.f32 %v4863_v39, %v5649_v48  ;;  %v755_v50 = vsel %vm682_vm0, %v5741_v41, -inf  ;;  %v5758_v56 = vadd.f32 %v4887_v45, %v5649_v48 }
 0x147   : > { %v571_v44 = vpop.f32.mrf.mxu0  ;;  %v651_v53 = vpop.f32.mrf.mxu1 }
 0x148   : > { %8247 = vst [vmem:[#allocation34_spill] sm:$0xff] %v5748_v46  ;;  %v5751_v47 = vadd.f32 %v5649_v48, %v571_v44  ;;  %8249 = vst [vmem:[#allocation36_spill] sm:$0xff] %v5758_v56  ;;  %v5761_v57 = vadd.f32 %v5649_v48, %v651_v53  ;;  %v716_v58 = vsel %vm682_vm0, %v5748_v46, -inf  ;;  %v764_v3 = vsel %vm682_vm0, %v5758_v56, -inf }
 0x149   : > { %747 = vmax.xlane.f32.xlu1 %v746_v24  ;;  %744 = vmax.xlane.f32.xlu0 %v743_v25  ;;  %v4866_v54 = vpop.f32.mrf.mxu0  ;;  %v4890_v0 = vpop.f32.mrf.mxu1 }
 0x14a   : > { %8248 = vst [vmem:[#allocation35_spill] sm:$0xff] %v5751_v47  ;;  %8250 = vst [vmem:[#allocation37_spill] sm:$0xff] %v5761_v57  ;;  %v713_v59 = vsel %vm682_vm0, %v5751_v47, -inf  ;;  %v5768_v1 = vadd.f32 %v4866_v54, %v5649_v48  ;;  %v761_v4 = vsel %vm682_vm0, %v5761_v57, -inf  ;;  %v5778_v9 = vadd.f32 %v4890_v0, %v5649_v48 }
 0x14b   : > { %v581_v62 = vpop.f32.mrf.mxu0  ;;  %v661_v5 = vpop.f32.mrf.mxu1 }
 0x14c   : > { %8251 = vst [vmem:[#allocation38_spill] sm:$0xff] %v5768_v1  ;;  %v5771_v2 = vadd.f32 %v5649_v48, %v581_v62  ;;  %8253 = vst [vmem:[#allocation40_spill] sm:$0xff] %v5778_v9  ;;  %v5781_v12 = vadd.f32 %v5649_v48, %v661_v5  ;;  %v722_v13 = vsel %vm682_vm0, %v5768_v1, -inf  ;;  %v770_v21 = vsel %vm682_vm0, %v5778_v9, -inf }
 0x14d   : > { %705 = vmax.xlane.f32.xlu1 %v704_v30  ;;  %702 = vmax.xlane.f32.xlu0 %v701_v31  ;;  %v4869_v6 = vpop.f32.mrf.mxu0  ;;  %v4893_v18 = vpop.f32.mrf.mxu1 }
 0x14e   : > { %8252 = vst [vmem:[#allocation39_spill] sm:$0xff] %v5771_v2  ;;  %8254 = vst [vmem:[#allocation41_spill] sm:$0xff] %v5781_v12  ;;  %v719_v14 = vsel %vm682_vm0, %v5771_v2, -inf  ;;  %v5788_v19 = vadd.f32 %v4869_v6, %v5649_v48  ;;  %v767_v24 = vsel %vm682_vm0, %v5781_v12, -inf  ;;  %v5798_v26 = vadd.f32 %v4893_v18, %v5649_v48 }
 0x14f   : > { %v591_v15 = vpop.f32.mrf.mxu0  ;;  %v671_v25 = vpop.f32.mrf.mxu1 }
 0x150   : > { %8255 = vst [vmem:[#allocation42_spill] sm:$0xff] %v5788_v19  ;;  %v5791_v20 = vadd.f32 %v5649_v48, %v591_v15  ;;  %8257 = vst [vmem:[#allocation44_spill] sm:$0xff] %v5798_v26  ;;  %v5801_v27 = vadd.f32 %v5649_v48, %v671_v25  ;;  %v728_v30 = vsel %vm682_vm0, %v5788_v19, -inf  ;;  %v776_v32 = vsel %vm682_vm0, %v5798_v26, -inf }
 0x151   : > { %753 = vmax.xlane.f32.xlu1 %v752_v36  ;;  %750 = vmax.xlane.f32.xlu0 %v749_v37  ;;  %v680_v36 = vlaneseq }
 0x152   : > { %8256 = vst [vmem:[#allocation43_spill] sm:$0xff] %v5791_v20  ;;  %8258 = vst [vmem:[#allocation45_spill] sm:$0xff] %v5801_v27  ;;  %v725_v31 = vsel %vm682_vm0, %v5791_v20, -inf  ;;  %v773_v33 = vsel %vm682_vm0, %v5801_v27, -inf }
 0x153   : > { %v5811_v37 = vand.u32 127, %v680_v36 }
 0x155   : > { %711 = vmax.xlane.f32.xlu1 %v710_v42  ;;  %708 = vmax.xlane.f32.xlu0 %v707_v43  ;;  %8259 = vst [vmem:[#allocation46_spill] sm:$0xff] %v5811_v37 }
 0x159   : > { %759 = vmax.xlane.f32.xlu1 %v758_v49  ;;  %756 = vmax.xlane.f32.xlu0 %v755_v50 }
 0x15d   : > { %717 = vmax.xlane.f32.xlu1 %v716_v58  ;;  %714 = vmax.xlane.f32.xlu0 %v713_v59 }
 0x161   : > { %765 = vmax.xlane.f32.xlu1 %v764_v3  ;;  %762 = vmax.xlane.f32.xlu0 %v761_v4 }
 0x165   : > { %723 = vmax.xlane.f32.xlu1 %v722_v13  ;;  %720 = vmax.xlane.f32.xlu0 %v719_v14 }
 0x169   : > { %771 = vmax.xlane.f32.xlu1 %v770_v21  ;;  %768 = vmax.xlane.f32.xlu0 %v767_v24 }
 0x16d   : > { %729 = vmax.xlane.f32.xlu1 %v728_v30  ;;  %726 = vmax.xlane.f32.xlu0 %v725_v31 }
 0x171   : > { %777 = vmax.xlane.f32.xlu1 %v776_v32  ;;  %774 = vmax.xlane.f32.xlu0 %v773_v33 }
 0x1be   : > { %v736_v48 = vpop.xlane.xlu1 %735  ;;  %v688_v38 = vpop.xlane.xlu0 %687 }
 0x1bf   : > { %vm796_vm1 = vcmp.eq.f32.partialorder %v5655_v52, %v736_v48  ;;  %vm780_vm2 = vcmp.eq.f32.partialorder %v5652_v51, %v688_v38 }
 0x1c0   : > { %v828_v39 = vsel %vm796_vm1, %v5811_v37, 4  ;;  %v812_v42 = vsel %vm780_vm2, %v5811_v37, 4 }
 0x1c1   : > { %v5818_v43 = vsel %vm682_vm0, %v812_v42, 2147483647  ;;  %v5821_v44 = vsel %vm682_vm0, %v828_v39, 2147483647 }
 0x1c2   : > { %v694_v45 = vpop.xlane.xlu1 %693  ;;  %v685_v49 = vpop.xlane.xlu0 %684  ;;  %v860_v50 = vshra.s32 %v5818_v43, 16  ;;  %v1100_v59 = vshra.s32 %v5821_v44, 16 }
 0x1c3   : > { %vm782_vm3 = vcmp.eq.f32.partialorder %v5665_v60, %v694_v45  ;;  %vm779_vm4 = vcmp.eq.f32.partialorder %v5658_v55, %v685_v49 }
 0x1c4   : > { %v814_v53 = vsel %vm782_vm3, %v5811_v37, 4  ;;  %v811_v54 = vsel %vm779_vm4, %v5811_v37, 4  ;;  %v5828_v58 = vcvt.s32.f32 %v860_v50  ;;  %v5844_v15 = vcvt.s32.f32 %v1100_v59 }
 0x1c5   : > { %v5832_v62 = vsel %vm682_vm0, %v811_v54, 2147483647  ;;  %v5835_v0 = vsel %vm682_vm0, %v814_v53, 2147483647 }
 0x1c6   : > { %v742_v3 = vpop.xlane.xlu1 %741  ;;  %863 = vmin.xlane.f32.xlu1 %v5828_v58  ;;  %v733_v4 = vpop.xlane.xlu0 %732  ;;  %v845_v5 = vshra.s32 %v5832_v62, 16  ;;  %v890_v6 = vshra.s32 %v5835_v0, 16 }
 0x1c7   : > { %vm798_vm5 = vcmp.eq.f32.partialorder %v5668_v61, %v742_v3  ;;  %vm795_vm6 = vcmp.eq.f32.partialorder %v5671_v63, %v733_v4 }
 0x1c8   : > { %v830_v13 = vsel %vm798_vm5, %v5811_v37, 4  ;;  %v827_v14 = vsel %vm795_vm6, %v5811_v37, 4  ;;  %v5846_v18 = vcvt.s32.f32 %v845_v5  ;;  %v5859_v32 = vcvt.s32.f32 %v890_v6 }
 0x1c9   : > { %v5849_v21 = vsel %vm682_vm0, %v827_v14, 2147483647  ;;  %v5852_v24 = vsel %vm682_vm0, %v830_v13, 2147483647 }
 0x1ca   : > { %1103 = vmin.xlane.f32.xlu1 %v5844_v15  ;;  %v691_v25 = vpop.xlane.xlu1 %690  ;;  %848 = vmin.xlane.f32.xlu0 %v5846_v18  ;;  %v739_v30 = vpop.xlane.xlu0 %738  ;;  %v1085_v31 = vshra.s32 %v5849_v21, 16  ;;  %v1130_v38 = vshra.s32 %v5852_v24, 16 }
 0x1cb   : > { %vm781_vm7 = vcmp.eq.f32.partialorder %v5680_v7, %v691_v25  ;;  %vm797_vm8 = vcmp.eq.f32.partialorder %v5683_v8, %v739_v30 }
 0x1cc   : > { %v813_v33 = vsel %vm781_vm7, %v5811_v37, 4  ;;  %v829_v36 = vsel %vm797_vm8, %v5811_v37, 4  ;;  %v5863_v48 = vcvt.s32.f32 %v1085_v31  ;;  %v5880_v3 = vcvt.s32.f32 %v1130_v38 }
 0x1cd   : > { %v5867_v39 = vsel %vm682_vm0, %v813_v33, 2147483647  ;;  %v5870_v42 = vsel %vm682_vm0, %v829_v36, 2147483647 }
 0x1ce   : > { %893 = vmin.xlane.f32.xlu1 %v5859_v32  ;;  %v700_v45 = vpop.xlane.xlu1 %699  ;;  %1088 = vmin.xlane.f32.xlu0 %v5863_v48  ;;  %v697_v49 = vpop.xlane.xlu0 %696  ;;  %v875_v50 = vshra.s32 %v5867_v39, 16  ;;  %v1115_v53 = vshra.s32 %v5870_v42, 16 }
 0x1cf   : > { %vm784_vm9 = vcmp.eq.f32.partialorder %v5688_v10, %v700_v45  ;;  %vm783_vm10 = vcmp.eq.f32.partialorder %v5691_v11, %v697_v49 }
 0x1d0   : > { %v816_v54 = vsel %vm784_vm9, %v5811_v37, 4  ;;  %v815_v59 = vsel %vm783_vm10, %v5811_v37, 4  ;;  %v5882_v4 = vcvt.s32.f32 %v875_v50  ;;  %v5895_v30 = vcvt.s32.f32 %v1115_v53 }
 0x1d1   : > { %v5885_v5 = vsel %vm682_vm0, %v816_v54, 2147483647  ;;  %v5888_v6 = vsel %vm682_vm0, %v815_v59, 2147483647 }
 0x1d2   : > { %1133 = vmin.xlane.f32.xlu1 %v5880_v3  ;;  %v748_v13 = vpop.xlane.xlu1 %747  ;;  %878 = vmin.xlane.f32.xlu0 %v5882_v4  ;;  %v745_v14 = vpop.xlane.xlu0 %744  ;;  %v920_v25 = vshra.s32 %v5885_v5, 16  ;;  %v905_v38 = vshra.s32 %v5888_v6, 16 }
 0x1d3   : > { %vm800_vm11 = vcmp.eq.f32.partialorder %v5698_v16, %v748_v13  ;;  %vm799_vm12 = vcmp.eq.f32.partialorder %v5701_v17, %v745_v14 }
 0x1d4   : > { %v832_v31 = vsel %vm800_vm11, %v5811_v37, 4  ;;  %v831_v33 = vsel %vm799_vm12, %v5811_v37, 4  ;;  %v5899_v36 = vcvt.s32.f32 %v920_v25 }
 0x1d5   : > { %v5903_v45 = vsel %vm682_vm0, %v832_v31, 2147483647  ;;  %v5906_v49 = vsel %vm682_vm0, %v831_v33, 2147483647  ;;  %v5918_v31 = vcvt.s32.f32 %v905_v38 }
 0x1d6   : > { %923 = vmin.xlane.f32.xlu1 %v5899_v36  ;;  %v706_v50 = vpop.xlane.xlu1 %705  ;;  %1118 = vmin.xlane.f32.xlu0 %v5895_v30  ;;  %v703_v53 = vpop.xlane.xlu0 %702  ;;  %v1160_v54 = vshra.s32 %v5903_v45, 16  ;;  %v1145_v59 = vshra.s32 %v5906_v49, 16 }
 0x1d7   : > { %vm786_vm13 = vcmp.eq.f32.partialorder %v5708_v22, %v706_v50  ;;  %vm785_vm14 = vcmp.eq.f32.partialorder %v5711_v23, %v703_v53 }
 0x1d8   : > { %v818_v13 = vsel %vm786_vm13, %v5811_v37, 4  ;;  %v817_v14 = vsel %vm785_vm14, %v5811_v37, 4  ;;  %v5916_v25 = vcvt.s32.f32 %v1160_v54  ;;  %v5931_v38 = vcvt.s32.f32 %v1145_v59 }
 0x1d9   : > { %v5921_v33 = vsel %vm682_vm0, %v818_v13, 2147483647  ;;  %v5924_v17 = vsel %vm682_vm0, %v817_v14, 2147483647 }
 0x1da   : > { %1163 = vmin.xlane.f32.xlu1 %v5916_v25  ;;  %v754_v50 = vpop.xlane.xlu1 %753  ;;  %908 = vmin.xlane.f32.xlu0 %v5918_v31  ;;  %v751_v53 = vpop.xlane.xlu0 %750  ;;  %v950_v23 = vshra.s32 %v5921_v33, 16  ;;  %v935_v22 = vshra.s32 %v5924_v17, 16 }
 0x1db   : > { %vm802_vm15 = vcmp.eq.f32.partialorder %v5718_v28, %v754_v50  ;;  %vm801_vm1 = vcmp.eq.f32.partialorder %v5721_v29, %v751_v53 }
 0x1dc   : > { %v834_v54 = vsel %vm802_vm15, %v5811_v37, 4  ;;  %v833_v13 = vsel %vm801_vm1, %v5811_v37, 4  ;;  %v5935_v14 = vcvt.s32.f32 %v950_v23  ;;  %v5954_v28 = vcvt.s32.f32 %v935_v22 }
 0x1dd   : > { %v5939_v11 = vsel %vm682_vm0, %v834_v54, 2147483647  ;;  %v5942_v16 = vsel %vm682_vm0, %v833_v13, 2147483647 }
 0x1de   : > { %953 = vmin.xlane.f32.xlu1 %v5935_v14  ;;  %v712_v50 = vpop.xlane.xlu1 %711  ;;  %1148 = vmin.xlane.f32.xlu0 %v5931_v38  ;;  %v709_v59 = vpop.xlane.xlu0 %708  ;;  %v1190_v53 = vshra.s32 %v5939_v11, 16  ;;  %v1175_v23 = vshra.s32 %v5942_v16, 16 }
 0x1df   : > { %vm788_vm2 = vcmp.eq.f32.partialorder %v5728_v34, %v712_v50  ;;  %vm787_vm3 = vcmp.eq.f32.partialorder %v5731_v35, %v709_v59 }
 0x1e0   : > { %v820_v54 = vsel %vm788_vm2, %v5811_v37, 4  ;;  %v819_v29 = vsel %vm787_vm3, %v5811_v37, 4  ;;  %v5952_v13 = vcvt.s32.f32 %v1190_v53  ;;  %v5967_v22 = vcvt.s32.f32 %v1175_v23 }
 0x1e1   : > { %v5957_v8 = vsel %vm682_vm0, %v820_v54, 2147483647  ;;  %v5960_v10 = vsel %vm682_vm0, %v819_v29, 2147483647 }
 0x1e2   : > { %1193 = vmin.xlane.f32.xlu1 %v5952_v13  ;;  %v760_v50 = vpop.xlane.xlu1 %759  ;;  %938 = vmin.xlane.f32.xlu0 %v5954_v28  ;;  %v757_v59 = vpop.xlane.xlu0 %756  ;;  %v980_v35 = vshra.s32 %v5957_v8, 16  ;;  %v965_v34 = vshra.s32 %v5960_v10, 16 }
 0x1e3   : > { %vm804_vm4 = vcmp.eq.f32.partialorder %v5738_v40, %v760_v50  ;;  %vm803_vm5 = vcmp.eq.f32.partialorder %v5741_v41, %v757_v59 }
 0x1e4   : > { %v836_v53 = vsel %vm804_vm4, %v5811_v37, 4  ;;  %v835_v54 = vsel %vm803_vm5, %v5811_v37, 4  ;;  %v5971_v29 = vcvt.s32.f32 %v980_v35  ;;  %v5990_v40 = vcvt.s32.f32 %v965_v34 }
 0x1e5   : > { %v5975_v7 = vsel %vm682_vm0, %v836_v53, 2147483647  ;;  %v5978_v61 = vsel %vm682_vm0, %v835_v54, 2147483647 }
 0x1e6   : > { %983 = vmin.xlane.f32.xlu1 %v5971_v29  ;;  %v718_v50 = vpop.xlane.xlu1 %717  ;;  %1178 = vmin.xlane.f32.xlu0 %v5967_v22  ;;  %v715_v23 = vpop.xlane.xlu0 %714  ;;  %v1220_v59 = vshra.s32 %v5975_v7, 16  ;;  %v1205_v35 = vshra.s32 %v5978_v61, 16 }
 0x1e7   : > { %vm790_vm6 = vcmp.eq.f32.partialorder %v5748_v46, %v718_v50  ;;  %vm789_vm7 = vcmp.eq.f32.partialorder %v5751_v47, %v715_v23 }
 0x1e8   : > { %v822_v53 = vsel %vm790_vm6, %v5811_v37, 4  ;;  %v821_v41 = vsel %vm789_vm7, %v5811_v37, 4  ;;  %v5988_v54 = vcvt.s32.f32 %v1220_v59  ;;  %v6003_v34 = vcvt.s32.f32 %v1205_v35 }
 0x1e9   : > { %v5993_v63 = vsel %vm682_vm0, %v822_v53, 2147483647  ;;  %v5996_v60 = vsel %vm682_vm0, %v821_v41, 2147483647 }
 0x1ea   : > { %1223 = vmin.xlane.f32.xlu1 %v5988_v54  ;;  %v766_v50 = vpop.xlane.xlu1 %765  ;;  %968 = vmin.xlane.f32.xlu0 %v5990_v40  ;;  %v763_v23 = vpop.xlane.xlu0 %762  ;;  %v1010_v47 = vshra.s32 %v5993_v63, 16  ;;  %8260 = vst [vmem:[#allocation47_spill] sm:$0xff] %v6003_v34  ;;  %v995_v46 = vshra.s32 %v5996_v60, 16 }
 0x1eb   : > { %vm806_vm8 = vcmp.eq.f32.partialorder %v5758_v56, %v766_v50  ;;  %vm805_vm9 = vcmp.eq.f32.partialorder %v5761_v57, %v763_v23 }
 0x1ec   : > { %v838_v59 = vsel %vm806_vm8, %v5811_v37, 4  ;;  %v837_v53 = vsel %vm805_vm9, %v5811_v37, 4  ;;  %v6007_v41 = vcvt.s32.f32 %v1010_v47  ;;  %v6026_v56 = vcvt.s32.f32 %v995_v46 }
 0x1ed   : > { %v6011_v55 = vsel %vm682_vm0, %v838_v59, 2147483647  ;;  %v6014_v52 = vsel %vm682_vm0, %v837_v53, 2147483647 }
 0x1ee   : > { %1013 = vmin.xlane.f32.xlu1 %v6007_v41  ;;  %v724_v50 = vpop.xlane.xlu1 %723  ;;  %1208 = vmin.xlane.f32.xlu0 %v6003_v34  ;;  %v721_v35 = vpop.xlane.xlu0 %720  ;;  %v1250_v23 = vshra.s32 %v6011_v55, 16  ;;  %v1235_v47 = vshra.s32 %v6014_v52, 16  ;;  %8262 = vst [vmem:[#allocation49_spill] sm:$0xff] %v6026_v56 }
 0x1ef   : > { %vm792_vm10 = vcmp.eq.f32.partialorder %v5768_v1, %v724_v50  ;;  %vm791_vm11 = vcmp.eq.f32.partialorder %v5771_v2, %v721_v35 }
 0x1f0   : > { %v824_v59 = vsel %vm792_vm10, %v5811_v37, 4  ;;  %v823_v57 = vsel %vm791_vm11, %v5811_v37, 4  ;;  %v6024_v53 = vcvt.s32.f32 %v1250_v23  ;;  %v6039_v46 = vcvt.s32.f32 %v1235_v47 }
 0x1f1   : > { %v6029_v51 = vsel %vm682_vm0, %v824_v59, 2147483647  ;;  %v6032_v34 = vsel %vm682_vm0, %v823_v57, 2147483647 }
 0x1f2   : > { %8261 = vst [vmem:[#allocation48_spill] sm:$0xff] %v6024_v53  ;;  %1253 = vmin.xlane.f32.xlu1 %v6024_v53  ;;  %v772_v50 = vpop.xlane.xlu1 %771  ;;  %998 = vmin.xlane.f32.xlu0 %v6026_v56  ;;  %v769_v35 = vpop.xlane.xlu0 %768  ;;  %v1040_v2 = vshra.s32 %v6029_v51, 16  ;;  %8263 = vst [vmem:[#allocation50_spill] sm:$0xff] %v6039_v46  ;;  %v1025_v1 = vshra.s32 %v6032_v34, 16 }
 0x1f3   : > { %vm808_vm12 = vcmp.eq.f32.partialorder %v5778_v9, %v772_v50  ;;  %vm807_vm13 = vcmp.eq.f32.partialorder %v5781_v12, %v769_v35 }
 0x1f4   : > { %v840_v23 = vsel %vm808_vm12, %v5811_v37, 4  ;;  %v839_v59 = vsel %vm807_vm13, %v5811_v37, 4  ;;  %v6043_v57 = vcvt.s32.f32 %v1040_v2  ;;  %v6062_v9 = vcvt.s32.f32 %v1025_v1 }
 0x1f5   : > { %v6047_v53 = vsel %vm682_vm0, %v840_v23, 2147483647  ;;  %v6050_v56 = vsel %vm682_vm0, %v839_v59, 2147483647 }
 0x1f6   : > { %8264 = vst [vmem:[#allocation51_spill] sm:$0xff] %v6043_v57  ;;  %1043 = vmin.xlane.f32.xlu1 %v6043_v57  ;;  %v730_v50 = vpop.xlane.xlu1 %729  ;;  %1238 = vmin.xlane.f32.xlu0 %v6039_v46  ;;  %v727_v47 = vpop.xlane.xlu0 %726  ;;  %v1280_v35 = vshra.s32 %v6047_v53, 16  ;;  %v1265_v2 = vshra.s32 %v6050_v56, 16  ;;  %8266 = vst [vmem:[#allocation53_spill] sm:$0xff] %v6062_v9 }
 0x1f7   : > { %vm794_vm14 = vcmp.eq.f32.partialorder %v5788_v19, %v730_v50  ;;  %vm793_vm15 = vcmp.eq.f32.partialorder %v5791_v20, %v727_v47 }
 0x1f8   : > { %v826_v23 = vsel %vm794_vm14, %v5811_v37, 4  ;;  %v825_v12 = vsel %vm793_vm15, %v5811_v37, 4  ;;  %v6060_v59 = vcvt.s32.f32 %v1280_v35  ;;  %v6075_v1 = vcvt.s32.f32 %v1265_v2 }
 0x1f9   : > { %v6065_v57 = vsel %vm682_vm0, %v826_v23, 2147483647  ;;  %v6068_v46 = vsel %vm682_vm0, %v825_v12, 2147483647 }
 0x1fa   : > { %8265 = vst [vmem:[#allocation52_spill] sm:$0xff] %v6060_v59  ;;  %1283 = vmin.xlane.f32.xlu1 %v6060_v59  ;;  %v778_v50 = vpop.xlane.xlu1 %777  ;;  %1028 = vmin.xlane.f32.xlu0 %v6062_v9  ;;  %v775_v47 = vpop.xlane.xlu0 %774  ;;  %v1070_v20 = vshra.s32 %v6065_v57, 16  ;;  %v1055_v19 = vshra.s32 %v6068_v46, 16 }
 0x1fb   : > { %vm810_vm1 = vcmp.eq.f32.partialorder %v5798_v26, %v778_v50  ;;  %vm809_vm2 = vcmp.eq.f32.partialorder %v5801_v27, %v775_v47 }
 0x1fc   : > { %v842_v35 = vsel %vm810_vm1, %v5811_v37, 4  ;;  %v841_v23 = vsel %vm809_vm2, %v5811_v37, 4  ;;  %v6079_v12 = vcvt.s32.f32 %v1070_v20  ;;  %v6093_v47 = vcvt.s32.f32 %v1055_v19 }
 0x1fd   : > { %v6083_v59 = vsel %vm682_vm0, %v842_v35, 2147483647  ;;  %v6086_v9 = vsel %vm682_vm0, %v841_v23, 2147483647  ;;  %v859_v23 = vand.u32 65535, %v5818_v43  ;;  %v844_v19 = vand.u32 65535, %v5832_v62 }
 0x1fe   : > { %8267 = vst [vmem:[#allocation54_spill] sm:$0xff] %v6086_v9  ;;  %1073 = vmin.xlane.f32.xlu1 %v6079_v12  ;;  %1268 = vmin.xlane.f32.xlu0 %v6075_v1  ;;  %v1310_v2 = vshra.s32 %v6083_v59, 16  ;;  %8269 = vst [vmem:[#allocation56_spill] sm:$0xff] %v6093_v47  ;;  %v1295_v20 = vshra.s32 %v6086_v9, 16  ;;  %v889_v43 = vand.u32 65535, %v5835_v0  ;;  %v1084_v9 = vand.u32 65535, %v5849_v21 }
 0x1ff   : > { %v861_v26 = vcvt.s32.f32 %v859_v23  ;;  %v1129_v0 = vand.u32 65535, %v5852_v24  ;;  %v874_v21 = vand.u32 65535, %v5867_v39  ;;  %v919_v24 = vand.u32 65535, %v5885_v5 }
 0x200   : > { %v6091_v50 = vcvt.s32.f32 %v1310_v2  ;;  %v6098_v35 = vcvt.s32.f32 %v1295_v20  ;;  %v1099_v2 = vand.u32 65535, %v5821_v44  ;;  %v891_v62 = vcvt.s32.f32 %v889_v43 }
 0x201   : > { %v1086_v23 = vcvt.s32.f32 %v1084_v9  ;;  %v876_v9 = vcvt.s32.f32 %v874_v21  ;;  %v1114_v39 = vand.u32 65535, %v5870_v42  ;;  %v1159_v5 = vand.u32 65535, %v5903_v45 }
 0x202   : > { %8268 = vst [vmem:[#allocation55_spill] sm:$0xff] %v6091_v50  ;;  %1313 = vmin.xlane.f32.xlu1 %v6091_v50  ;;  %1058 = vmin.xlane.f32.xlu0 %v6093_v47  ;;  %8270 = vst [vmem:[#allocation57_spill] sm:$0xff] %v6098_v35  ;;  %v1101_v47 = vcvt.s32.f32 %v1099_v2  ;;  %v1131_v2 = vcvt.s32.f32 %v1129_v0  ;;  %v904_v42 = vand.u32 65535, %v5888_v6  ;;  %v949_v45 = vand.u32 65535, %v5921_v33 }
 0x203   : > { %v1161_v0 = vcvt.s32.f32 %v1159_v5  ;;  %v1144_v6 = vand.u32 65535, %v5906_v49  ;;  %v1189_v33 = vand.u32 65535, %v5939_v11  ;;  %v934_v49 = vand.u32 65535, %v5924_v17 }
 0x204   : > { %v906_v21 = vcvt.s32.f32 %v904_v42  ;;  %v979_v11 = vand.u32 65535, %v5957_v8  ;;  %v1174_v17 = vand.u32 65535, %v5942_v16  ;;  %v1219_v8 = vand.u32 65535, %v5975_v7 }
 0x205   : > { %v964_v16 = vand.u32 65535, %v5960_v10  ;;  %v1009_v7 = vand.u32 65535, %v5993_v63  ;;  %v1204_v10 = vand.u32 65535, %v5978_v61  ;;  %v1249_v63 = vand.u32 65535, %v6011_v55 }
 0x206   : > { %1298 = vmin.xlane.f32.xlu0 %v6098_v35  ;;  %v846_v35 = vcvt.s32.f32 %v844_v19  ;;  %v981_v5 = vcvt.s32.f32 %v979_v11  ;;  %v1176_v42 = vcvt.s32.f32 %v1174_v17  ;;  %v994_v61 = vand.u32 65535, %v5996_v60 }
 0x207   : > { %v1039_v55 = vand.u32 65535, %v6029_v51  ;;  %v1234_v60 = vand.u32 65535, %v6014_v52  ;;  %v1279_v51 = vand.u32 65535, %v6047_v53  ;;  %v1024_v52 = vand.u32 65535, %v6032_v34 }
 0x208   : > { %v1069_v53 = vand.u32 65535, %v6065_v57  ;;  %v1264_v34 = vand.u32 65535, %v6050_v56  ;;  %v1309_v57 = vand.u32 65535, %v6083_v59  ;;  %v1054_v56 = vand.u32 65535, %v6068_v46 }
 0x209   : > { %v8279_v46 = vld [vmem:[#allocation55_spill] sm:$0xff] }
 0x24f   : > { %v6102_v27 = vpop.xlane.xlu1 %863 }
 0x250   : > { %vm865_vm3 = vcmp.eq.f32.partialorder %v5828_v58, %v6102_v27 }
 0x251   : > { %v866_v37 = vsel %vm865_vm3, %v861_v26, inf }
 0x252   : > { %867 = vmin.xlane.f32.xlu1 %v866_v37 }
 0x253   : > { %v6108_v50 = vpop.xlane.xlu1 %1103  ;;  %v6110_v20 = vpop.xlane.xlu0 %848 }
 0x254   : > { %vm1105_vm4 = vcmp.eq.f32.partialorder %v5844_v15, %v6108_v50  ;;  %vm850_vm5 = vcmp.eq.f32.partialorder %v5846_v18, %v6110_v20 }
 0x255   : > { %v1106_v44 = vsel %vm1105_vm4, %v1101_v47, inf  ;;  %v851_v58 = vsel %vm850_vm5, %v846_v35, inf }
 0x256   : > { %1107 = vmin.xlane.f32.xlu1 %v1106_v44  ;;  %852 = vmin.xlane.f32.xlu0 %v851_v58  ;;  %v921_v44 = vcvt.s32.f32 %v919_v24  ;;  %v1116_v58 = vcvt.s32.f32 %v1114_v39 }
 0x257   : > { %v6118_v26 = vpop.xlane.xlu1 %893  ;;  %v6120_v37 = vpop.xlane.xlu0 %1088 }
 0x258   : > { %vm895_vm6 = vcmp.eq.f32.partialorder %v5859_v32, %v6118_v26  ;;  %vm1090_vm7 = vcmp.eq.f32.partialorder %v5863_v48, %v6120_v37 }
 0x259   : > { %v896_v15 = vsel %vm895_vm6, %v891_v62, inf  ;;  %v1091_v18 = vsel %vm1090_vm7, %v1086_v23, inf }
 0x25a   : > { %897 = vmin.xlane.f32.xlu1 %v896_v15  ;;  %1092 = vmin.xlane.f32.xlu0 %v1091_v18 }
 0x25b   : > { %v6128_v47 = vpop.xlane.xlu1 %1133  ;;  %v6130_v35 = vpop.xlane.xlu0 %878 }
 0x25c   : > { %vm1135_vm8 = vcmp.eq.f32.partialorder %v5880_v3, %v6128_v47  ;;  %vm880_vm9 = vcmp.eq.f32.partialorder %v5882_v4, %v6130_v35 }
 0x25d   : > { %v1136_v32 = vsel %vm1135_vm8, %v1131_v2, inf  ;;  %v881_v48 = vsel %vm880_vm9, %v876_v9, inf  ;;  %v951_v2 = vcvt.s32.f32 %v949_v45  ;;  %v1146_v9 = vcvt.s32.f32 %v1144_v6 }
 0x25e   : > { %1137 = vmin.xlane.f32.xlu1 %v1136_v32  ;;  %882 = vmin.xlane.f32.xlu0 %v881_v48  ;;  %v1191_v32 = vcvt.s32.f32 %v1189_v33  ;;  %v936_v48 = vcvt.s32.f32 %v934_v49  ;;  %v1251_v49 = vcvt.s32.f32 %v1249_v63  ;;  %v1071_v63 = vcvt.s32.f32 %v1069_v53 }
 0x25f   : > { %v6138_v19 = vpop.xlane.xlu1 %923  ;;  %v6140_v43 = vpop.xlane.xlu0 %1118  ;;  %v1095_v53 = vcvt.f32.s32 %v6120_v37 }
 0x260   : > { %vm925_vm10 = vcmp.eq.f32.partialorder %v5899_v36, %v6138_v19  ;;  %vm1120_vm11 = vcmp.eq.f32.partialorder %v5895_v30, %v6140_v43 }
 0x261   : > { %v926_v3 = vsel %vm925_vm10, %v921_v44, inf  ;;  %v1121_v4 = vsel %vm1120_vm11, %v1116_v58, inf }
 0x262   : > { %927 = vmin.xlane.f32.xlu1 %v926_v3  ;;  %1122 = vmin.xlane.f32.xlu0 %v1121_v4 }
 0x263   : > { %v6148_v62 = vpop.xlane.xlu1 %1163  ;;  %v6150_v23 = vpop.xlane.xlu0 %908 }
 0x264   : > { %vm1165_vm12 = vcmp.eq.f32.partialorder %v5916_v25, %v6148_v62  ;;  %vm910_vm13 = vcmp.eq.f32.partialorder %v5918_v31, %v6150_v23 }
 0x265   : > { %v1166_v30 = vsel %vm1165_vm12, %v1161_v0, inf  ;;  %v911_v36 = vsel %vm910_vm13, %v906_v21, inf  ;;  %v1221_v0 = vcvt.s32.f32 %v1219_v8  ;;  %v966_v21 = vcvt.s32.f32 %v964_v16 }
 0x266   : > { %1167 = vmin.xlane.f32.xlu1 %v1166_v30  ;;  %912 = vmin.xlane.f32.xlu0 %v911_v36  ;;  %v1011_v30 = vcvt.s32.f32 %v1009_v7  ;;  %v1206_v36 = vcvt.s32.f32 %v1204_v10  ;;  %v8276_v7 = vld [vmem:[#allocation52_spill] sm:$0xff]  ;;  %v8277_v10 = vld [vmem:[#allocation53_spill] sm:$0xff] }
 0x267   : > { %v6158_v15 = vpop.xlane.xlu1 %953  ;;  %v6160_v18 = vpop.xlane.xlu0 %1148 }
 0x268   : > { %vm955_vm14 = vcmp.eq.f32.partialorder %v5935_v14, %v6158_v15  ;;  %vm1150_vm15 = vcmp.eq.f32.partialorder %v5931_v38, %v6160_v18 }
 0x269   : > { %v956_v25 = vsel %vm955_vm14, %v951_v2, inf  ;;  %v1151_v31 = vsel %vm1150_vm15, %v1146_v9, inf }
 0x26a   : > { %957 = vmin.xlane.f32.xlu1 %v956_v25  ;;  %1152 = vmin.xlane.f32.xlu0 %v1151_v31  ;;  %v996_v25 = vcvt.s32.f32 %v994_v61  ;;  %v8272_v31 = vld [vmem:[#allocation48_spill] sm:$0xff]  ;;  %v1266_v61 = vcvt.s32.f32 %v1264_v34 }
 0x26b   : > { %v6168_v24 = vpop.xlane.xlu1 %1193  ;;  %v6170_v39 = vpop.xlane.xlu0 %938 }
 0x26c   : > { %vm1195_vm1 = vcmp.eq.f32.partialorder %v5952_v13, %v6168_v24  ;;  %vm940_vm2 = vcmp.eq.f32.partialorder %v5954_v28, %v6170_v39 }
 0x26d   : > { %v1196_v38 = vsel %vm1195_vm1, %v1191_v32, inf  ;;  %v941_v14 = vsel %vm940_vm2, %v936_v48, inf }
 0x26e   : > { %1197 = vmin.xlane.f32.xlu1 %v1196_v38  ;;  %942 = vmin.xlane.f32.xlu0 %v941_v14  ;;  %v1041_v38 = vcvt.s32.f32 %v1039_v55  ;;  %v1236_v14 = vcvt.s32.f32 %v1234_v60  ;;  %v1056_v55 = vcvt.s32.f32 %v1054_v56  ;;  %v8278_v60 = vld [vmem:[#allocation54_spill] sm:$0xff]  ;;  %v1140_v56 = vcvt.f32.s32 %v6128_v47  ;;  %v8288_v47 = vld [vmem:[#allocation16_spill] sm:$0xff] }
 0x26f   : > { %v6178_v44 = vpop.xlane.xlu1 %983  ;;  %v6180_v58 = vpop.xlane.xlu0 %1178  ;;  %v1294_v59 = vand.u32 65535, %v8278_v60 }
 0x270   : > { %vm985_vm3 = vcmp.eq.f32.partialorder %v5971_v29, %v6178_v44  ;;  %vm1180_vm4 = vcmp.eq.f32.partialorder %v5967_v22, %v6180_v58 }
 0x271   : > { %v986_v28 = vsel %vm985_vm3, %v981_v5, inf  ;;  %v1181_v13 = vsel %vm1180_vm4, %v1176_v42, inf  ;;  %v8274_v5 = vld [vmem:[#allocation51_spill] sm:$0xff]  ;;  %v8275_v42 = vld [vmem:[#allocation50_spill] sm:$0xff] }
 0x272   : > { %987 = vmin.xlane.f32.xlu1 %v986_v28  ;;  %1182 = vmin.xlane.f32.xlu0 %v1181_v13 }
 0x273   : > { %v6188_v3 = vpop.xlane.xlu1 %1223  ;;  %v6190_v4 = vpop.xlane.xlu0 %968 }
 0x274   : > { %vm1225_vm5 = vcmp.eq.f32.partialorder %v5988_v54, %v6188_v3  ;;  %vm970_vm6 = vcmp.eq.f32.partialorder %v5990_v40, %v6190_v4  ;;  %v8271_v54 = vld [vmem:[#allocation47_spill] sm:$0xff] }
 0x275   : > { %v1226_v22 = vsel %vm1225_vm5, %v1221_v0, inf  ;;  %v971_v29 = vsel %vm970_vm6, %v966_v21, inf  ;;  %v1281_v0 = vcvt.s32.f32 %v1279_v51  ;;  %v1026_v21 = vcvt.s32.f32 %v1024_v52 }
 0x276   : > { %1227 = vmin.xlane.f32.xlu1 %v1226_v22  ;;  %972 = vmin.xlane.f32.xlu0 %v971_v29  ;;  %v1110_v51 = vcvt.f32.s32 %v6108_v50  ;;  %v8284_v50 = vld [vmem:[#allocation14_spill] sm:$0xff] }
 0x277   : > { %v6198_v45 = vpop.xlane.xlu1 %1013  ;;  %v6200_v6 = vpop.xlane.xlu0 %1208 }
 0x278   : > { %vm1015_vm7 = vcmp.eq.f32.partialorder %v6007_v41, %v6198_v45  ;;  %vm1210_vm8 = vcmp.eq.f32.partialorder %v8271_v54, %v6200_v6  ;;  %v8273_v41 = vld [vmem:[#allocation49_spill] sm:$0xff] }
 0x279   : > { %v1016_v40 = vsel %vm1015_vm7, %v1011_v30, inf  ;;  %v1211_v2 = vsel %vm1210_vm8, %v1206_v36, inf }
 0x27a   : > { %1017 = vmin.xlane.f32.xlu1 %v1016_v40  ;;  %1212 = vmin.xlane.f32.xlu0 %v1211_v2 }
 0x27b   : > { %v6208_v9 = vpop.xlane.xlu1 %1253  ;;  %v6210_v33 = vpop.xlane.xlu0 %998 }
 0x27c   : > { %vm1255_vm9 = vcmp.eq.f32.partialorder %v8272_v31, %v6208_v9  ;;  %vm1000_vm10 = vcmp.eq.f32.partialorder %v8273_v41, %v6210_v33 }
 0x27d   : > { %v1256_v32 = vsel %vm1255_vm9, %v1251_v49, inf  ;;  %v1001_v48 = vsel %vm1000_vm10, %v996_v25, inf  ;;  %v1311_v25 = vcvt.s32.f32 %v1309_v57  ;;  %v1096_v57 = vshll.u32 %v1095_v53, 16 }
 0x27e   : > { %1257 = vmin.xlane.f32.xlu1 %v1256_v32  ;;  %1002 = vmin.xlane.f32.xlu0 %v1001_v48  ;;  %v1296_v32 = vcvt.s32.f32 %v1294_v59  ;;  %v8281_v48 = vld [vmem:[#allocation57_spill] sm:$0xff]  ;;  %v8287_v59 = vld [vmem:[#allocation15_spill] sm:$0xff] }
 0x27f   : > { %v6218_v11 = vpop.xlane.xlu1 %1043  ;;  %v6220_v17 = vpop.xlane.xlu0 %1238 }
 0x280   : > { %vm1045_vm11 = vcmp.eq.f32.partialorder %v8274_v5, %v6218_v11  ;;  %vm1240_vm12 = vcmp.eq.f32.partialorder %v8275_v42, %v6220_v17  ;;  %v855_v42 = vcvt.f32.s32 %v6110_v20 }
 0x281   : > { %v1046_v8 = vsel %vm1045_vm11, %v1041_v38, inf  ;;  %v1241_v16 = vsel %vm1240_vm12, %v1236_v14, inf  ;;  %v870_v14 = vcvt.f32.s32 %v6102_v27  ;;  %v8283_v27 = vld [vmem:[#allocation46_spill] sm:$0xff] }
 0x282   : > { %1047 = vmin.xlane.f32.xlu1 %v1046_v8  ;;  %1242 = vmin.xlane.f32.xlu0 %v1241_v16 }
 0x283   : > { %v6228_v28 = vpop.xlane.xlu1 %1283  ;;  %v6230_v13 = vpop.xlane.xlu0 %1028  ;;  %v871_v5 = vshll.u32 %v870_v14, 16  ;;  %v930_v14 = vcvt.f32.s32 %v6138_v19  ;;  %v8292_v19 = vld [vmem:[#allocation19_spill] sm:$0xff] }
 0x284   : > { %vm1285_vm13 = vcmp.eq.f32.partialorder %v8276_v7, %v6228_v28  ;;  %vm1030_vm14 = vcmp.eq.f32.partialorder %v8277_v10, %v6230_v13  ;;  %v856_v10 = vshll.u32 %v855_v42, 16 }
 0x285   : > { %v1286_v22 = vsel %vm1285_vm13, %v1281_v0, inf  ;;  %v1031_v29 = vsel %vm1030_vm14, %v1026_v21, inf  ;;  %v1111_v0 = vshll.u32 %v1110_v51, 16  ;;  %v900_v21 = vcvt.f32.s32 %v6118_v26 }
 0x286   : > { %1287 = vmin.xlane.f32.xlu1 %v1286_v22  ;;  %1032 = vmin.xlane.f32.xlu0 %v1031_v29  ;;  %v1125_v51 = vcvt.f32.s32 %v6140_v43 }
 0x287   : > { %v6238_v30 = vpop.xlane.xlu1 %1073  ;;  %v6240_v36 = vpop.xlane.xlu0 %1268  ;;  %v901_v37 = vshll.u32 %v900_v21, 16 }
 0x288   : > { %vm1075_vm15 = vcmp.eq.f32.partialorder %v6079_v12, %v6238_v30  ;;  %vm1270_vm1 = vcmp.eq.f32.partialorder %v6075_v1, %v6240_v36  ;;  %v8280_v12 = vld [vmem:[#allocation56_spill] sm:$0xff] }
 0x289   : > { %v1076_v54 = vsel %vm1075_vm15, %v1071_v63, inf  ;;  %v1271_v40 = vsel %vm1270_vm1, %v1266_v61, inf }
 0x28a   : > { %1077 = vmin.xlane.f32.xlu1 %v1076_v54  ;;  %1272 = vmin.xlane.f32.xlu0 %v1271_v40  ;;  %v885_v54 = vcvt.f32.s32 %v6130_v35 }
 0x28b   : > { %v6248_v2 = vpop.xlane.xlu1 %1313  ;;  %v6250_v49 = vpop.xlane.xlu0 %1058 }
 0x28c   : > { %vm1315_vm2 = vcmp.eq.f32.partialorder %v8279_v46, %v6248_v2  ;;  %vm1060_vm3 = vcmp.eq.f32.partialorder %v8280_v12, %v6250_v49 }
 0x28d   : > { %v1316_v31 = vsel %vm1315_vm2, %v1311_v25, inf  ;;  %v1061_v1 = vsel %vm1060_vm3, %v1056_v55, inf }
 0x28e   : > { %1317 = vmin.xlane.f32.xlu1 %v1316_v31  ;;  %1062 = vmin.xlane.f32.xlu0 %v1061_v1 }
 0x28f   : > { %v6257_v41 = vpop.xlane.xlu0 %1298 }
 0x290   : > { %vm1300_vm4 = vcmp.eq.f32.partialorder %v8281_v48, %v6257_v41  ;;  %v1141_v48 = vshll.u32 %v1140_v56, 16 }
 0x291   : > { %v1301_v38 = vsel %vm1300_vm4, %v1296_v32, inf }
 0x292   : > { %1302 = vmin.xlane.f32.xlu0 %v1301_v38  ;;  %v886_v38 = vshll.u32 %v885_v54, 16 }
 0x2db   : > { %v868_v52 = vpop.xlane.xlu1 %867 }
 0x2dc   : > { %v869_v8 = vcvt.f32.s32 %v868_v52 }
 0x2de   : > { %v6264_v16 = vadd.s32 %v871_v5, %v869_v8 }
 0x2df   : > { %v1108_v34 = vpop.xlane.xlu1 %1107  ;;  %v853_v7 = vpop.xlane.xlu0 %852 }
 0x2e0   : > { %8282 = vst [vmem:[#allocation47_spill] sm:$0xff] %v6264_v16  ;;  %v1109_v22 = vcvt.f32.s32 %v1108_v34  ;;  %v854_v29 = vcvt.f32.s32 %v853_v7  ;;  %vm1324_vm5 = vcmp.eq.s32.totalorder %v8283_v27, %v6264_v16 }
 0x2e1   : > { %v6274_v20 = vsel %vm1324_vm5, -inf, %v8284_v50 }
 0x2e2   : > { %v6276_v63 = vadd.s32 %v1111_v0, %v1109_v22  ;;  %v6278_v61 = vadd.s32 %v856_v10, %v854_v29  ;;  %v1390_v26 = vsel %vm682_vm0, %v6274_v20, -inf  ;;  %v8291_v0 = vld [vmem:[#allocation17_spill] sm:$0xff]  ;;  %v931_v22 = vshll.u32 %v930_v14, 16 }
 0x2e3   : > { %1391 = vmax.xlane.f32.xlu1 %v1390_v26  ;;  %v898_v40 = vpop.xlane.xlu1 %897  ;;  %v1093_v25 = vpop.xlane.xlu0 %1092  ;;  %v1126_v29 = vshll.u32 %v1125_v51, 16  ;;  %v1170_v26 = vcvt.f32.s32 %v6148_v62  ;;  %v8296_v62 = vld [vmem:[#allocation20_spill] sm:$0xff]  ;;  %v960_v51 = vcvt.f32.s32 %v6158_v15  ;;  %v8300_v15 = vld [vmem:[#allocation21_spill] sm:$0xff] }
 0x2e4   : > { %8285 = vst [vmem:[#allocation48_spill] sm:$0xff] %v6276_v63  ;;  %8286 = vst [vmem:[#allocation49_spill] sm:$0xff] %v6278_v61  ;;  %v899_v55 = vcvt.f32.s32 %v898_v40  ;;  %v1094_v60 = vcvt.f32.s32 %v1093_v25  ;;  %vm1340_vm6 = vcmp.eq.s32.totalorder %v8283_v27, %v6276_v63  ;;  %vm1323_vm7 = vcmp.eq.s32.totalorder %v8283_v27, %v6278_v61  ;;  %v8295_v25 = vld [vmem:[#allocation18_spill] sm:$0xff] }
 0x2e5   : > { %v6292_v46 = vsel %vm1340_vm6, -inf, %v8287_v59  ;;  %v6298_v35 = vsel %vm1323_vm7, -inf, %v8288_v47 }
 0x2e6   : > { %v6300_v12 = vadd.s32 %v901_v37, %v899_v55  ;;  %v6302_v31 = vadd.s32 %v1096_v57, %v1094_v60  ;;  %v1438_v1 = vsel %vm682_vm0, %v6292_v46, -inf  ;;  %v1387_v32 = vsel %vm682_vm0, %v6298_v35, -inf }
 0x2e7   : > { %1439 = vmax.xlane.f32.xlu1 %v1438_v1  ;;  %v1138_v52 = vpop.xlane.xlu1 %1137  ;;  %1388 = vmax.xlane.f32.xlu0 %v1387_v32  ;;  %v883_v5 = vpop.xlane.xlu0 %882  ;;  %v915_v37 = vcvt.f32.s32 %v6150_v23 }
 0x2e8   : > { %8289 = vst [vmem:[#allocation51_spill] sm:$0xff] %v6300_v12  ;;  %8290 = vst [vmem:[#allocation50_spill] sm:$0xff] %v6302_v31  ;;  %v1139_v42 = vcvt.f32.s32 %v1138_v52  ;;  %v884_v8 = vcvt.f32.s32 %v883_v5  ;;  %vm1326_vm8 = vcmp.eq.s32.totalorder %v8283_v27, %v6300_v12  ;;  %vm1339_vm9 = vcmp.eq.s32.totalorder %v8283_v27, %v6302_v31 }
 0x2e9   : > { %v6318_v21 = vsel %vm1326_vm8, -inf, %v8291_v0  ;;  %v6324_v43 = vsel %vm1339_vm9, -inf, %v8292_v19  ;;  %v916_v14 = vshll.u32 %v915_v37, 16  ;;  %v1155_v52 = vcvt.f32.s32 %v6160_v18 }
 0x2ea   : > { %v6326_v53 = vadd.s32 %v1141_v48, %v1139_v42  ;;  %v6328_v34 = vadd.s32 %v886_v38, %v884_v8  ;;  %v1396_v7 = vsel %vm682_vm0, %v6318_v21, -inf  ;;  %v1435_v10 = vsel %vm682_vm0, %v6324_v43, -inf }
 0x2eb   : > { %1397 = vmax.xlane.f32.xlu1 %v1396_v7  ;;  %v928_v57 = vpop.xlane.xlu1 %927  ;;  %1436 = vmax.xlane.f32.xlu0 %v1435_v10  ;;  %v1123_v56 = vpop.xlane.xlu0 %1122  ;;  %v1171_v38 = vshll.u32 %v1170_v26, 16  ;;  %v8299_v10 = vld [vmem:[#allocation22_spill] sm:$0xff] }
 0x2ec   : > { %8293 = vst [vmem:[#allocation52_spill] sm:$0xff] %v6326_v53  ;;  %8294 = vst [vmem:[#allocation53_spill] sm:$0xff] %v6328_v34  ;;  %v929_v54 = vcvt.f32.s32 %v928_v57  ;;  %v1124_v40 = vcvt.f32.s32 %v1123_v56  ;;  %vm1342_vm10 = vcmp.eq.s32.totalorder %v8283_v27, %v6326_v53  ;;  %vm1325_vm11 = vcmp.eq.s32.totalorder %v8283_v27, %v6328_v34 }
 0x2ed   : > { %v6344_v55 = vsel %vm1342_vm10, -inf, %v8295_v25  ;;  %v6350_v23 = vsel %vm1325_vm11, -inf, %v8296_v62  ;;  %v961_v56 = vshll.u32 %v960_v51, 16 }
 0x2ee   : > { %v6352_v60 = vadd.s32 %v931_v22, %v929_v54  ;;  %v6354_v1 = vadd.s32 %v1126_v29, %v1124_v40  ;;  %v1444_v32 = vsel %vm682_vm0, %v6344_v55, -inf  ;;  %v1393_v48 = vsel %vm682_vm0, %v6350_v23, -inf }
 0x2ef   : > { %1445 = vmax.xlane.f32.xlu1 %v1444_v32  ;;  %v1168_v5 = vpop.xlane.xlu1 %1167  ;;  %1394 = vmax.xlane.f32.xlu0 %v1393_v48  ;;  %v913_v42 = vpop.xlane.xlu0 %912  ;;  %v1156_v54 = vshll.u32 %v1155_v52, 16  ;;  %v1200_v40 = vcvt.f32.s32 %v6168_v24  ;;  %v945_v32 = vcvt.f32.s32 %v6170_v39  ;;  %v8304_v24 = vld [vmem:[#allocation23_spill] sm:$0xff] }
 0x2f0   : > { %8297 = vst [vmem:[#allocation54_spill] sm:$0xff] %v6352_v60  ;;  %8298 = vst [vmem:[#allocation55_spill] sm:$0xff] %v6354_v1  ;;  %v1169_v8 = vcvt.f32.s32 %v1168_v5  ;;  %v914_v7 = vcvt.f32.s32 %v913_v42  ;;  %vm1328_vm12 = vcmp.eq.s32.totalorder %v8283_v27, %v6352_v60  ;;  %vm1341_vm13 = vcmp.eq.s32.totalorder %v8283_v27, %v6354_v1 }
 0x2f1   : > { %v6370_v22 = vsel %vm1328_vm12, -inf, %v8299_v10  ;;  %v6376_v18 = vsel %vm1341_vm13, -inf, %v8300_v15 }
 0x2f2   : > { %v6378_v29 = vadd.s32 %v1171_v38, %v1169_v8  ;;  %v6380_v26 = vadd.s32 %v916_v14, %v914_v7  ;;  %v1402_v37 = vsel %vm682_vm0, %v6370_v22, -inf  ;;  %v1441_v57 = vsel %vm682_vm0, %v6376_v18, -inf  ;;  %v8303_v14 = vld [vmem:[#allocation24_spill] sm:$0xff] }
 0x2f3   : > { %1403 = vmax.xlane.f32.xlu1 %v1402_v37  ;;  %v958_v48 = vpop.xlane.xlu1 %957  ;;  %1442 = vmax.xlane.f32.xlu0 %v1441_v57  ;;  %v1153_v5 = vpop.xlane.xlu0 %1152  ;;  %v1201_v57 = vshll.u32 %v1200_v40, 16 }
 0x2f4   : > { %8301 = vst [vmem:[#allocation56_spill] sm:$0xff] %v6378_v29  ;;  %8302 = vst [vmem:[#allocation57_spill] sm:$0xff] %v6380_v26  ;;  %v959_v38 = vcvt.f32.s32 %v958_v48  ;;  %v1154_v42 = vcvt.f32.s32 %v1153_v5  ;;  %vm1344_vm14 = vcmp.eq.s32.totalorder %v8283_v27, %v6378_v29  ;;  %vm1327_vm15 = vcmp.eq.s32.totalorder %v8283_v27, %v6380_v26 }
 0x2f5   : > { %v6396_v51 = vsel %vm1344_vm14, -inf, %v8303_v14  ;;  %v6402_v39 = vsel %vm1327_vm15, -inf, %v8304_v24  ;;  %v946_v48 = vshll.u32 %v945_v32, 16  ;;  %v990_v5 = vcvt.f32.s32 %v6178_v44  ;;  %v8308_v44 = vld [vmem:[#allocation25_spill] sm:$0xff] }
 0x2f6   : > { %v6404_v52 = vadd.s32 %v961_v56, %v959_v38  ;;  %v6406_v8 = vadd.s32 %v1156_v54, %v1154_v42  ;;  %v1450_v7 = vsel %vm682_vm0, %v6396_v51, -inf  ;;  %v1399_v37 = vsel %vm682_vm0, %v6402_v39, -inf  ;;  %v8307_v54 = vld [vmem:[#allocation26_spill] sm:$0xff] }
 0x2f7   : > { %v1185_v14 = vcvt.f32.s32 %v6180_v58  ;;  %1451 = vmax.xlane.f32.xlu1 %v1450_v7  ;;  %v1198_v26 = vpop.xlane.xlu1 %1197  ;;  %1400 = vmax.xlane.f32.xlu0 %v1399_v37  ;;  %v943_v24 = vpop.xlane.xlu0 %942  ;;  %v991_v7 = vshll.u32 %v990_v5, 16 }
 0x2f8   : > { %8305 = vst [vmem:[#allocation58_spill] sm:$0xff] %v6404_v52  ;;  %8306 = vst [vmem:[#allocation59_spill] sm:$0xff] %v6406_v8  ;;  %v1199_v56 = vcvt.f32.s32 %v1198_v26  ;;  %v944_v38 = vcvt.f32.s32 %v943_v24  ;;  %vm8222_vm1 = vcmp.eq.s32.totalorder %v8283_v27, %v6404_v52  ;;  %vm8196_vm2 = vcmp.eq.s32.totalorder %v8283_v27, %v6406_v8 }
 0x2f9   : > { %v6422_v40 = vsel %vm8222_vm1, -inf, %v8307_v54  ;;  %v6428_v58 = vsel %vm8196_vm2, -inf, %v8308_v44  ;;  %v1186_v37 = vshll.u32 %v1185_v14, 16  ;;  %v1230_v54 = vcvt.f32.s32 %v6188_v3  ;;  %v8312_v3 = vld [vmem:[#allocation27_spill] sm:$0xff] }
 0x2fa   : > { %v6430_v26 = vadd.s32 %v1201_v57, %v1199_v56  ;;  %v6432_v32 = vadd.s32 %v946_v48, %v944_v38  ;;  %v1408_v42 = vsel %vm682_vm0, %v6422_v40, -inf  ;;  %v1447_v24 = vsel %vm682_vm0, %v6428_v58, -inf  ;;  %v8311_v48 = vld [vmem:[#allocation28_spill] sm:$0xff] }
 0x2fb   : > { %v975_v52 = vcvt.f32.s32 %v6190_v4  ;;  %1409 = vmax.xlane.f32.xlu1 %v1408_v42  ;;  %v988_v8 = vpop.xlane.xlu1 %987  ;;  %1448 = vmax.xlane.f32.xlu0 %v1447_v24  ;;  %v1183_v44 = vpop.xlane.xlu0 %1182  ;;  %v1231_v42 = vshll.u32 %v1230_v54, 16 }
 0x2fc   : > { %8309 = vst [vmem:[#allocation60_spill] sm:$0xff] %v6430_v26  ;;  %8310 = vst [vmem:[#allocation61_spill] sm:$0xff] %v6432_v32  ;;  %v989_v57 = vcvt.f32.s32 %v988_v8  ;;  %v1184_v56 = vcvt.f32.s32 %v1183_v44  ;;  %vm8164_vm3 = vcmp.eq.s32.totalorder %v8283_v27, %v6430_v26  ;;  %vm8163_vm4 = vcmp.eq.s32.totalorder %v8283_v27, %v6432_v32 }
 0x2fd   : > { %v6448_v14 = vsel %vm8164_vm3, -inf, %v8311_v48  ;;  %v6454_v4 = vsel %vm8163_vm4, -inf, %v8312_v3  ;;  %v976_v24 = vshll.u32 %v975_v52, 16  ;;  %v1020_v48 = vcvt.f32.s32 %v6198_v45  ;;  %v8316_v45 = vld [vmem:[#allocation29_spill] sm:$0xff] }
 0x2fe   : > { %v6456_v8 = vadd.s32 %v991_v7, %v989_v57  ;;  %v6458_v5 = vadd.s32 %v1186_v37, %v1184_v56  ;;  %v1456_v38 = vsel %vm682_vm0, %v6448_v14, -inf  ;;  %v1405_v44 = vsel %vm682_vm0, %v6454_v4, -inf  ;;  %v8315_v37 = vld [vmem:[#allocation30_spill] sm:$0xff] }
 0x2ff   : > { %v1215_v26 = vcvt.f32.s32 %v6200_v6  ;;  %1457 = vmax.xlane.f32.xlu1 %v1456_v38  ;;  %v1228_v32 = vpop.xlane.xlu1 %1227  ;;  %1406 = vmax.xlane.f32.xlu0 %v1405_v44  ;;  %v973_v3 = vpop.xlane.xlu0 %972  ;;  %v1021_v38 = vshll.u32 %v1020_v48, 16 }
 0x300   : > { %8313 = vst [vmem:[#allocation62_spill] sm:$0xff] %v6456_v8  ;;  %8314 = vst [vmem:[#allocation63_spill] sm:$0xff] %v6458_v5  ;;  %v1229_v7 = vcvt.f32.s32 %v1228_v32  ;;  %v974_v57 = vcvt.f32.s32 %v973_v3  ;;  %vm8168_vm4 = vcmp.eq.s32.totalorder %v8283_v27, %v6456_v8  ;;  %vm8167_vm3 = vcmp.eq.s32.totalorder %v8283_v27, %v6458_v5 }
 0x301   : > { %v6474_v52 = vsel %vm8168_vm4, -inf, %v8315_v37  ;;  %v6480_v6 = vsel %vm8167_vm3, -inf, %v8316_v45  ;;  %v1216_v44 = vshll.u32 %v1215_v26, 16  ;;  %v1260_v37 = vcvt.f32.s32 %v6208_v9  ;;  %v8320_v9 = vld [vmem:[#allocation31_spill] sm:$0xff] }
 0x302   : > { %v6482_v54 = vadd.s32 %v1231_v42, %v1229_v7  ;;  %v6484_v32 = vadd.s32 %v976_v24, %v974_v57  ;;  %v1414_v56 = vsel %vm682_vm0, %v6474_v52, -inf  ;;  %v1453_v3 = vsel %vm682_vm0, %v6480_v6, -inf  ;;  %v8319_v24 = vld [vmem:[#allocation32_spill] sm:$0xff] }
 0x303   : > { %v1005_v8 = vcvt.f32.s32 %v6210_v33  ;;  %1415 = vmax.xlane.f32.xlu1 %v1414_v56  ;;  %v1018_v5 = vpop.xlane.xlu1 %1017  ;;  %1454 = vmax.xlane.f32.xlu0 %v1453_v3  ;;  %v1213_v45 = vpop.xlane.xlu0 %1212  ;;  %v1261_v56 = vshll.u32 %v1260_v37, 16 }
 0x304   : > { %8317 = vst [vmem:[#allocation64_spill] sm:$0xff] %v6482_v54  ;;  %8318 = vst [vmem:[#allocation65_spill] sm:$0xff] %v6484_v32  ;;  %v1019_v42 = vcvt.f32.s32 %v1018_v5  ;;  %v1214_v7 = vcvt.f32.s32 %v1213_v45  ;;  %vm8172_vm3 = vcmp.eq.s32.totalorder %v8283_v27, %v6482_v54  ;;  %vm8171_vm4 = vcmp.eq.s32.totalorder %v8283_v27, %v6484_v32 }
 0x305   : > { %v6500_v26 = vsel %vm8172_vm3, -inf, %v8319_v24  ;;  %v6506_v33 = vsel %vm8171_vm4, -inf, %v8320_v9  ;;  %v1006_v3 = vshll.u32 %v1005_v8, 16  ;;  %v1050_v24 = vcvt.f32.s32 %v6218_v11  ;;  %v8324_v11 = vld [vmem:[#allocation33_spill] sm:$0xff] }
 0x306   : > { %v6508_v48 = vadd.s32 %v1021_v38, %v1019_v42  ;;  %v6510_v5 = vadd.s32 %v1216_v44, %v1214_v7  ;;  %v1462_v57 = vsel %vm682_vm0, %v6500_v26, -inf  ;;  %v1411_v45 = vsel %vm682_vm0, %v6506_v33, -inf  ;;  %v8323_v44 = vld [vmem:[#allocation34_spill] sm:$0xff] }
 0x307   : > { %v1245_v54 = vcvt.f32.s32 %v6220_v17  ;;  %1463 = vmax.xlane.f32.xlu1 %v1462_v57  ;;  %v1258_v32 = vpop.xlane.xlu1 %1257  ;;  %1412 = vmax.xlane.f32.xlu0 %v1411_v45  ;;  %v1003_v9 = vpop.xlane.xlu0 %1002  ;;  %v1051_v57 = vshll.u32 %v1050_v24, 16 }
 0x308   : > { %8321 = vst [vmem:[#allocation66_spill] sm:$0xff] %v6508_v48  ;;  %8322 = vst [vmem:[#allocation67_spill] sm:$0xff] %v6510_v5  ;;  %v1259_v38 = vcvt.f32.s32 %v1258_v32  ;;  %v1004_v42 = vcvt.f32.s32 %v1003_v9  ;;  %vm8176_vm4 = vcmp.eq.s32.totalorder %v8283_v27, %v6508_v48  ;;  %vm8175_vm3 = vcmp.eq.s32.totalorder %v8283_v27, %v6510_v5 }
 0x309   : > { %v6526_v8 = vsel %vm8176_vm4, -inf, %v8323_v44  ;;  %v6532_v17 = vsel %vm8175_vm3, -inf, %v8324_v11  ;;  %v1246_v45 = vshll.u32 %v1245_v54, 16  ;;  %v1290_v44 = vcvt.f32.s32 %v6228_v28  ;;  %v8328_v28 = vld [vmem:[#allocation35_spill] sm:$0xff] }
 0x30a   : > { %v6534_v37 = vadd.s32 %v1261_v56, %v1259_v38  ;;  %v6536_v32 = vadd.s32 %v1006_v3, %v1004_v42  ;;  %v1420_v7 = vsel %vm682_vm0, %v6526_v8, -inf  ;;  %v1459_v9 = vsel %vm682_vm0, %v6532_v17, -inf  ;;  %v8327_v3 = vld [vmem:[#allocation36_spill] sm:$0xff] }
 0x30b   : > { %v1035_v48 = vcvt.f32.s32 %v6230_v13  ;;  %1421 = vmax.xlane.f32.xlu1 %v1420_v7  ;;  %v1048_v5 = vpop.xlane.xlu1 %1047  ;;  %1460 = vmax.xlane.f32.xlu0 %v1459_v9  ;;  %v1243_v11 = vpop.xlane.xlu0 %1242  ;;  %v1291_v7 = vshll.u32 %v1290_v44, 16 }
 0x30c   : > { %8325 = vst [vmem:[#allocation68_spill] sm:$0xff] %v6534_v37  ;;  %8326 = vst [vmem:[#allocation69_spill] sm:$0xff] %v6536_v32  ;;  %v1049_v56 = vcvt.f32.s32 %v1048_v5  ;;  %v1244_v38 = vcvt.f32.s32 %v1243_v11  ;;  %vm8180_vm3 = vcmp.eq.s32.totalorder %v8283_v27, %v6534_v37  ;;  %vm8179_vm4 = vcmp.eq.s32.totalorder %v8283_v27, %v6536_v32 }
 0x30d   : > { %v6552_v54 = vsel %vm8180_vm3, -inf, %v8327_v3  ;;  %v6558_v13 = vsel %vm8179_vm4, -inf, %v8328_v28  ;;  %v1036_v9 = vshll.u32 %v1035_v48, 16  ;;  %v1080_v3 = vcvt.f32.s32 %v6238_v30  ;;  %v8332_v30 = vld [vmem:[#allocation37_spill] sm:$0xff] }
 0x30e   : > { %v6560_v24 = vadd.s32 %v1051_v57, %v1049_v56  ;;  %v6562_v5 = vadd.s32 %v1246_v45, %v1244_v38  ;;  %v1468_v42 = vsel %vm682_vm0, %v6552_v54, -inf  ;;  %v1417_v11 = vsel %vm682_vm0, %v6558_v13, -inf  ;;  %v8331_v45 = vld [vmem:[#allocation38_spill] sm:$0xff] }
 0x30f   : > { %v1275_v37 = vcvt.f32.s32 %v6240_v36  ;;  %1469 = vmax.xlane.f32.xlu1 %v1468_v42  ;;  %v1288_v32 = vpop.xlane.xlu1 %1287  ;;  %1418 = vmax.xlane.f32.xlu0 %v1417_v11  ;;  %v1033_v28 = vpop.xlane.xlu0 %1032  ;;  %v1081_v42 = vshll.u32 %v1080_v3, 16 }
 0x310   : > { %8329 = vst [vmem:[#allocation70_spill] sm:$0xff] %v6560_v24  ;;  %8330 = vst [vmem:[#allocation71_spill] sm:$0xff] %v6562_v5  ;;  %v1289_v57 = vcvt.f32.s32 %v1288_v32  ;;  %v1034_v56 = vcvt.f32.s32 %v1033_v28  ;;  %vm8184_vm4 = vcmp.eq.s32.totalorder %v8283_v27, %v6560_v24  ;;  %vm8183_vm3 = vcmp.eq.s32.totalorder %v8283_v27, %v6562_v5 }
 0x311   : > { %v6578_v48 = vsel %vm8184_vm4, -inf, %v8331_v45  ;;  %v6584_v36 = vsel %vm8183_vm3, -inf, %v8332_v30  ;;  %v1276_v11 = vshll.u32 %v1275_v37, 16  ;;  %v1320_v45 = vcvt.f32.s32 %v6248_v2  ;;  %v8336_v2 = vld [vmem:[#allocation39_spill] sm:$0xff] }
 0x312   : > { %v6586_v44 = vadd.s32 %v1291_v7, %v1289_v57  ;;  %v6588_v32 = vadd.s32 %v1036_v9, %v1034_v56  ;;  %v1426_v38 = vsel %vm682_vm0, %v6578_v48, -inf  ;;  %v1465_v28 = vsel %vm682_vm0, %v6584_v36, -inf  ;;  %v8335_v9 = vld [vmem:[#allocation40_spill] sm:$0xff] }
 0x313   : > { %v1065_v24 = vcvt.f32.s32 %v6250_v49  ;;  %1427 = vmax.xlane.f32.xlu1 %v1426_v38  ;;  %v1078_v5 = vpop.xlane.xlu1 %1077  ;;  %1466 = vmax.xlane.f32.xlu0 %v1465_v28  ;;  %v1273_v30 = vpop.xlane.xlu0 %1272  ;;  %v1321_v38 = vshll.u32 %v1320_v45, 16 }
 0x314   : > { %8333 = vst [vmem:[#allocation72_spill] sm:$0xff] %v6586_v44  ;;  %8334 = vst [vmem:[#allocation73_spill] sm:$0xff] %v6588_v32  ;;  %v1079_v7 = vcvt.f32.s32 %v1078_v5  ;;  %v1274_v57 = vcvt.f32.s32 %v1273_v30  ;;  %vm8189_vm3 = vcmp.eq.s32.totalorder %v8283_v27, %v6586_v44  ;;  %vm8188_vm4 = vcmp.eq.s32.totalorder %v8283_v27, %v6588_v32 }
 0x315   : > { %v6604_v37 = vsel %vm8189_vm3, -inf, %v8335_v9  ;;  %v6610_v49 = vsel %vm8188_vm4, -inf, %v8336_v2  ;;  %v1066_v28 = vshll.u32 %v1065_v24, 16  ;;  %v1305_v9 = vcvt.f32.s32 %v6257_v41  ;;  %v8340_v24 = vld [vmem:[#allocation41_spill] sm:$0xff] }
 0x316   : > { %v6612_v3 = vadd.s32 %v1081_v42, %v1079_v7  ;;  %v6614_v5 = vadd.s32 %v1276_v11, %v1274_v57  ;;  %v1474_v56 = vsel %vm682_vm0, %v6604_v37, -inf  ;;  %v1423_v30 = vsel %vm682_vm0, %v6610_v49, -inf  ;;  %v8339_v42 = vld [vmem:[#allocation42_spill] sm:$0xff] }
 0x317   : > { %1475 = vmax.xlane.f32.xlu1 %v1474_v56  ;;  %v1318_v44 = vpop.xlane.xlu1 %1317  ;;  %1424 = vmax.xlane.f32.xlu0 %v1423_v30  ;;  %v1063_v32 = vpop.xlane.xlu0 %1062  ;;  %v1306_v56 = vshll.u32 %v1305_v9, 16 }
 0x318   : > { %8337 = vst [vmem:[#allocation74_spill] sm:$0xff] %v6612_v3  ;;  %8338 = vst [vmem:[#allocation75_spill] sm:$0xff] %v6614_v5  ;;  %v1319_v2 = vcvt.f32.s32 %v1318_v44  ;;  %v1064_v29 = vcvt.f32.s32 %v1063_v32  ;;  %vm8190_vm4 = vcmp.eq.s32.totalorder %v8283_v27, %v6612_v3  ;;  %vm8191_vm3 = vcmp.eq.s32.totalorder %v8283_v27, %v6614_v5 }
 0x319   : > { %v6629_v45 = vsel %vm8190_vm4, -inf, %v8339_v42  ;;  %v6635_v41 = vsel %vm8191_vm3, -inf, %v8340_v24 }
 0x31a   : > { %v6637_v44 = vadd.s32 %v1321_v38, %v1319_v2  ;;  %v6639_v32 = vadd.s32 %v1066_v28, %v1064_v29  ;;  %v1432_v11 = vsel %vm682_vm0, %v6629_v45, -inf  ;;  %v1471_v7 = vsel %vm682_vm0, %v6635_v41, -inf  ;;  %v8343_v2 = vld [vmem:[#allocation44_spill] sm:$0xff]  ;;  %v8344_v38 = vld [vmem:[#allocation43_spill] sm:$0xff] }
 0x31b   : > { %1433 = vmax.xlane.f32.xlu1 %v1432_v11  ;;  %1472 = vmax.xlane.f32.xlu0 %v1471_v7  ;;  %v1303_v57 = vpop.xlane.xlu0 %1302 }
 0x31c   : > { %8341 = vst [vmem:[#allocation76_spill] sm:$0xff] %v6637_v44  ;;  %8342 = vst [vmem:[#allocation77_spill] sm:$0xff] %v6639_v32  ;;  %v1304_v30 = vcvt.f32.s32 %v1303_v57  ;;  %vm8192_vm4 = vcmp.eq.s32.totalorder %v8283_v27, %v6637_v44  ;;  %vm8194_vm3 = vcmp.eq.s32.totalorder %v8283_v27, %v6639_v32  ;;  %v8346_v57 = vld [vmem:[#allocation45_spill] sm:$0xff] }
 0x31d   : > { %v6653_v29 = vsel %vm8192_vm4, -inf, %v8343_v2  ;;  %v6659_v28 = vsel %vm8194_vm3, -inf, %v8344_v38 }
 0x31e   : > { %v6661_v9 = vadd.s32 %v1306_v56, %v1304_v30  ;;  %v1480_v11 = vsel %vm682_vm0, %v6653_v29, -inf  ;;  %v1429_v7 = vsel %vm682_vm0, %v6659_v28, -inf }
 0x31f   : > { %1481 = vmax.xlane.f32.xlu1 %v1480_v11  ;;  %1430 = vmax.xlane.f32.xlu0 %v1429_v7 }
 0x320   : > { %8345 = vst [vmem:[#allocation78_spill] sm:$0xff] %v6661_v9  ;;  %vm8197_vm4 = vcmp.eq.s32.totalorder %v8283_v27, %v6661_v9 }
 0x321   : > { %v6673_v32 = vsel %vm8197_vm4, -inf, %v8346_v57 }
 0x322   : > { %v1477_v56 = vsel %vm682_vm0, %v6673_v32, -inf }
 0x323   : > { %1478 = vmax.xlane.f32.xlu0 %v1477_v56 }
 0x36c   : > { %v1392_v30 = vpop.xlane.xlu1 %1391 }
 0x36d   : > { %vm1484_vm3 = vcmp.eq.f32.partialorder %v6274_v20, %v1392_v30 }
 0x36e   : > { %v1516_v38 = vsel %vm1484_vm3, %v8283_v27, 4 }
 0x36f   : > { %v6680_v11 = vsel %vm682_vm0, %v1516_v38, 2147483647 }
 0x370   : > { %v1440_v7 = vpop.xlane.xlu1 %1439  ;;  %v1389_v2 = vpop.xlane.xlu0 %1388  ;;  %v1564_v44 = vshra.s32 %v6680_v11, 16 }
 0x371   : > { %vm1500_vm2 = vcmp.eq.f32.partialorder %v6292_v46, %v1440_v7  ;;  %vm1483_vm4 = vcmp.eq.f32.partialorder %v6298_v35, %v1389_v2 }
 0x372   : > { %v1532_v57 = vsel %vm1500_vm2, %v8283_v27, 4  ;;  %v1515_v56 = vsel %vm1483_vm4, %v8283_v27, 4  ;;  %v6687_v9 = vcvt.s32.f32 %v1564_v44 }
 0x373   : > { %v6690_v20 = vsel %vm682_vm0, %v1532_v57, 2147483647  ;;  %v6693_v38 = vsel %vm682_vm0, %v1515_v56, 2147483647 }
 0x374   : > { %1567 = vmin.xlane.f32.xlu1 %v6687_v9  ;;  %v1398_v30 = vpop.xlane.xlu1 %1397  ;;  %v1437_v24 = vpop.xlane.xlu0 %1436  ;;  %v1804_v46 = vshra.s32 %v6690_v20, 16  ;;  %v1549_v35 = vshra.s32 %v6693_v38, 16 }
 0x375   : > { %vm1486_vm2 = vcmp.eq.f32.partialorder %v6318_v21, %v1398_v30  ;;  %vm1499_vm3 = vcmp.eq.f32.partialorder %v6324_v43, %v1437_v24 }
 0x376   : > { %v1518_v44 = vsel %vm1486_vm2, %v8283_v27, 4  ;;  %v1531_v2 = vsel %vm1499_vm3, %v8283_v27, 4  ;;  %v6702_v57 = vcvt.s32.f32 %v1804_v46  ;;  %v6704_v7 = vcvt.s32.f32 %v1549_v35 }
 0x377   : > { %v6707_v56 = vsel %vm682_vm0, %v1518_v44, 2147483647  ;;  %v6710_v5 = vsel %vm682_vm0, %v1531_v2, 2147483647 }
 0x378   : > { %1807 = vmin.xlane.f32.xlu1 %v6702_v57  ;;  %v1446_v42 = vpop.xlane.xlu1 %1445  ;;  %1552 = vmin.xlane.f32.xlu0 %v6704_v7  ;;  %v1395_v21 = vpop.xlane.xlu0 %1394  ;;  %v1594_v43 = vshra.s32 %v6707_v56, 16  ;;  %v1789_v24 = vshra.s32 %v6710_v5, 16 }
 0x379   : > { %vm1502_vm4 = vcmp.eq.f32.partialorder %v6344_v55, %v1446_v42  ;;  %vm1485_vm2 = vcmp.eq.f32.partialorder %v6350_v23, %v1395_v21 }
 0x37a   : > { %v1534_v30 = vsel %vm1502_vm4, %v8283_v27, 4  ;;  %v1517_v46 = vsel %vm1485_vm2, %v8283_v27, 4  ;;  %v6720_v35 = vcvt.s32.f32 %v1594_v43  ;;  %v6722_v44 = vcvt.s32.f32 %v1789_v24 }
 0x37b   : > { %v6725_v2 = vsel %vm682_vm0, %v1534_v30, 2147483647  ;;  %v6728_v3 = vsel %vm682_vm0, %v1517_v46, 2147483647 }
 0x37c   : > { %1597 = vmin.xlane.f32.xlu1 %v6720_v35  ;;  %v1404_v15 = vpop.xlane.xlu1 %1403  ;;  %1792 = vmin.xlane.f32.xlu0 %v6722_v44  ;;  %v1443_v55 = vpop.xlane.xlu0 %1442  ;;  %v1834_v23 = vshra.s32 %v6725_v2, 16  ;;  %v1579_v42 = vshra.s32 %v6728_v3, 16 }
 0x37d   : > { %vm1488_vm3 = vcmp.eq.f32.partialorder %v6370_v22, %v1404_v15  ;;  %vm1501_vm4 = vcmp.eq.f32.partialorder %v6376_v18, %v1443_v55 }
 0x37e   : > { %v1520_v21 = vsel %vm1488_vm3, %v8283_v27, 4  ;;  %v1533_v43 = vsel %vm1501_vm4, %v8283_v27, 4  ;;  %v6738_v24 = vcvt.s32.f32 %v1834_v23  ;;  %v6740_v30 = vcvt.s32.f32 %v1579_v42 }
 0x37f   : > { %v6743_v46 = vsel %vm682_vm0, %v1520_v21, 2147483647  ;;  %v6746_v1 = vsel %vm682_vm0, %v1533_v43, 2147483647 }
 0x380   : > { %1837 = vmin.xlane.f32.xlu1 %v6738_v24  ;;  %v1452_v10 = vpop.xlane.xlu1 %1451  ;;  %1582 = vmin.xlane.f32.xlu0 %v6740_v30  ;;  %v1401_v22 = vpop.xlane.xlu0 %1400  ;;  %v1624_v15 = vshra.s32 %v6743_v46, 16  ;;  %v1819_v18 = vshra.s32 %v6746_v1, 16 }
 0x381   : > { %vm1504_vm2 = vcmp.eq.f32.partialorder %v6396_v51, %v1452_v10  ;;  %vm1487_vm3 = vcmp.eq.f32.partialorder %v6402_v39, %v1401_v22 }
 0x382   : > { %v1536_v55 = vsel %vm1504_vm2, %v8283_v27, 4  ;;  %v1519_v23 = vsel %vm1487_vm3, %v8283_v27, 4  ;;  %v6756_v42 = vcvt.s32.f32 %v1624_v15  ;;  %v6758_v21 = vcvt.s32.f32 %v1819_v18 }
 0x383   : > { %v6761_v43 = vsel %vm682_vm0, %v1536_v55, 2147483647  ;;  %v6764_v60 = vsel %vm682_vm0, %v1519_v23, 2147483647 }
 0x384   : > { %1627 = vmin.xlane.f32.xlu1 %v6756_v42  ;;  %v1410_v62 = vpop.xlane.xlu1 %1409  ;;  %1822 = vmin.xlane.f32.xlu0 %v6758_v21  ;;  %v1449_v10 = vpop.xlane.xlu0 %1448  ;;  %v1864_v51 = vshra.s32 %v6761_v43, 16  ;;  %v1609_v39 = vshra.s32 %v6764_v60, 16 }
 0x385   : > { %vm1490_vm4 = vcmp.eq.f32.partialorder %v6422_v40, %v1410_v62  ;;  %vm1503_vm2 = vcmp.eq.f32.partialorder %v6428_v58, %v1449_v10 }
 0x386   : > { %v1522_v22 = vsel %vm1490_vm4, %v8283_v27, 4  ;;  %v1535_v15 = vsel %vm1503_vm2, %v8283_v27, 4  ;;  %v6774_v18 = vcvt.s32.f32 %v1864_v51  ;;  %v6776_v55 = vcvt.s32.f32 %v1609_v39 }
 0x387   : > { %v6779_v23 = vsel %vm682_vm0, %v1522_v22, 2147483647  ;;  %v6782_v34 = vsel %vm682_vm0, %v1535_v15, 2147483647 }
 0x388   : > { %1867 = vmin.xlane.f32.xlu1 %v6774_v18  ;;  %v1458_v25 = vpop.xlane.xlu1 %1457  ;;  %1612 = vmin.xlane.f32.xlu0 %v6776_v55  ;;  %v1407_v62 = vpop.xlane.xlu0 %1406  ;;  %v1654_v40 = vshra.s32 %v6779_v23, 16  ;;  %v1849_v58 = vshra.s32 %v6782_v34, 16 }
 0x389   : > { %vm1506_vm3 = vcmp.eq.f32.partialorder %v6448_v14, %v1458_v25  ;;  %vm1489_vm4 = vcmp.eq.f32.partialorder %v6454_v4, %v1407_v62 }
 0x38a   : > { %v1538_v10 = vsel %vm1506_vm3, %v8283_v27, 4  ;;  %v1521_v51 = vsel %vm1489_vm4, %v8283_v27, 4  ;;  %v6792_v39 = vcvt.s32.f32 %v1654_v40  ;;  %v6794_v22 = vcvt.s32.f32 %v1849_v58 }
 0x38b   : > { %v6797_v15 = vsel %vm682_vm0, %v1538_v10, 2147483647  ;;  %v6800_v53 = vsel %vm682_vm0, %v1521_v51, 2147483647 }
 0x38c   : > { %1657 = vmin.xlane.f32.xlu1 %v6792_v39  ;;  %v1416_v19 = vpop.xlane.xlu1 %1415  ;;  %1852 = vmin.xlane.f32.xlu0 %v6794_v22  ;;  %v1455_v25 = vpop.xlane.xlu0 %1454  ;;  %v1894_v14 = vshra.s32 %v6797_v15, 16  ;;  %v1639_v4 = vshra.s32 %v6800_v53, 16 }
 0x38d   : > { %vm1492_vm2 = vcmp.eq.f32.partialorder %v6474_v52, %v1416_v19  ;;  %vm1505_vm3 = vcmp.eq.f32.partialorder %v6480_v6, %v1455_v25 }
 0x38e   : > { %v1524_v62 = vsel %vm1492_vm2, %v8283_v27, 4  ;;  %v1537_v40 = vsel %vm1505_vm3, %v8283_v27, 4  ;;  %v6810_v58 = vcvt.s32.f32 %v1894_v14  ;;  %v6812_v10 = vcvt.s32.f32 %v1639_v4 }
 0x38f   : > { %v6815_v51 = vsel %vm682_vm0, %v1524_v62, 2147483647  ;;  %v6818_v31 = vsel %vm682_vm0, %v1537_v40, 2147483647 }
 0x390   : > { %1897 = vmin.xlane.f32.xlu1 %v6810_v58  ;;  %v1464_v0 = vpop.xlane.xlu1 %1463  ;;  %1642 = vmin.xlane.f32.xlu0 %v6812_v10  ;;  %v1413_v19 = vpop.xlane.xlu0 %1412  ;;  %v1684_v52 = vshra.s32 %v6815_v51, 16  ;;  %v1879_v6 = vshra.s32 %v6818_v31, 16 }
 0x391   : > { %vm1508_vm4 = vcmp.eq.f32.partialorder %v6500_v26, %v1464_v0  ;;  %vm1491_vm2 = vcmp.eq.f32.partialorder %v6506_v33, %v1413_v19 }
 0x392   : > { %v1540_v25 = vsel %vm1508_vm4, %v8283_v27, 4  ;;  %v1523_v14 = vsel %vm1491_vm2, %v8283_v27, 4  ;;  %v6828_v4 = vcvt.s32.f32 %v1684_v52  ;;  %v6830_v62 = vcvt.s32.f32 %v1879_v6 }
 0x393   : > { %v6833_v40 = vsel %vm682_vm0, %v1540_v25, 2147483647  ;;  %v6836_v12 = vsel %vm682_vm0, %v1523_v14, 2147483647 }
 0x394   : > { %1687 = vmin.xlane.f32.xlu1 %v6828_v4  ;;  %v1422_v47 = vpop.xlane.xlu1 %1421  ;;  %1882 = vmin.xlane.f32.xlu0 %v6830_v62  ;;  %v1461_v0 = vpop.xlane.xlu0 %1460  ;;  %v1924_v26 = vshra.s32 %v6833_v40, 16  ;;  %v1669_v33 = vshra.s32 %v6836_v12, 16 }
 0x395   : > { %vm1494_vm3 = vcmp.eq.f32.partialorder %v6526_v8, %v1422_v47  ;;  %vm1507_vm4 = vcmp.eq.f32.partialorder %v6532_v17, %v1461_v0 }
 0x396   : > { %v1526_v19 = vsel %vm1494_vm3, %v8283_v27, 4  ;;  %v1539_v52 = vsel %vm1507_vm4, %v8283_v27, 4  ;;  %v6846_v6 = vcvt.s32.f32 %v1924_v26  ;;  %v6848_v25 = vcvt.s32.f32 %v1669_v33 }
 0x397   : > { %v6851_v14 = vsel %vm682_vm0, %v1526_v19, 2147483647  ;;  %v6854_v61 = vsel %vm682_vm0, %v1539_v52, 2147483647 }
 0x398   : > { %1927 = vmin.xlane.f32.xlu1 %v6846_v6  ;;  %v1470_v59 = vpop.xlane.xlu1 %1469  ;;  %1672 = vmin.xlane.f32.xlu0 %v6848_v25  ;;  %v1419_v47 = vpop.xlane.xlu0 %1418  ;;  %v1714_v8 = vshra.s32 %v6851_v14, 16  ;;  %v1909_v17 = vshra.s32 %v6854_v61, 16 }
 0x399   : > { %vm1510_vm2 = vcmp.eq.f32.partialorder %v6552_v54, %v1470_v59  ;;  %vm1493_vm3 = vcmp.eq.f32.partialorder %v6558_v13, %v1419_v47 }
 0x39a   : > { %v1542_v0 = vsel %vm1510_vm2, %v8283_v27, 4  ;;  %v1525_v26 = vsel %vm1493_vm3, %v8283_v27, 4  ;;  %v6864_v33 = vcvt.s32.f32 %v1714_v8  ;;  %v6866_v19 = vcvt.s32.f32 %v1909_v17 }
 0x39b   : > { %v6869_v52 = vsel %vm682_vm0, %v1542_v0, 2147483647  ;;  %v6872_v63 = vsel %vm682_vm0, %v1525_v26, 2147483647 }
 0x39c   : > { %8347 = vst [vmem:[#allocation79_spill] sm:$0xff] %v6866_v19  ;;  %1717 = vmin.xlane.f32.xlu1 %v6864_v33  ;;  %v1428_v50 = vpop.xlane.xlu1 %1427  ;;  %1912 = vmin.xlane.f32.xlu0 %v6866_v19  ;;  %v1467_v59 = vpop.xlane.xlu0 %1466  ;;  %v1954_v54 = vshra.s32 %v6869_v52, 16  ;;  %v1699_v13 = vshra.s32 %v6872_v63, 16 }
 0x39d   : > { %vm1496_vm4 = vcmp.eq.f32.partialorder %v6578_v48, %v1428_v50  ;;  %vm1509_vm2 = vcmp.eq.f32.partialorder %v6584_v36, %v1467_v59 }
 0x39e   : > { %v1528_v47 = vsel %vm1496_vm4, %v8283_v27, 4  ;;  %v1541_v8 = vsel %vm1509_vm2, %v8283_v27, 4  ;;  %v6882_v17 = vcvt.s32.f32 %v1954_v54  ;;  %v6884_v0 = vcvt.s32.f32 %v1699_v13 }
 0x39f   : > { %v6887_v26 = vsel %vm682_vm0, %v1528_v47, 2147483647  ;;  %v6890_v16 = vsel %vm682_vm0, %v1541_v8, 2147483647 }
 0x3a0   : > { %8348 = vst [vmem:[#allocation80_spill] sm:$0xff] %v6882_v17  ;;  %8349 = vst [vmem:[#allocation81_spill] sm:$0xff] %v6884_v0  ;;  %1957 = vmin.xlane.f32.xlu1 %v6882_v17  ;;  %v1476_v19 = vpop.xlane.xlu1 %1475  ;;  %1702 = vmin.xlane.f32.xlu0 %v6884_v0  ;;  %v1425_v50 = vpop.xlane.xlu0 %1424  ;;  %v1744_v48 = vshra.s32 %v6887_v26, 16  ;;  %v1939_v36 = vshra.s32 %v6890_v16, 16 }
 0x3a1   : > { %vm1512_vm3 = vcmp.eq.f32.partialorder %v6604_v37, %v1476_v19  ;;  %vm1495_vm4 = vcmp.eq.f32.partialorder %v6610_v49, %v1425_v50 }
 0x3a2   : > { %v1544_v59 = vsel %vm1512_vm3, %v8283_v27, 4  ;;  %v1527_v54 = vsel %vm1495_vm4, %v8283_v27, 4  ;;  %v6900_v13 = vcvt.s32.f32 %v1744_v48  ;;  %v6902_v47 = vcvt.s32.f32 %v1939_v36 }
 0x3a3   : > { %v6905_v8 = vsel %vm682_vm0, %v1544_v59, 2147483647  ;;  %v6908_v0 = vsel %vm682_vm0, %v1527_v54, 2147483647 }
 0x3a4   : > { %8350 = vst [vmem:[#allocation82_spill] sm:$0xff] %v6900_v13  ;;  %8351 = vst [vmem:[#allocation83_spill] sm:$0xff] %v6902_v47  ;;  %1747 = vmin.xlane.f32.xlu1 %v6900_v13  ;;  %v1434_v17 = vpop.xlane.xlu1 %1433  ;;  %1942 = vmin.xlane.f32.xlu0 %v6902_v47  ;;  %v1473_v37 = vpop.xlane.xlu0 %1472  ;;  %v1984_v49 = vshra.s32 %v6905_v8, 16  ;;  %v1729_v19 = vshra.s32 %v6908_v0, 16 }
 0x3a5   : > { %vm1498_vm2 = vcmp.eq.f32.partialorder %v6629_v45, %v1434_v17  ;;  %vm1511_vm3 = vcmp.eq.f32.partialorder %v6635_v41, %v1473_v37 }
 0x3a6   : > { %v1530_v50 = vsel %vm1498_vm2, %v8283_v27, 4  ;;  %v1543_v48 = vsel %vm1511_vm3, %v8283_v27, 4  ;;  %v6918_v36 = vcvt.s32.f32 %v1984_v49  ;;  %v6920_v59 = vcvt.s32.f32 %v1729_v19 }
 0x3a7   : > { %v6923_v54 = vsel %vm682_vm0, %v1530_v50, 2147483647  ;;  %v6926_v47 = vsel %vm682_vm0, %v1543_v48, 2147483647 }
 0x3a8   : > { %8352 = vst [vmem:[#allocation84_spill] sm:$0xff] %v6920_v59  ;;  %1987 = vmin.xlane.f32.xlu1 %v6918_v36  ;;  %v1482_v13 = vpop.xlane.xlu1 %1481  ;;  %1732 = vmin.xlane.f32.xlu0 %v6920_v59  ;;  %v1431_v45 = vpop.xlane.xlu0 %1430  ;;  %v1774_v41 = vshra.s32 %v6923_v54, 16  ;;  %v1969_v17 = vshra.s32 %v6926_v47, 16 }
 0x3a9   : > { %vm1514_vm4 = vcmp.eq.f32.partialorder %v6653_v29, %v1482_v13  ;;  %vm1497_vm2 = vcmp.eq.f32.partialorder %v6659_v28, %v1431_v45 }
 0x3aa   : > { %v1546_v37 = vsel %vm1514_vm4, %v8283_v27, 4  ;;  %v1529_v49 = vsel %vm1497_vm2, %v8283_v27, 4  ;;  %v6936_v19 = vcvt.s32.f32 %v1774_v41  ;;  %v6938_v50 = vcvt.s32.f32 %v1969_v17 }
 0x3ab   : > { %v6941_v48 = vsel %vm682_vm0, %v1546_v37, 2147483647  ;;  %v6944_v59 = vsel %vm682_vm0, %v1529_v49, 2147483647 }
 0x3ac   : > { %8353 = vst [vmem:[#allocation85_spill] sm:$0xff] %v6938_v50  ;;  %1777 = vmin.xlane.f32.xlu1 %v6936_v19  ;;  %1972 = vmin.xlane.f32.xlu0 %v6938_v50  ;;  %v1479_v29 = vpop.xlane.xlu0 %1478  ;;  %v2014_v28 = vshra.s32 %v6941_v48, 16  ;;  %v1759_v13 = vshra.s32 %v6944_v59, 16 }
 0x3ad   : > { %vm1513_vm3 = vcmp.eq.f32.partialorder %v6673_v32, %v1479_v29  ;;  %v1563_v32 = vand.u32 65535, %v6680_v11  ;;  %v1593_v11 = vand.u32 65535, %v6707_v56  ;;  %v1833_v56 = vand.u32 65535, %v6725_v2 }
 0x3ae   : > { %v1545_v45 = vsel %vm1513_vm3, %v8283_v27, 4  ;;  %v6952_v41 = vcvt.s32.f32 %v2014_v28  ;;  %v6954_v17 = vcvt.s32.f32 %v1759_v13  ;;  %v1803_v13 = vand.u32 65535, %v6690_v20 }
 0x3af   : > { %v6957_v37 = vsel %vm682_vm0, %v1545_v45, 2147483647  ;;  %v1565_v28 = vcvt.s32.f32 %v1563_v32  ;;  %v1548_v45 = vand.u32 65535, %v6693_v38  ;;  %v1595_v32 = vcvt.s32.f32 %v1593_v11 }
 0x3b0   : > { %8354 = vst [vmem:[#allocation86_spill] sm:$0xff] %v6952_v41  ;;  %8355 = vst [vmem:[#allocation87_spill] sm:$0xff] %v6954_v17  ;;  %2017 = vmin.xlane.f32.xlu1 %v6952_v41  ;;  %1762 = vmin.xlane.f32.xlu0 %v6954_v17  ;;  %v1999_v49 = vshra.s32 %v6957_v37, 16  ;;  %v1805_v41 = vcvt.s32.f32 %v1803_v13  ;;  %v1835_v13 = vcvt.s32.f32 %v1833_v56  ;;  %v1623_v2 = vand.u32 65535, %v6743_v46 }
 0x3b1   : > { %8356 = vst [vmem:[#allocation88_spill] sm:$0xff] %v6957_v37  ;;  %v1788_v37 = vand.u32 65535, %v6710_v5  ;;  %v1578_v5 = vand.u32 65535, %v6728_v3  ;;  %v1818_v3 = vand.u32 65535, %v6746_v1  ;;  %v1863_v46 = vand.u32 65535, %v6761_v43 }
 0x3b2   : > { %v6962_v50 = vcvt.s32.f32 %v1999_v49  ;;  %v1608_v1 = vand.u32 65535, %v6764_v60  ;;  %v1653_v43 = vand.u32 65535, %v6779_v23  ;;  %v1848_v60 = vand.u32 65535, %v6782_v34 }
 0x3b3   : > { %v1865_v56 = vcvt.s32.f32 %v1863_v46  ;;  %v1893_v23 = vand.u32 65535, %v6797_v15  ;;  %v1638_v34 = vand.u32 65535, %v6800_v53  ;;  %v1683_v15 = vand.u32 65535, %v6815_v51 }
 0x3b4   : > { %8357 = vst [vmem:[#allocation89_spill] sm:$0xff] %v6962_v50  ;;  %2002 = vmin.xlane.f32.xlu0 %v6962_v50  ;;  %v1550_v50 = vcvt.s32.f32 %v1548_v45  ;;  %v1878_v53 = vand.u32 65535, %v6818_v31  ;;  %v1923_v51 = vand.u32 65535, %v6833_v40  ;;  %v1668_v31 = vand.u32 65535, %v6836_v12 }
 0x3b5   : > { %v1685_v46 = vcvt.s32.f32 %v1683_v15  ;;  %v1713_v40 = vand.u32 65535, %v6851_v14  ;;  %v1908_v12 = vand.u32 65535, %v6854_v61  ;;  %v1953_v14 = vand.u32 65535, %v6869_v52 }
 0x3b6   : > { %v1698_v61 = vand.u32 65535, %v6872_v63  ;;  %v1743_v52 = vand.u32 65535, %v6887_v26  ;;  %v1938_v63 = vand.u32 65535, %v6890_v16  ;;  %v1983_v26 = vand.u32 65535, %v6905_v8 }
 0x3b7   : > { %v1728_v16 = vand.u32 65535, %v6908_v0  ;;  %v1773_v8 = vand.u32 65535, %v6923_v54  ;;  %v1968_v0 = vand.u32 65535, %v6926_v47  ;;  %v2013_v54 = vand.u32 65535, %v6941_v48 }
 0x3b8   : > { %v1758_v47 = vand.u32 65535, %v6944_v59  ;;  %v8366_v59 = vld [vmem:[#allocation86_spill] sm:$0xff] }
 0x3fd   : > { %v6966_v29 = vpop.xlane.xlu1 %1567 }
 0x3fe   : > { %vm1569_vm4 = vcmp.eq.f32.partialorder %v6687_v9, %v6966_v29 }
 0x3ff   : > { %v1570_v27 = vsel %vm1569_vm4, %v1565_v28, inf  ;;  %v1790_v28 = vcvt.s32.f32 %v1788_v37  ;;  %v1580_v37 = vcvt.s32.f32 %v1578_v5  ;;  %v1610_v5 = vcvt.s32.f32 %v1608_v1 }
 0x400   : > { %1571 = vmin.xlane.f32.xlu1 %v1570_v27  ;;  %v1880_v1 = vcvt.s32.f32 %v1878_v53 }
 0x401   : > { %v6972_v17 = vpop.xlane.xlu1 %1807  ;;  %v6974_v49 = vpop.xlane.xlu0 %1552 }
 0x402   : > { %vm1809_vm2 = vcmp.eq.f32.partialorder %v6702_v57, %v6972_v17  ;;  %vm1554_vm3 = vcmp.eq.f32.partialorder %v6704_v7, %v6974_v49 }
 0x403   : > { %v1810_v20 = vsel %vm1809_vm2, %v1805_v41, inf  ;;  %v1555_v9 = vsel %vm1554_vm3, %v1550_v50, inf }
 0x404   : > { %1811 = vmin.xlane.f32.xlu1 %v1810_v20  ;;  %1556 = vmin.xlane.f32.xlu0 %v1555_v9  ;;  %v1625_v20 = vcvt.s32.f32 %v1623_v2  ;;  %v1820_v9 = vcvt.s32.f32 %v1818_v3 }
 0x405   : > { %v6982_v27 = vpop.xlane.xlu1 %1597  ;;  %v6984_v38 = vpop.xlane.xlu0 %1792 }
 0x406   : > { %vm1599_vm4 = vcmp.eq.f32.partialorder %v6720_v35, %v6982_v27  ;;  %vm1794_vm1 = vcmp.eq.f32.partialorder %v6722_v44, %v6984_v38 }
 0x407   : > { %v1600_v57 = vsel %vm1599_vm4, %v1595_v32, inf  ;;  %v1795_v7 = vsel %vm1794_vm1, %v1790_v28, inf }
 0x408   : > { %1601 = vmin.xlane.f32.xlu1 %v1600_v57  ;;  %1796 = vmin.xlane.f32.xlu0 %v1795_v7 }
 0x409   : > { %v6992_v50 = vpop.xlane.xlu1 %1837  ;;  %v6994_v41 = vpop.xlane.xlu0 %1582 }
 0x40a   : > { %vm1839_vm2 = vcmp.eq.f32.partialorder %v6738_v24, %v6992_v50  ;;  %vm1584_vm3 = vcmp.eq.f32.partialorder %v6740_v30, %v6994_v41 }
 0x40b   : > { %v1840_v35 = vsel %vm1839_vm2, %v1835_v13, inf  ;;  %v1585_v44 = vsel %vm1584_vm3, %v1580_v37, inf  ;;  %v1655_v13 = vcvt.s32.f32 %v1653_v43  ;;  %v1850_v37 = vcvt.s32.f32 %v1848_v60 }
 0x40c   : > { %1841 = vmin.xlane.f32.xlu1 %v1840_v35  ;;  %1586 = vmin.xlane.f32.xlu0 %v1585_v44  ;;  %v1895_v35 = vcvt.s32.f32 %v1893_v23  ;;  %v1640_v44 = vcvt.s32.f32 %v1638_v34  ;;  %v1955_v34 = vcvt.s32.f32 %v1953_v14  ;;  %v1970_v14 = vcvt.s32.f32 %v1968_v0 }
 0x40d   : > { %v7002_v45 = vpop.xlane.xlu1 %1627  ;;  %v7004_v11 = vpop.xlane.xlu0 %1822 }
 0x40e   : > { %vm1629_vm1 = vcmp.eq.f32.partialorder %v6756_v42, %v7002_v45  ;;  %vm1824_vm4 = vcmp.eq.f32.partialorder %v6758_v21, %v7004_v11 }
 0x40f   : > { %v1630_v24 = vsel %vm1629_vm1, %v1625_v20, inf  ;;  %v1825_v30 = vsel %vm1824_vm4, %v1820_v9, inf }
 0x410   : > { %1631 = vmin.xlane.f32.xlu1 %v1630_v24  ;;  %1826 = vmin.xlane.f32.xlu0 %v1825_v30 }
 0x411   : > { %v7012_v32 = vpop.xlane.xlu1 %1867  ;;  %v7014_v28 = vpop.xlane.xlu0 %1612 }
 0x412   : > { %vm1869_vm2 = vcmp.eq.f32.partialorder %v6774_v18, %v7012_v32  ;;  %vm1614_vm3 = vcmp.eq.f32.partialorder %v6776_v55, %v7014_v28 }
 0x413   : > { %v1870_v42 = vsel %vm1869_vm2, %v1865_v56, inf  ;;  %v1615_v21 = vsel %vm1614_vm3, %v1610_v5, inf  ;;  %v1925_v56 = vcvt.s32.f32 %v1923_v51  ;;  %v1670_v5 = vcvt.s32.f32 %v1668_v31 }
 0x414   : > { %1871 = vmin.xlane.f32.xlu1 %v1870_v42  ;;  %1616 = vmin.xlane.f32.xlu0 %v1615_v21  ;;  %v1715_v42 = vcvt.s32.f32 %v1713_v40  ;;  %v1910_v21 = vcvt.s32.f32 %v1908_v12  ;;  %v8363_v40 = vld [vmem:[#allocation84_spill] sm:$0xff] }
 0x415   : > { %v7022_v57 = vpop.xlane.xlu1 %1657  ;;  %v7024_v7 = vpop.xlane.xlu0 %1852 }
 0x416   : > { %vm1659_vm1 = vcmp.eq.f32.partialorder %v6792_v39, %v7022_v57  ;;  %vm1854_vm4 = vcmp.eq.f32.partialorder %v6794_v22, %v7024_v7 }
 0x417   : > { %v1660_v18 = vsel %vm1659_vm1, %v1655_v13, inf  ;;  %v1855_v55 = vsel %vm1854_vm4, %v1850_v37, inf }
 0x418   : > { %1661 = vmin.xlane.f32.xlu1 %v1660_v18  ;;  %1856 = vmin.xlane.f32.xlu0 %v1855_v55  ;;  %v1700_v18 = vcvt.s32.f32 %v1698_v61  ;;  %v8359_v55 = vld [vmem:[#allocation80_spill] sm:$0xff] }
 0x419   : > { %v7032_v2 = vpop.xlane.xlu1 %1897  ;;  %v7034_v3 = vpop.xlane.xlu0 %1642 }
 0x41a   : > { %vm1899_vm2 = vcmp.eq.f32.partialorder %v6810_v58, %v7032_v2  ;;  %vm1644_vm3 = vcmp.eq.f32.partialorder %v6812_v10, %v7034_v3 }
 0x41b   : > { %v1900_v39 = vsel %vm1899_vm2, %v1895_v35, inf  ;;  %v1645_v22 = vsel %vm1644_vm3, %v1640_v44, inf }
 0x41c   : > { %1901 = vmin.xlane.f32.xlu1 %v1900_v39  ;;  %1646 = vmin.xlane.f32.xlu0 %v1645_v22  ;;  %v1745_v39 = vcvt.s32.f32 %v1743_v52  ;;  %v1940_v22 = vcvt.s32.f32 %v1938_v63  ;;  %v8365_v52 = vld [vmem:[#allocation88_spill] sm:$0xff] }
 0x41d   : > { %v7042_v20 = vpop.xlane.xlu1 %1687  ;;  %v7044_v9 = vpop.xlane.xlu0 %1882  ;;  %v1998_v48 = vand.u32 65535, %v8365_v52 }
 0x41e   : > { %vm1689_vm1 = vcmp.eq.f32.partialorder %v6828_v4, %v7042_v20  ;;  %vm1884_vm4 = vcmp.eq.f32.partialorder %v6830_v62, %v7044_v9 }
 0x41f   : > { %v1690_v58 = vsel %vm1689_vm1, %v1685_v46, inf  ;;  %v1885_v10 = vsel %vm1884_vm4, %v1880_v1, inf  ;;  %v8361_v46 = vld [vmem:[#allocation82_spill] sm:$0xff]  ;;  %v8362_v1 = vld [vmem:[#allocation83_spill] sm:$0xff] }
 0x420   : > { %1691 = vmin.xlane.f32.xlu1 %v1690_v58  ;;  %1886 = vmin.xlane.f32.xlu0 %v1885_v10 }
 0x421   : > { %v7052_v24 = vpop.xlane.xlu1 %1927  ;;  %v7054_v30 = vpop.xlane.xlu0 %1672 }
 0x422   : > { %vm1929_vm2 = vcmp.eq.f32.partialorder %v6846_v6, %v7052_v24  ;;  %vm1674_vm3 = vcmp.eq.f32.partialorder %v6848_v25, %v7054_v30  ;;  %v8358_v6 = vld [vmem:[#allocation79_spill] sm:$0xff] }
 0x423   : > { %v1930_v4 = vsel %vm1929_vm2, %v1925_v56, inf  ;;  %v1675_v62 = vsel %vm1674_vm3, %v1670_v5, inf  ;;  %v1985_v56 = vcvt.s32.f32 %v1983_v26  ;;  %v1730_v5 = vcvt.s32.f32 %v1728_v16 }
 0x424   : > { %1931 = vmin.xlane.f32.xlu1 %v1930_v4  ;;  %1676 = vmin.xlane.f32.xlu0 %v1675_v62  ;;  %v1814_v26 = vcvt.f32.s32 %v6972_v17 }
 0x425   : > { %v7062_v43 = vpop.xlane.xlu1 %1717  ;;  %v7064_v60 = vpop.xlane.xlu0 %1912 }
 0x426   : > { %vm1719_vm1 = vcmp.eq.f32.partialorder %v6864_v33, %v7062_v43  ;;  %vm1914_vm4 = vcmp.eq.f32.partialorder %v8358_v6, %v7064_v60  ;;  %v8360_v33 = vld [vmem:[#allocation81_spill] sm:$0xff] }
 0x427   : > { %v1720_v25 = vsel %vm1719_vm1, %v1715_v42, inf  ;;  %v1915_v13 = vsel %vm1914_vm4, %v1910_v21, inf  ;;  %v1775_v21 = vcvt.s32.f32 %v1773_v8  ;;  %v1799_v8 = vcvt.f32.s32 %v6984_v38 }
 0x428   : > { %1721 = vmin.xlane.f32.xlu1 %v1720_v25  ;;  %1916 = vmin.xlane.f32.xlu0 %v1915_v13 }
 0x429   : > { %v7072_v37 = vpop.xlane.xlu1 %1957  ;;  %v7074_v23 = vpop.xlane.xlu0 %1702  ;;  %v1800_v38 = vshll.u32 %v1799_v8, 16  ;;  %v1874_v8 = vcvt.f32.s32 %v7012_v32 }
 0x42a   : > { %vm1959_vm2 = vcmp.eq.f32.partialorder %v8359_v55, %v7072_v37  ;;  %vm1704_vm3 = vcmp.eq.f32.partialorder %v8360_v33, %v7074_v23 }
 0x42b   : > { %v1960_v35 = vsel %vm1959_vm2, %v1955_v34, inf  ;;  %v1705_v44 = vsel %vm1704_vm3, %v1700_v18, inf  ;;  %v2015_v34 = vcvt.s32.f32 %v2013_v54  ;;  %v1760_v18 = vcvt.s32.f32 %v1758_v47  ;;  %v8371_v47 = vld [vmem:[#allocation14_spill] sm:$0xff] }
 0x42c   : > { %1961 = vmin.xlane.f32.xlu1 %v1960_v35  ;;  %1706 = vmin.xlane.f32.xlu0 %v1705_v44  ;;  %v2000_v35 = vcvt.s32.f32 %v1998_v48  ;;  %v8368_v44 = vld [vmem:[#allocation89_spill] sm:$0xff]  ;;  %v1634_v48 = vcvt.f32.s32 %v7002_v45 }
 0x42d   : > { %v7082_v15 = vpop.xlane.xlu1 %1747  ;;  %v7084_v53 = vpop.xlane.xlu0 %1942 }
 0x42e   : > { %vm1749_vm1 = vcmp.eq.f32.partialorder %v8361_v46, %v7082_v15  ;;  %vm1944_vm4 = vcmp.eq.f32.partialorder %v8362_v1, %v7084_v53  ;;  %v1559_v1 = vcvt.f32.s32 %v6974_v49  ;;  %v1844_v49 = vcvt.f32.s32 %v6992_v50 }
 0x42f   : > { %v1750_v51 = vsel %vm1749_vm1, %v1745_v39, inf  ;;  %v1945_v31 = vsel %vm1944_vm4, %v1940_v22, inf  ;;  %v1574_v22 = vcvt.f32.s32 %v6966_v29 }
 0x430   : > { %1751 = vmin.xlane.f32.xlu1 %v1750_v51  ;;  %1946 = vmin.xlane.f32.xlu0 %v1945_v31 }
 0x431   : > { %v7092_v58 = vpop.xlane.xlu1 %1987  ;;  %v7094_v10 = vpop.xlane.xlu0 %1732  ;;  %v1575_v46 = vshll.u32 %v1574_v22, 16  ;;  %v1829_v22 = vcvt.f32.s32 %v7004_v11 }
 0x432   : > { %vm1989_vm2 = vcmp.eq.f32.partialorder %v6918_v36, %v7092_v58  ;;  %vm1734_vm3 = vcmp.eq.f32.partialorder %v8363_v40, %v7094_v10  ;;  %v8364_v36 = vld [vmem:[#allocation85_spill] sm:$0xff] }
 0x433   : > { %v1990_v12 = vsel %vm1989_vm2, %v1985_v56, inf  ;;  %v1735_v4 = vsel %vm1734_vm3, %v1730_v5, inf  ;;  %v1815_v56 = vshll.u32 %v1814_v26, 16  ;;  %v1604_v5 = vcvt.f32.s32 %v6982_v27 }
 0x434   : > { %1991 = vmin.xlane.f32.xlu1 %v1990_v12  ;;  %1736 = vmin.xlane.f32.xlu0 %v1735_v4  ;;  %v1560_v12 = vshll.u32 %v1559_v1, 16  ;;  %v8369_v4 = vld [vmem:[#allocation46_spill] sm:$0xff]  ;;  %v1830_v17 = vshll.u32 %v1829_v22, 16 }
 0x435   : > { %v7102_v62 = vpop.xlane.xlu1 %1777  ;;  %v7104_v42 = vpop.xlane.xlu0 %1972  ;;  %v1605_v27 = vshll.u32 %v1604_v5, 16 }
 0x436   : > { %vm1779_vm1 = vcmp.eq.f32.partialorder %v6936_v19, %v7102_v62  ;;  %vm1974_vm4 = vcmp.eq.f32.partialorder %v8364_v36, %v7104_v42  ;;  %v8367_v19 = vld [vmem:[#allocation87_spill] sm:$0xff] }
 0x437   : > { %v1780_v61 = vsel %vm1779_vm1, %v1775_v21, inf  ;;  %v1975_v6 = vsel %vm1974_vm4, %v1970_v14, inf }
 0x438   : > { %1781 = vmin.xlane.f32.xlu1 %v1780_v61  ;;  %1976 = vmin.xlane.f32.xlu0 %v1975_v6  ;;  %v1589_v61 = vcvt.f32.s32 %v6994_v41 }
 0x439   : > { %v7112_v25 = vpop.xlane.xlu1 %2017  ;;  %v7114_v13 = vpop.xlane.xlu0 %1762 }
 0x43a   : > { %vm2019_vm2 = vcmp.eq.f32.partialorder %v8366_v59, %v7112_v25  ;;  %vm1764_vm3 = vcmp.eq.f32.partialorder %v8367_v19, %v7114_v13  ;;  %v1845_v19 = vshll.u32 %v1844_v49, 16  ;;  %v1619_v49 = vcvt.f32.s32 %v7014_v28 }
 0x43b   : > { %v2020_v63 = vsel %vm2019_vm2, %v2015_v34, inf  ;;  %v1765_v55 = vsel %vm1764_vm3, %v1760_v18, inf }
 0x43c   : > { %2021 = vmin.xlane.f32.xlu1 %v2020_v63  ;;  %1766 = vmin.xlane.f32.xlu0 %v1765_v55  ;;  %v8373_v55 = vld [vmem:[#allocation15_spill] sm:$0xff] }
 0x43d   : > { %v7121_v33 = vpop.xlane.xlu0 %2002 }
 0x43e   : > { %vm2004_vm1 = vcmp.eq.f32.partialorder %v8368_v44, %v7121_v33 }
 0x43f   : > { %v2005_v39 = vsel %vm2004_vm1, %v2000_v35, inf }
 0x440   : > { %2006 = vmin.xlane.f32.xlu0 %v2005_v39  ;;  %v1590_v39 = vshll.u32 %v1589_v61, 16 }
 0x489   : > { %v1572_v16 = vpop.xlane.xlu1 %1571 }
 0x48a   : > { %v1573_v51 = vcvt.f32.s32 %v1572_v16 }
 0x48c   : > { %v1576_v31 = vadd.s32 %v1575_v46, %v1573_v51  ;;  %v8375_v46 = vld [vmem:[#allocation16_spill] sm:$0xff] }
 0x48d   : > { %v1812_v0 = vpop.xlane.xlu1 %1811  ;;  %v1557_v40 = vpop.xlane.xlu0 %1556 }
 0x48e   : > { %vm2028_vm4 = vcmp.eq.s32.totalorder %v8369_v4, %v1576_v31  ;;  %v1813_v21 = vcvt.f32.s32 %v1812_v0  ;;  %v1558_v29 = vcvt.f32.s32 %v1557_v40 }
 0x48f   : > { %vm2060_vm2 = vmor %vm1324_vm5, %vm2028_vm4 }
 0x490   : > { %v1816_v14 = vadd.s32 %v1815_v56, %v1813_v21  ;;  %v1561_v54 = vadd.s32 %v1560_v12, %v1558_v29  ;;  %v7136_v36 = vsel %vm2060_vm2, %v8371_v47, -inf  ;;  %v1635_v56 = vshll.u32 %v1634_v48, 16  ;;  %v8377_v12 = vld [vmem:[#allocation17_spill] sm:$0xff]  ;;  %v8381_v48 = vld [vmem:[#allocation18_spill] sm:$0xff] }
 0x491   : > { %v1602_v6 = vpop.xlane.xlu1 %1601  ;;  %v1797_v34 = vpop.xlane.xlu0 %1796  ;;  %v2126_v18 = vsel %vm682_vm0, %v7136_v36, -inf }
 0x492   : > { %vm2044_vm3 = vcmp.eq.s32.totalorder %v8369_v4, %v1816_v14  ;;  %vm2027_vm5 = vcmp.eq.s32.totalorder %v8369_v4, %v1561_v54  ;;  %v1603_v52 = vcvt.f32.s32 %v1602_v6  ;;  %v1798_v50 = vcvt.f32.s32 %v1797_v34  ;;  %2127 = vmax.xlane.f32.xlu1 %v2126_v18 }
 0x493   : > { %vm2076_vm1 = vmor %vm1340_vm6, %vm2044_vm3  ;;  %v1664_v6 = vcvt.f32.s32 %v7022_v57  ;;  %v1875_v18 = vshll.u32 %v1874_v8, 16  ;;  %v1859_v57 = vcvt.f32.s32 %v7024_v7 }
 0x494   : > { %v1606_v41 = vadd.s32 %v1605_v27, %v1603_v52  ;;  %v1801_v63 = vadd.s32 %v1800_v38, %v1798_v50  ;;  %v7148_v35 = vsel %vm2076_vm1, %v8373_v55, -inf  ;;  %vm2059_vm4 = vmor %vm1323_vm7, %vm2027_vm5  ;;  %v8379_v27 = vld [vmem:[#allocation19_spill] sm:$0xff] }
 0x495   : > { %v1842_v26 = vpop.xlane.xlu1 %1841  ;;  %v1587_v16 = vpop.xlane.xlu0 %1586  ;;  %v2174_v45 = vsel %vm682_vm0, %v7148_v35, -inf  ;;  %v7157_v1 = vsel %vm2059_vm4, %v8375_v46, -inf }
 0x496   : > { %vm2030_vm6 = vcmp.eq.s32.totalorder %v8369_v4, %v1606_v41  ;;  %vm2043_vm2 = vcmp.eq.s32.totalorder %v8369_v4, %v1801_v63  ;;  %v1843_v51 = vcvt.f32.s32 %v1842_v26  ;;  %v1588_v31 = vcvt.f32.s32 %v1587_v16  ;;  %2175 = vmax.xlane.f32.xlu1 %v2174_v45 }
 0x497   : > { %v2123_v5 = vsel %vm682_vm0, %v7157_v1, -inf  ;;  %vm2062_vm7 = vmor %vm1326_vm8, %vm2030_vm6  ;;  %v1620_v41 = vshll.u32 %v1619_v49, 16  ;;  %v1665_v45 = vshll.u32 %v1664_v6, 16  ;;  %v8387_v49 = vld [vmem:[#allocation21_spill] sm:$0xff] }
 0x498   : > { %v1846_v0 = vadd.s32 %v1845_v19, %v1843_v51  ;;  %v1591_v40 = vadd.s32 %v1590_v39, %v1588_v31  ;;  %2124 = vmax.xlane.f32.xlu0 %v2123_v5  ;;  %v7168_v21 = vsel %vm2062_vm7, %v8377_v12, -inf  ;;  %vm2075_vm3 = vmor %vm1339_vm9, %vm2043_vm2  ;;  %v8383_v39 = vld [vmem:[#allocation20_spill] sm:$0xff]  ;;  %v1904_v51 = vcvt.f32.s32 %v7032_v2  ;;  %v8385_v5 = vld [vmem:[#allocation22_spill] sm:$0xff] }
 0x499   : > { %v1632_v14 = vpop.xlane.xlu1 %1631  ;;  %v1827_v54 = vpop.xlane.xlu0 %1826  ;;  %v2132_v47 = vsel %vm682_vm0, %v7168_v21, -inf  ;;  %v7177_v32 = vsel %vm2075_vm3, %v8379_v27, -inf }
 0x49a   : > { %vm2046_vm8 = vcmp.eq.s32.totalorder %v8369_v4, %v1846_v0  ;;  %vm2029_vm5 = vcmp.eq.s32.totalorder %v8369_v4, %v1591_v40  ;;  %v1633_v38 = vcvt.f32.s32 %v1632_v14  ;;  %v1828_v61 = vcvt.f32.s32 %v1827_v54  ;;  %2133 = vmax.xlane.f32.xlu1 %v2132_v47 }
 0x49b   : > { %v2171_v28 = vsel %vm682_vm0, %v7177_v32, -inf  ;;  %vm2078_vm9 = vmor %vm1342_vm10, %vm2046_vm8  ;;  %v1860_v0 = vshll.u32 %v1859_v57, 16  ;;  %v1649_v40 = vcvt.f32.s32 %v7034_v3  ;;  %v1694_v47 = vcvt.f32.s32 %v7042_v20 }
 0x49c   : > { %v1636_v52 = vadd.s32 %v1635_v56, %v1633_v38  ;;  %v1831_v50 = vadd.s32 %v1830_v17, %v1828_v61  ;;  %2172 = vmax.xlane.f32.xlu0 %v2171_v28  ;;  %v7188_v59 = vsel %vm2078_vm9, %v8381_v48, -inf  ;;  %vm2061_vm1 = vmor %vm1325_vm11, %vm2029_vm5  ;;  %v1905_v38 = vshll.u32 %v1904_v51, 16  ;;  %v8389_v28 = vld [vmem:[#allocation24_spill] sm:$0xff]  ;;  %v8395_v51 = vld [vmem:[#allocation59_spill] sm:$0xff] }
 0x49d   : > { %v1872_v63 = vpop.xlane.xlu1 %1871  ;;  %v1617_v55 = vpop.xlane.xlu0 %1616  ;;  %v2180_v44 = vsel %vm682_vm0, %v7188_v59, -inf  ;;  %v7197_v22 = vsel %vm2061_vm1, %v8383_v39, -inf  ;;  %v1889_v20 = vcvt.f32.s32 %v7044_v9  ;;  %v8392_v9 = vld [vmem:[#allocation58_spill] sm:$0xff]  ;;  %vm8396_vm5 = vcmp.eq.s32.totalorder %v8369_v4, %v8395_v51 }
 0x49e   : > { %vm2032_vm10 = vcmp.eq.s32.totalorder %v8369_v4, %v1636_v52  ;;  %vm2045_vm4 = vcmp.eq.s32.totalorder %v8369_v4, %v1831_v50  ;;  %v1873_v26 = vcvt.f32.s32 %v1872_v63  ;;  %v1618_v16 = vcvt.f32.s32 %v1617_v55  ;;  %2181 = vmax.xlane.f32.xlu1 %v2180_v44 }
 0x49f   : > { %v2129_v46 = vsel %vm682_vm0, %v7197_v22, -inf  ;;  %vm2064_vm11 = vmor %vm1328_vm12, %vm2032_vm10  ;;  %v1650_v52 = vshll.u32 %v1649_v40, 16  ;;  %v1695_v44 = vshll.u32 %v1694_v47, 16  ;;  %v8397_v40 = vld [vmem:[#allocation25_spill] sm:$0xff] }
 0x4a0   : > { %v1876_v31 = vadd.s32 %v1875_v18, %v1873_v26  ;;  %v1621_v56 = vadd.s32 %v1620_v41, %v1618_v16  ;;  %2130 = vmax.xlane.f32.xlu0 %v2129_v46  ;;  %v7208_v11 = vsel %vm2064_vm11, %v8385_v5, -inf  ;;  %vm2077_vm6 = vmor %vm1341_vm13, %vm2045_vm4  ;;  %v8391_v41 = vld [vmem:[#allocation23_spill] sm:$0xff]  ;;  %v1934_v26 = vcvt.f32.s32 %v7052_v24  ;;  %v8394_v46 = vld [vmem:[#allocation26_spill] sm:$0xff] }
 0x4a1   : > { %v1662_v12 = vpop.xlane.xlu1 %1661  ;;  %v1857_v29 = vpop.xlane.xlu0 %1856  ;;  %v2138_v17 = vsel %vm682_vm0, %v7208_v11, -inf  ;;  %v7217_v2 = vsel %vm2077_vm6, %v8387_v49, -inf  ;;  %v8398_v49 = vld [vmem:[#allocation60_spill] sm:$0xff] }
 0x4a2   : > { %vm2048_vm12 = vcmp.eq.s32.totalorder %v8369_v4, %v1876_v31  ;;  %vm2031_vm2 = vcmp.eq.s32.totalorder %v8369_v4, %v1621_v56  ;;  %v1663_v14 = vcvt.f32.s32 %v1662_v12  ;;  %v1858_v54 = vcvt.f32.s32 %v1857_v29  ;;  %2139 = vmax.xlane.f32.xlu1 %v2138_v17 }
 0x4a3   : > { %v2177_v3 = vsel %vm682_vm0, %v7217_v2, -inf  ;;  %vm2080_vm13 = vmor %vm1344_vm14, %vm2048_vm12  ;;  %v1890_v31 = vshll.u32 %v1889_v20, 16  ;;  %v1679_v56 = vcvt.f32.s32 %v7054_v30  ;;  %v1724_v17 = vcvt.f32.s32 %v7062_v43 }
 0x4a4   : > { %v1666_v61 = vadd.s32 %v1665_v45, %v1663_v14  ;;  %v1861_v6 = vadd.s32 %v1860_v0, %v1858_v54  ;;  %2178 = vmax.xlane.f32.xlu0 %v2177_v3  ;;  %v7228_v34 = vsel %vm2080_vm13, %v8389_v28, -inf  ;;  %vm2063_vm7 = vmor %vm1327_vm15, %vm2031_vm2  ;;  %vm8393_vm15 = vcmp.eq.s32.totalorder %v8369_v4, %v8392_v9  ;;  %v8400_v3 = vld [vmem:[#allocation28_spill] sm:$0xff] }
 0x4a5   : > { %v1902_v50 = vpop.xlane.xlu1 %1901  ;;  %v1647_v48 = vpop.xlane.xlu0 %1646  ;;  %v2186_v19 = vsel %vm682_vm0, %v7228_v34, -inf  ;;  %v7237_v57 = vsel %vm2063_vm7, %v8391_v41, -inf  ;;  %vm8399_vm4 = vcmp.eq.s32.totalorder %v8369_v4, %v8398_v49  ;;  %v1935_v14 = vshll.u32 %v1934_v26, 16  ;;  %v8407_v26 = vld [vmem:[#allocation63_spill] sm:$0xff] }
 0x4a6   : > { %vm2034_vm14 = vcmp.eq.s32.totalorder %v8369_v4, %v1666_v61  ;;  %vm2047_vm3 = vcmp.eq.s32.totalorder %v8369_v4, %v1861_v6  ;;  %v1903_v63 = vcvt.f32.s32 %v1902_v50  ;;  %v1648_v55 = vcvt.f32.s32 %v1647_v48  ;;  %2187 = vmax.xlane.f32.xlu1 %v2186_v19 }
 0x4a7   : > { %v2135_v39 = vsel %vm682_vm0, %v7237_v57, -inf  ;;  %vm2066_vm8 = vmor %vm8393_vm15, %vm2034_vm14  ;;  %v1680_v61 = vshll.u32 %v1679_v56, 16  ;;  %v1919_v43 = vcvt.f32.s32 %v7064_v60  ;;  %v1725_v19 = vshll.u32 %v1724_v17, 16  ;;  %v8404_v60 = vld [vmem:[#allocation62_spill] sm:$0xff]  ;;  %v8409_v56 = vld [vmem:[#allocation29_spill] sm:$0xff] }
 0x4a8   : > { %v1906_v16 = vadd.s32 %v1905_v38, %v1903_v63  ;;  %v1651_v45 = vadd.s32 %v1650_v52, %v1648_v55  ;;  %2136 = vmax.xlane.f32.xlu0 %v2135_v39  ;;  %v7248_v7 = vsel %vm2066_vm8, %v8394_v46, -inf  ;;  %vm2079_vm9 = vmor %vm8396_vm5, %vm2047_vm3  ;;  %v8401_v38 = vld [vmem:[#allocation61_spill] sm:$0xff]  ;;  %v8403_v52 = vld [vmem:[#allocation27_spill] sm:$0xff]  ;;  %vm8405_vm7 = vcmp.eq.s32.totalorder %v8369_v4, %v8404_v60 }
 0x4a9   : > { %v1692_v5 = vpop.xlane.xlu1 %1691  ;;  %v1887_v8 = vpop.xlane.xlu0 %1886  ;;  %v2144_v0 = vsel %vm682_vm0, %v7248_v7, -inf  ;;  %v7257_v24 = vsel %vm2079_vm9, %v8397_v40, -inf  ;;  %vm8402_vm6 = vcmp.eq.s32.totalorder %v8369_v4, %v8401_v38  ;;  %v1964_v63 = vcvt.f32.s32 %v7072_v37  ;;  %v8406_v39 = vld [vmem:[#allocation30_spill] sm:$0xff]  ;;  %v8410_v40 = vld [vmem:[#allocation64_spill] sm:$0xff] }
 0x4aa   : > { %vm2050_vm1 = vcmp.eq.s32.totalorder %v8369_v4, %v1906_v16  ;;  %vm2033_vm10 = vcmp.eq.s32.totalorder %v8369_v4, %v1651_v45  ;;  %v1693_v12 = vcvt.f32.s32 %v1692_v5  ;;  %v1888_v29 = vcvt.f32.s32 %v1887_v8  ;;  %2145 = vmax.xlane.f32.xlu1 %v2144_v0 }
 0x4ab   : > { %v2183_v30 = vsel %vm682_vm0, %v7257_v24, -inf  ;;  %vm2082_vm11 = vmor %vm8399_vm4, %vm2050_vm1  ;;  %vm8408_vm3 = vcmp.eq.s32.totalorder %v8369_v4, %v8407_v26  ;;  %v1920_v16 = vshll.u32 %v1919_v43, 16  ;;  %v1709_v45 = vcvt.f32.s32 %v7074_v23 }
 0x4ac   : > { %v1696_v54 = vadd.s32 %v1695_v44, %v1693_v12  ;;  %v1891_v47 = vadd.s32 %v1890_v31, %v1888_v29  ;;  %2184 = vmax.xlane.f32.xlu0 %v2183_v30  ;;  %v7268_v27 = vsel %vm2082_vm11, %v8400_v3, -inf  ;;  %vm2065_vm12 = vmor %vm8402_vm6, %vm2033_vm10  ;;  %v1754_v0 = vcvt.f32.s32 %v7082_v15  ;;  %v8412_v30 = vld [vmem:[#allocation32_spill] sm:$0xff] }
 0x4ad   : > { %v1932_v6 = vpop.xlane.xlu1 %1931  ;;  %v1677_v28 = vpop.xlane.xlu0 %1676  ;;  %v2192_v18 = vsel %vm682_vm0, %v7268_v27, -inf  ;;  %v7277_v20 = vsel %vm2065_vm12, %v8403_v52, -inf  ;;  %vm8411_vm9 = vcmp.eq.s32.totalorder %v8369_v4, %v8410_v40  ;;  %v1965_v12 = vshll.u32 %v1964_v63, 16  ;;  %v8419_v63 = vld [vmem:[#allocation67_spill] sm:$0xff] }
 0x4ae   : > { %vm2036_vm2 = vcmp.eq.s32.totalorder %v8369_v4, %v1696_v54  ;;  %vm2049_vm13 = vcmp.eq.s32.totalorder %v8369_v4, %v1891_v47  ;;  %v1933_v50 = vcvt.f32.s32 %v1932_v6  ;;  %v1678_v48 = vcvt.f32.s32 %v1677_v28  ;;  %2193 = vmax.xlane.f32.xlu1 %v2192_v18 }
 0x4af   : > { %v2141_v41 = vsel %vm682_vm0, %v7277_v20, -inf  ;;  %vm2068_vm14 = vmor %vm8405_vm7, %vm2036_vm2  ;;  %v1710_v54 = vshll.u32 %v1709_v45, 16  ;;  %v1949_v15 = vcvt.f32.s32 %v7084_v53  ;;  %v1755_v18 = vshll.u32 %v1754_v0, 16  ;;  %v8416_v53 = vld [vmem:[#allocation66_spill] sm:$0xff]  ;;  %v8421_v45 = vld [vmem:[#allocation33_spill] sm:$0xff] }
 0x4b0   : > { %v1936_v55 = vadd.s32 %v1935_v14, %v1933_v50  ;;  %v1681_v44 = vadd.s32 %v1680_v61, %v1678_v48  ;;  %2142 = vmax.xlane.f32.xlu0 %v2141_v41  ;;  %v7288_v9 = vsel %vm2068_vm14, %v8406_v39, -inf  ;;  %vm2081_vm15 = vmor %vm8408_vm3, %vm2049_vm13  ;;  %v8413_v14 = vld [vmem:[#allocation65_spill] sm:$0xff]  ;;  %v8415_v61 = vld [vmem:[#allocation31_spill] sm:$0xff]  ;;  %vm8417_vm12 = vcmp.eq.s32.totalorder %v8369_v4, %v8416_v53 }
 0x4b1   : > { %v1722_v46 = vpop.xlane.xlu1 %1721  ;;  %v1917_v51 = vpop.xlane.xlu0 %1916  ;;  %v2150_v31 = vsel %vm682_vm0, %v7288_v9, -inf  ;;  %v7297_v37 = vsel %vm2081_vm15, %v8409_v56, -inf  ;;  %vm8414_vm10 = vcmp.eq.s32.totalorder %v8369_v4, %v8413_v14  ;;  %v1994_v50 = vcvt.f32.s32 %v7092_v58  ;;  %v8418_v41 = vld [vmem:[#allocation34_spill] sm:$0xff]  ;;  %v8422_v56 = vld [vmem:[#allocation68_spill] sm:$0xff] }
 0x4b2   : > { %vm2052_vm8 = vcmp.eq.s32.totalorder %v8369_v4, %v1936_v55  ;;  %vm2035_vm5 = vcmp.eq.s32.totalorder %v8369_v4, %v1681_v44  ;;  %v1723_v5 = vcvt.f32.s32 %v1722_v46  ;;  %v1918_v8 = vcvt.f32.s32 %v1917_v51  ;;  %2151 = vmax.xlane.f32.xlu1 %v2150_v31 }
 0x4b3   : > { %v2189_v23 = vsel %vm682_vm0, %v7297_v37, -inf  ;;  %vm2084_vm1 = vmor %vm8411_vm9, %vm2052_vm8  ;;  %vm8420_vm13 = vcmp.eq.s32.totalorder %v8369_v4, %v8419_v63  ;;  %v1950_v55 = vshll.u32 %v1949_v15, 16  ;;  %v1739_v44 = vcvt.f32.s32 %v7094_v10 }
 0x4b4   : > { %v1726_v29 = vadd.s32 %v1725_v19, %v1723_v5  ;;  %v1921_v17 = vadd.s32 %v1920_v16, %v1918_v8  ;;  %2190 = vmax.xlane.f32.xlu0 %v2189_v23  ;;  %v7308_v49 = vsel %vm2084_vm1, %v8412_v30, -inf  ;;  %vm2067_vm4 = vmor %vm8414_vm10, %vm2035_vm5  ;;  %v1784_v31 = vcvt.f32.s32 %v7102_v62  ;;  %v8424_v23 = vld [vmem:[#allocation36_spill] sm:$0xff] }
 0x4b5   : > { %v1962_v47 = vpop.xlane.xlu1 %1961  ;;  %v1707_v3 = vpop.xlane.xlu0 %1706  ;;  %v2198_v38 = vsel %vm682_vm0, %v7308_v49, -inf  ;;  %v7317_v43 = vsel %vm2067_vm4, %v8415_v61, -inf  ;;  %vm8423_vm15 = vcmp.eq.s32.totalorder %v8369_v4, %v8422_v56  ;;  %v1995_v5 = vshll.u32 %v1994_v50, 16  ;;  %v8431_v50 = vld [vmem:[#allocation71_spill] sm:$0xff]  ;;  %v8437_v56 = vld [vmem:[#allocation73_spill] sm:$0xff] }
 0x4b6   : > { %vm2038_vm11 = vcmp.eq.s32.totalorder %v8369_v4, %v1726_v29  ;;  %vm2051_vm6 = vcmp.eq.s32.totalorder %v8369_v4, %v1921_v17  ;;  %v1963_v6 = vcvt.f32.s32 %v1962_v47  ;;  %v1708_v28 = vcvt.f32.s32 %v1707_v3  ;;  %2199 = vmax.xlane.f32.xlu1 %v2198_v38 }
 0x4b7   : > { %v2147_v52 = vsel %vm682_vm0, %v7317_v43, -inf  ;;  %vm2070_vm2 = vmor %vm8417_vm12, %vm2038_vm11  ;;  %v1740_v29 = vshll.u32 %v1739_v44, 16  ;;  %v1979_v62 = vcvt.f32.s32 %v7104_v42  ;;  %v1785_v38 = vshll.u32 %v1784_v31, 16  ;;  %v8428_v42 = vld [vmem:[#allocation70_spill] sm:$0xff]  ;;  %v8433_v44 = vld [vmem:[#allocation37_spill] sm:$0xff] }
 0x4b8   : > { %v1966_v48 = vadd.s32 %v1965_v12, %v1963_v6  ;;  %v1711_v19 = vadd.s32 %v1710_v54, %v1708_v28  ;;  %2148 = vmax.xlane.f32.xlu0 %v2147_v52  ;;  %v7328_v60 = vsel %vm2070_vm2, %v8418_v41, -inf  ;;  %vm2083_vm7 = vmor %vm8420_vm13, %vm2051_vm6  ;;  %v8425_v12 = vld [vmem:[#allocation69_spill] sm:$0xff]  ;;  %v8427_v54 = vld [vmem:[#allocation35_spill] sm:$0xff]  ;;  %vm8429_vm4 = vcmp.eq.s32.totalorder %v8369_v4, %v8428_v42 }
 0x4b9   : > { %v1752_v39 = vpop.xlane.xlu1 %1751  ;;  %v1947_v26 = vpop.xlane.xlu0 %1946  ;;  %v2156_v16 = vsel %vm682_vm0, %v7328_v60, -inf  ;;  %v7337_v58 = vsel %vm2083_vm7, %v8421_v45, -inf  ;;  %vm8426_vm5 = vcmp.eq.s32.totalorder %v8369_v4, %v8425_v12  ;;  %v2024_v6 = vcvt.f32.s32 %v7112_v25  ;;  %v8430_v52 = vld [vmem:[#allocation38_spill] sm:$0xff]  ;;  %v8436_v31 = vld [vmem:[#allocation40_spill] sm:$0xff] }
 0x4ba   : > { %vm2054_vm14 = vcmp.eq.s32.totalorder %v8369_v4, %v1966_v48  ;;  %vm2037_vm3 = vcmp.eq.s32.totalorder %v8369_v4, %v1711_v19  ;;  %v1753_v46 = vcvt.f32.s32 %v1752_v39  ;;  %v1948_v51 = vcvt.f32.s32 %v1947_v26  ;;  %2157 = vmax.xlane.f32.xlu1 %v2156_v16 }
 0x4bb   : > { %v2195_v10 = vsel %vm682_vm0, %v7337_v58, -inf  ;;  %vm2086_vm8 = vmor %vm8423_vm15, %vm2054_vm14  ;;  %vm8432_vm6 = vcmp.eq.s32.totalorder %v8369_v4, %v8431_v50  ;;  %v1980_v48 = vshll.u32 %v1979_v62, 16  ;;  %v1769_v19 = vcvt.f32.s32 %v7114_v13  ;;  %v8434_v13 = vld [vmem:[#allocation72_spill] sm:$0xff] }
 0x4bc   : > { %v1756_v8 = vadd.s32 %v1755_v18, %v1753_v46  ;;  %v1951_v0 = vadd.s32 %v1950_v55, %v1948_v51  ;;  %2196 = vmax.xlane.f32.xlu0 %v2195_v10  ;;  %v7348_v40 = vsel %vm2086_vm8, %v8424_v23, -inf  ;;  %vm2069_vm9 = vmor %vm8426_vm5, %vm2037_vm3  ;;  %vm8435_vm7 = vcmp.eq.s32.totalorder %v8369_v4, %v8434_v13 }
 0x4bd   : > { %v1992_v17 = vpop.xlane.xlu1 %1991  ;;  %v1737_v30 = vpop.xlane.xlu0 %1736  ;;  %v2204_v14 = vsel %vm682_vm0, %v7348_v40, -inf  ;;  %v7357_v15 = vsel %vm2069_vm9, %v8427_v54, -inf  ;;  %v2025_v45 = vshll.u32 %v2024_v6, 16  ;;  %vm8438_vm3 = vcmp.eq.s32.totalorder %v8369_v4, %v8437_v56 }
 0x4be   : > { %vm2040_vm1 = vcmp.eq.s32.totalorder %v8369_v4, %v1756_v8  ;;  %vm2053_vm10 = vcmp.eq.s32.totalorder %v8369_v4, %v1951_v0  ;;  %v1993_v47 = vcvt.f32.s32 %v1992_v17  ;;  %v1738_v3 = vcvt.f32.s32 %v1737_v30  ;;  %2205 = vmax.xlane.f32.xlu1 %v2204_v14 }
 0x4bf   : > { %v2153_v61 = vsel %vm682_vm0, %v7357_v15, -inf  ;;  %vm2072_vm11 = vmor %vm8429_vm4, %vm2040_vm1  ;;  %v2009_v8 = vcvt.f32.s32 %v7121_v33  ;;  %v8440_v33 = vld [vmem:[#allocation74_spill] sm:$0xff] }
 0x4c0   : > { %v1996_v28 = vadd.s32 %v1995_v5, %v1993_v47  ;;  %v1741_v18 = vadd.s32 %v1740_v29, %v1738_v3  ;;  %2154 = vmax.xlane.f32.xlu0 %v2153_v61  ;;  %v7368_v53 = vsel %vm2072_vm11, %v8430_v52, -inf  ;;  %vm2085_vm12 = vmor %vm8432_vm6, %vm2053_vm10  ;;  %v1770_v5 = vshll.u32 %v1769_v19, 16  ;;  %v8439_v29 = vld [vmem:[#allocation39_spill] sm:$0xff]  ;;  %v8442_v3 = vld [vmem:[#allocation42_spill] sm:$0xff] }
 0x4c1   : > { %v1782_v41 = vpop.xlane.xlu1 %1781  ;;  %v1977_v63 = vpop.xlane.xlu0 %1976  ;;  %v2162_v55 = vsel %vm682_vm0, %v7368_v53, -inf  ;;  %v7377_v25 = vsel %vm2085_vm12, %v8433_v44, -inf  ;;  %vm8441_vm9 = vcmp.eq.s32.totalorder %v8369_v4, %v8440_v33  ;;  %v8443_v61 = vld [vmem:[#allocation75_spill] sm:$0xff]  ;;  %v2010_v42 = vshll.u32 %v2009_v8, 16  ;;  %v8446_v19 = vld [vmem:[#allocation76_spill] sm:$0xff]  ;;  %v8449_v44 = vld [vmem:[#allocation77_spill] sm:$0xff] }
 0x4c2   : > { %vm2056_vm2 = vcmp.eq.s32.totalorder %v8369_v4, %v1996_v28  ;;  %vm2039_vm13 = vcmp.eq.s32.totalorder %v8369_v4, %v1741_v18  ;;  %v1783_v39 = vcvt.f32.s32 %v1782_v41  ;;  %v1978_v26 = vcvt.f32.s32 %v1977_v63  ;;  %2163 = vmax.xlane.f32.xlu1 %v2162_v55  ;;  %v8445_v18 = vld [vmem:[#allocation41_spill] sm:$0xff]  ;;  %v8448_v63 = vld [vmem:[#allocation44_spill] sm:$0xff] }
 0x4c3   : > { %v2201_v16 = vsel %vm682_vm0, %v7377_v25, -inf  ;;  %vm2088_vm14 = vmor %vm8435_vm7, %vm2056_vm2  ;;  %vm8444_vm10 = vcmp.eq.s32.totalorder %v8369_v4, %v8443_v61  ;;  %vm8447_vm12 = vcmp.eq.s32.totalorder %v8369_v4, %v8446_v19 }
 0x4c4   : > { %v1786_v46 = vadd.s32 %v1785_v38, %v1783_v39  ;;  %v1981_v51 = vadd.s32 %v1980_v48, %v1978_v26  ;;  %2202 = vmax.xlane.f32.xlu0 %v2201_v16  ;;  %v7387_v10 = vsel %vm2088_vm14, %v8436_v31, -inf  ;;  %vm2071_vm15 = vmor %vm8438_vm3, %vm2039_vm13  ;;  %vm8450_vm13 = vcmp.eq.s32.totalorder %v8369_v4, %v8449_v44  ;;  %v8451_v26 = vld [vmem:[#allocation43_spill] sm:$0xff] }
 0x4c5   : > { %v2022_v0 = vpop.xlane.xlu1 %2021  ;;  %v1767_v23 = vpop.xlane.xlu0 %1766  ;;  %v2210_v12 = vsel %vm682_vm0, %v7387_v10, -inf  ;;  %v7396_v62 = vsel %vm2071_vm15, %v8439_v29, -inf }
 0x4c6   : > { %vm2042_vm8 = vcmp.eq.s32.totalorder %v8369_v4, %v1786_v46  ;;  %vm2055_vm5 = vcmp.eq.s32.totalorder %v8369_v4, %v1981_v51  ;;  %v2023_v17 = vcvt.f32.s32 %v2022_v0  ;;  %v1768_v30 = vcvt.f32.s32 %v1767_v23  ;;  %2211 = vmax.xlane.f32.xlu1 %v2210_v12  ;;  %v8454_v46 = vld [vmem:[#allocation45_spill] sm:$0xff] }
 0x4c7   : > { %v2159_v14 = vsel %vm682_vm0, %v7396_v62, -inf  ;;  %vm2074_vm1 = vmor %vm8441_vm9, %vm2042_vm8 }
 0x4c8   : > { %v2026_v54 = vadd.s32 %v2025_v45, %v2023_v17  ;;  %v1771_v47 = vadd.s32 %v1770_v5, %v1768_v30  ;;  %2160 = vmax.xlane.f32.xlu0 %v2159_v14  ;;  %v7406_v38 = vsel %vm2074_vm1, %v8442_v3, -inf  ;;  %vm2087_vm4 = vmor %vm8444_vm10, %vm2055_vm5  ;;  %v8452_v45 = vld [vmem:[#allocation78_spill] sm:$0xff] }
 0x4c9   : > { %v2007_v6 = vpop.xlane.xlu0 %2006  ;;  %v2168_v28 = vsel %vm682_vm0, %v7406_v38, -inf  ;;  %v7414_v52 = vsel %vm2087_vm4, %v8445_v18, -inf  ;;  %vm8453_vm3 = vcmp.eq.s32.totalorder %v8369_v4, %v8452_v45 }
 0x4ca   : > { %vm2058_vm11 = vcmp.eq.s32.totalorder %v8369_v4, %v2026_v54  ;;  %vm2041_vm6 = vcmp.eq.s32.totalorder %v8369_v4, %v1771_v47  ;;  %v2008_v50 = vcvt.f32.s32 %v2007_v6  ;;  %2169 = vmax.xlane.f32.xlu1 %v2168_v28  ;;  %v2207_v48 = vsel %vm682_vm0, %v7414_v52, -inf }
 0x4cb   : > { %vm2090_vm2 = vmor %vm8447_vm12, %vm2058_vm11 }
 0x4cc   : > { %v2011_v41 = vadd.s32 %v2010_v42, %v2008_v50  ;;  %2208 = vmax.xlane.f32.xlu0 %v2207_v48  ;;  %v7424_v55 = vsel %vm2090_vm2, %v8448_v63, -inf  ;;  %vm2073_vm7 = vmor %vm8450_vm13, %vm2041_vm6 }
 0x4cd   : > { %v2216_v39 = vsel %vm682_vm0, %v7424_v55, -inf  ;;  %v7432_v16 = vsel %vm2073_vm7, %v8451_v26, -inf }
 0x4ce   : > { %vm2057_vm14 = vcmp.eq.s32.totalorder %v8369_v4, %v2011_v41  ;;  %2217 = vmax.xlane.f32.xlu1 %v2216_v39  ;;  %v2165_v13 = vsel %vm682_vm0, %v7432_v16, -inf }
 0x4cf   : > { %vm2089_vm15 = vmor %vm8453_vm3, %vm2057_vm14 }
 0x4d0   : > { %2166 = vmax.xlane.f32.xlu0 %v2165_v13  ;;  %v7441_v51 = vsel %vm2089_vm15, %v8454_v46, -inf }
 0x4d1   : > { %v2213_v31 = vsel %vm682_vm0, %v7441_v51, -inf }
 0x4d4   : > { %2214 = vmax.xlane.f32.xlu0 %v2213_v31 }
 0x51b   : > { %v2128_v56 = vpop.xlane.xlu1 %2127 }
 0x51c   : > { %v2220_v5 = vsub.f32 %v7136_v36, %v2128_v56 }
 0x51e   : > { %v2253_v8 = vmul.f32 1.442695, %v2220_v5 }
 0x51f   : > { %v2176_v0 = vpop.xlane.xlu1 %2175 }
 0x520   : > { %5014 = vpow2.f32 %v2253_v8  ;;  %v2236_v23 = vsub.f32 %v7148_v35, %v2176_v0 }
 0x521   : > { %v2125_v12 = vpop.xlane.xlu0 %2124 }
 0x522   : > { %v2285_v29 = vmul.f32 1.442695, %v2236_v23  ;;  %v2219_v4 = vsub.f32 %v7157_v1, %v2125_v12 }
 0x523   : > { %v2134_v17 = vpop.xlane.xlu1 %2133 }
 0x524   : > { %5016 = vpow2.f32 %v2285_v29  ;;  %v2251_v30 = vmul.f32 1.442695, %v2219_v4  ;;  %v2222_v14 = vsub.f32 %v7168_v21, %v2134_v17 }
 0x525   : > { %v2173_v33 = vpop.xlane.xlu0 %2172 }
 0x526   : > { %5018 = vpow2.f32 %v2251_v30  ;;  %v2257_v54 = vmul.f32 1.442695, %v2222_v14  ;;  %v2235_v47 = vsub.f32 %v7177_v32, %v2173_v33 }
 0x527   : > { %v2182_v36 = vpop.xlane.xlu1 %2181 }
 0x528   : > { %5020 = vpow2.f32 %v2257_v54  ;;  %v2283_v3 = vmul.f32 1.442695, %v2235_v47  ;;  %v2238_v61 = vsub.f32 %v7188_v59, %v2182_v36 }
 0x529   : > { %v2131_v35 = vpop.xlane.xlu0 %2130 }
 0x52a   : > { %5022 = vpow2.f32 %v2283_v3  ;;  %v2289_v42 = vmul.f32 1.442695, %v2238_v61  ;;  %v2221_v1 = vsub.f32 %v7197_v22, %v2131_v35 }
 0x52b   : > { %v2140_v6 = vpop.xlane.xlu1 %2139 }
 0x52c   : > { %5024 = vpow2.f32 %v2289_v42  ;;  %v2255_v28 = vmul.f32 1.442695, %v2221_v1  ;;  %v2224_v21 = vsub.f32 %v7208_v11, %v2140_v6 }
 0x52d   : > { %v7453_v18 = vpop.eup %5014  ;;  %v2179_v50 = vpop.xlane.xlu0 %2178 }
 0x52e   : > { %5026 = vpow2.f32 %v2255_v28  ;;  %v2261_v32 = vmul.f32 1.442695, %v2224_v21  ;;  %v2237_v48 = vsub.f32 %v7217_v2, %v2179_v50  ;;  %v2318_v59 = vsel %vm682_vm0, %v7453_v18, 0.0 }
 0x52f   : > { %2319 = vadd.xlane.f32.xlu1 %v2318_v59  ;;  %v2188_v19 = vpop.xlane.xlu1 %2187 }
 0x530   : > { %5028 = vpow2.f32 %v2261_v32  ;;  %v2287_v41 = vmul.f32 1.442695, %v2237_v48  ;;  %v2240_v22 = vsub.f32 %v7228_v34, %v2188_v19 }
 0x531   : > { %v7459_v63 = vpop.eup %5016  ;;  %v2137_v44 = vpop.xlane.xlu0 %2136 }
 0x532   : > { %5030 = vpow2.f32 %v2287_v41  ;;  %v2293_v11 = vmul.f32 1.442695, %v2240_v22  ;;  %v2223_v39 = vsub.f32 %v7237_v57, %v2137_v44  ;;  %v2366_v26 = vsel %vm682_vm0, %v7459_v63, 0.0 }
 0x533   : > { %v7464_v2 = vpop.eup %5018  ;;  %2367 = vadd.xlane.f32.xlu1 %v2366_v26  ;;  %v2146_v13 = vpop.xlane.xlu1 %2145 }
 0x534   : > { %5032 = vpow2.f32 %v2293_v11  ;;  %v2259_v45 = vmul.f32 1.442695, %v2223_v39  ;;  %v2226_v46 = vsub.f32 %v7248_v7, %v2146_v13  ;;  %v2315_v34 = vsel %vm682_vm0, %v7464_v2, 0.0 }
 0x535   : > { %v7469_v31 = vpop.eup %5020  ;;  %2316 = vadd.xlane.f32.xlu0 %v2315_v34  ;;  %v2185_v56 = vpop.xlane.xlu0 %2184 }
 0x536   : > { %5034 = vpow2.f32 %v2259_v45  ;;  %v2265_v57 = vmul.f32 1.442695, %v2226_v46  ;;  %v2239_v5 = vsub.f32 %v7257_v24, %v2185_v56  ;;  %v2324_v8 = vsel %vm682_vm0, %v7469_v31, 0.0 }
 0x537   : > { %v7474_v0 = vpop.eup %5022  ;;  %2325 = vadd.xlane.f32.xlu1 %v2324_v8  ;;  %v2194_v23 = vpop.xlane.xlu1 %2193 }
 0x538   : > { %5036 = vpow2.f32 %v2265_v57  ;;  %v2291_v7 = vmul.f32 1.442695, %v2239_v5  ;;  %v2242_v12 = vsub.f32 %v7268_v27, %v2194_v23  ;;  %v2363_v29 = vsel %vm682_vm0, %v7474_v0, 0.0 }
 0x539   : > { %v7479_v4 = vpop.eup %5024  ;;  %2364 = vadd.xlane.f32.xlu0 %v2363_v29  ;;  %v2143_v17 = vpop.xlane.xlu0 %2142 }
 0x53a   : > { %5038 = vpow2.f32 %v2291_v7  ;;  %v2297_v24 = vmul.f32 1.442695, %v2242_v12  ;;  %v2225_v30 = vsub.f32 %v7277_v20, %v2143_v17  ;;  %v2372_v14 = vsel %vm682_vm0, %v7479_v4, 0.0 }
 0x53b   : > { %v7484_v33 = vpop.eup %5026  ;;  %2373 = vadd.xlane.f32.xlu1 %v2372_v14  ;;  %v2152_v54 = vpop.xlane.xlu1 %2151 }
 0x53c   : > { %5040 = vpow2.f32 %v2297_v24  ;;  %v2263_v27 = vmul.f32 1.442695, %v2225_v30  ;;  %v2228_v47 = vsub.f32 %v7288_v9, %v2152_v54  ;;  %v2321_v36 = vsel %vm682_vm0, %v7484_v33, 0.0 }
 0x53d   : > { %v7489_v3 = vpop.eup %5028  ;;  %2322 = vadd.xlane.f32.xlu0 %v2321_v36  ;;  %v2191_v61 = vpop.xlane.xlu0 %2190 }
 0x53e   : > { %5042 = vpow2.f32 %v2263_v27  ;;  %v2269_v20 = vmul.f32 1.442695, %v2228_v47  ;;  %v2241_v35 = vsub.f32 %v7297_v37, %v2191_v61  ;;  %v2330_v42 = vsel %vm682_vm0, %v7489_v3, 0.0 }
 0x53f   : > { %v7494_v1 = vpop.eup %5030  ;;  %2331 = vadd.xlane.f32.xlu1 %v2330_v42  ;;  %v2200_v6 = vpop.xlane.xlu1 %2199 }
 0x540   : > { %5044 = vpow2.f32 %v2269_v20  ;;  %v2295_v9 = vmul.f32 1.442695, %v2241_v35  ;;  %v2244_v28 = vsub.f32 %v7308_v49, %v2200_v6  ;;  %v2369_v21 = vsel %vm682_vm0, %v7494_v1, 0.0 }
 0x541   : > { %v7499_v50 = vpop.eup %5032  ;;  %2370 = vadd.xlane.f32.xlu0 %v2369_v21  ;;  %v2149_v32 = vpop.xlane.xlu0 %2148 }
 0x542   : > { %5046 = vpow2.f32 %v2295_v9  ;;  %v2301_v37 = vmul.f32 1.442695, %v2244_v28  ;;  %v2227_v48 = vsub.f32 %v7317_v43, %v2149_v32  ;;  %v2378_v59 = vsel %vm682_vm0, %v7499_v50, 0.0 }
 0x543   : > { %v7504_v19 = vpop.eup %5034  ;;  %2379 = vadd.xlane.f32.xlu1 %v2378_v59  ;;  %v2158_v41 = vpop.xlane.xlu1 %2157 }
 0x544   : > { %5048 = vpow2.f32 %v2301_v37  ;;  %v2267_v49 = vmul.f32 1.442695, %v2227_v48  ;;  %v2230_v22 = vsub.f32 %v7328_v60, %v2158_v41  ;;  %v2327_v44 = vsel %vm682_vm0, %v7504_v19, 0.0 }
 0x545   : > { %v7509_v11 = vpop.eup %5036  ;;  %2328 = vadd.xlane.f32.xlu0 %v2327_v44  ;;  %v2197_v39 = vpop.xlane.xlu0 %2196 }
 0x546   : > { %5050 = vpow2.f32 %v2267_v49  ;;  %v2273_v43 = vmul.f32 1.442695, %v2230_v22  ;;  %v2243_v26 = vsub.f32 %v7337_v58, %v2197_v39  ;;  %v2336_v13 = vsel %vm682_vm0, %v7509_v11, 0.0 }
 0x547   : > { %v7514_v45 = vpop.eup %5038  ;;  %2337 = vadd.xlane.f32.xlu1 %v2336_v13  ;;  %v2206_v46 = vpop.xlane.xlu1 %2205 }
 0x548   : > { %5052 = vpow2.f32 %v2273_v43  ;;  %v2299_v60 = vmul.f32 1.442695, %v2243_v26  ;;  %v2246_v34 = vsub.f32 %v7348_v40, %v2206_v46  ;;  %v2375_v56 = vsel %vm682_vm0, %v7514_v45, 0.0 }
 0x549   : > { %v7519_v57 = vpop.eup %5040  ;;  %2376 = vadd.xlane.f32.xlu0 %v2375_v56  ;;  %v2155_v5 = vpop.xlane.xlu0 %2154 }
 0x54a   : > { %5054 = vpow2.f32 %v2299_v60  ;;  %v2305_v58 = vmul.f32 1.442695, %v2246_v34  ;;  %v2229_v8 = vsub.f32 %v7357_v15, %v2155_v5  ;;  %v2384_v23 = vsel %vm682_vm0, %v7519_v57, 0.0 }
 0x54b   : > { %v7524_v7 = vpop.eup %5042  ;;  %2385 = vadd.xlane.f32.xlu1 %v2384_v23  ;;  %v2164_v12 = vpop.xlane.xlu1 %2163 }
 0x54c   : > { %5056 = vpow2.f32 %v2305_v58  ;;  %v2271_v40 = vmul.f32 1.442695, %v2229_v8  ;;  %v2232_v29 = vsub.f32 %v7368_v53, %v2164_v12  ;;  %v2333_v17 = vsel %vm682_vm0, %v7524_v7, 0.0 }
 0x54d   : > { %v7529_v24 = vpop.eup %5044  ;;  %2334 = vadd.xlane.f32.xlu0 %v2333_v17  ;;  %v2203_v30 = vpop.xlane.xlu0 %2202 }
 0x54e   : > { %5058 = vpow2.f32 %v2271_v40  ;;  %v2277_v15 = vmul.f32 1.442695, %v2232_v29  ;;  %v2245_v14 = vsub.f32 %v7377_v25, %v2203_v30  ;;  %v2342_v54 = vsel %vm682_vm0, %v7529_v24, 0.0 }
 0x54f   : > { %v7534_v27 = vpop.eup %5046  ;;  %2343 = vadd.xlane.f32.xlu1 %v2342_v54  ;;  %v2212_v47 = vpop.xlane.xlu1 %2211 }
 0x550   : > { %5060 = vpow2.f32 %v2277_v15  ;;  %v2303_v53 = vmul.f32 1.442695, %v2245_v14  ;;  %v2248_v36 = vsub.f32 %v7387_v10, %v2212_v47  ;;  %v2381_v61 = vsel %vm682_vm0, %v7534_v27, 0.0 }
 0x551   : > { %v7539_v20 = vpop.eup %5048  ;;  %2382 = vadd.xlane.f32.xlu0 %v2381_v61  ;;  %v2161_v35 = vpop.xlane.xlu0 %2160 }
 0x552   : > { %5062 = vpow2.f32 %v2303_v53  ;;  %v2309_v25 = vmul.f32 1.442695, %v2248_v36  ;;  %v2231_v42 = vsub.f32 %v7396_v62, %v2161_v35  ;;  %v2390_v6 = vsel %vm682_vm0, %v7539_v20, 0.0 }
 0x553   : > { %v7544_v9 = vpop.eup %5050  ;;  %2391 = vadd.xlane.f32.xlu1 %v2390_v6  ;;  %v2170_v28 = vpop.xlane.xlu1 %2169 }
 0x554   : > { %5064 = vpow2.f32 %v2309_v25  ;;  %v2275_v10 = vmul.f32 1.442695, %v2231_v42  ;;  %v2234_v21 = vsub.f32 %v7406_v38, %v2170_v28  ;;  %v2339_v32 = vsel %vm682_vm0, %v7544_v9, 0.0 }
 0x555   : > { %v7549_v37 = vpop.eup %5052  ;;  %2340 = vadd.xlane.f32.xlu0 %v2339_v32  ;;  %v2209_v48 = vpop.xlane.xlu0 %2208  ;;  %v5397_v42 = vmov 0.0  }
 0x556   : > { %5066 = vpow2.f32 %v2275_v10  ;;  %v2281_v62 = vmul.f32 1.442695, %v2234_v21  ;;  %v2247_v59 = vsub.f32 %v7414_v52, %v2209_v48  ;;  %v2348_v41 = vsel %vm682_vm0, %v7549_v37, 0.0  ;;  %2507 = vst [vmem:[#allocation3 + $0xb0] sm:$0xff] %v5397_v42  ;;  %2508 = vst [vmem:[#allocation3] sm:$0xff] %v5397_v42 }
 0x557   : > { %v7554_v49 = vpop.eup %5054  ;;  %2349 = vadd.xlane.f32.xlu1 %v2348_v41  ;;  %v2218_v22 = vpop.xlane.xlu1 %2217  ;;  %2509 = vst [vmem:[#allocation3 + $0xd8] sm:$0xff] %v5397_v42  ;;  %2510 = vst [vmem:[#allocation3 + $0x18] sm:$0xff] %v5397_v42 }
 0x558   : > { %5068 = vpow2.f32 %v2281_v62  ;;  %v2307_v38 = vmul.f32 1.442695, %v2247_v59  ;;  %v2250_v44 = vsub.f32 %v7424_v55, %v2218_v22  ;;  %v2387_v39 = vsel %vm682_vm0, %v7554_v49, 0.0  ;;  %2511 = vst [vmem:[#allocation3 + $0x50] sm:$0xff] %v5397_v42  ;;  %2512 = vst [vmem:[#allocation3 + $0x68] sm:$0xff] %v5397_v42 }
 0x559   : > { %v7559_v43 = vpop.eup %5056  ;;  %2388 = vadd.xlane.f32.xlu0 %v2387_v39  ;;  %v2167_v26 = vpop.xlane.xlu0 %2166  ;;  %2513 = vst [vmem:[#allocation3 + $0x30] sm:$0xff] %v5397_v42  ;;  %2514 = vst [vmem:[#allocation3 + $0x48] sm:$0xff] %v5397_v42 }
 0x55a   : > { %5070 = vpow2.f32 %v2307_v38  ;;  %v2313_v52 = vmul.f32 1.442695, %v2250_v44  ;;  %v2233_v13 = vsub.f32 %v7432_v16, %v2167_v26  ;;  %v2396_v46 = vsel %vm682_vm0, %v7559_v43, 0.0  ;;  %2515 = vst [vmem:[#allocation3 + $0x80] sm:$0xff] %v5397_v42  ;;  %2516 = vst [vmem:[#allocation3 + $0x88] sm:$0xff] %v5397_v42 }
 0x55b   : > { %v7564_v60 = vpop.eup %5058  ;;  %2397 = vadd.xlane.f32.xlu1 %v2396_v46  ;;  %2517 = vst [vmem:[#allocation3 + $0xe8] sm:$0xff] %v5397_v42  ;;  %2518 = vst [vmem:[#allocation3 + $0xb8] sm:$0xff] %v5397_v42 }
 0x55c   : > { %5072 = vpow2.f32 %v2313_v52  ;;  %v2279_v34 = vmul.f32 1.442695, %v2233_v13  ;;  %v2345_v55 = vsel %vm682_vm0, %v7564_v60, 0.0  ;;  %2519 = vst [vmem:[#allocation3 + $0x60] sm:$0xff] %v5397_v42  ;;  %2520 = vst [vmem:[#allocation3 + $0xf0] sm:$0xff] %v5397_v42 }
 0x55d   : > { %v7568_v56 = vpop.eup %5060  ;;  %2346 = vadd.xlane.f32.xlu0 %v2345_v55  ;;  %v2215_v5 = vpop.xlane.xlu0 %2214  ;;  %2521 = vst [vmem:[#allocation3 + $0x8] sm:$0xff] %v5397_v42  ;;  %2522 = vst [vmem:[#allocation3 + $0x78] sm:$0xff] %v5397_v42 }
 0x55e   : > { %5074 = vpow2.f32 %v2279_v34  ;;  %v2249_v58 = vsub.f32 %v7441_v51, %v2215_v5  ;;  %v2354_v16 = vsel %vm682_vm0, %v7568_v56, 0.0  ;;  %2523 = vst [vmem:[#allocation3 + $0x38] sm:$0xff] %v5397_v42  ;;  %2524 = vst [vmem:[#allocation3 + $0x58] sm:$0xff] %v5397_v42 }
 0x55f   : > { %v7573_v8 = vpop.eup %5062  ;;  %2355 = vadd.xlane.f32.xlu1 %v2354_v16  ;;  %2525 = vst [vmem:[#allocation3 + $0x40] sm:$0xff] %v5397_v42  ;;  %2526 = vst [vmem:[#allocation3 + $0xc8] sm:$0xff] %v5397_v42 }
 0x560   : > { %v2311_v23 = vmul.f32 1.442695, %v2249_v58  ;;  %v2393_v12 = vsel %vm682_vm0, %v7573_v8, 0.0  ;;  %2527 = vst [vmem:[#allocation3 + $0xe0] sm:$0xff] %v5397_v42  ;;  %2528 = vst [vmem:[#allocation3 + $0x90] sm:$0xff] %v5397_v42 }
 0x561   : > { %v7577_v40 = vpop.eup %5064  ;;  %2394 = vadd.xlane.f32.xlu0 %v2393_v12  ;;  %2529 = vst [vmem:[#allocation3 + $0x70] sm:$0xff] %v5397_v42  ;;  %2530 = vst [vmem:[#allocation3 + $0xc0] sm:$0xff] %v5397_v42 }
 0x562   : > { %5076 = vpow2.f32 %v2311_v23  ;;  %v2402_v29 = vsel %vm682_vm0, %v7577_v40, 0.0  ;;  %2531 = vst [vmem:[#allocation3 + $0xa8] sm:$0xff] %v5397_v42  ;;  %2532 = vst [vmem:[#allocation3 + $0xd0] sm:$0xff] %v5397_v42 }
 0x563   : > { %v7581_v17 = vpop.eup %5066  ;;  %2403 = vadd.xlane.f32.xlu1 %v2402_v29  ;;  %2533 = vst [vmem:[#allocation3 + $0x10] sm:$0xff] %v5397_v42  ;;  %2534 = vst [vmem:[#allocation3 + $0x28] sm:$0xff] %v5397_v42 }
 0x564   : > { %v2351_v51 = vsel %vm682_vm0, %v7581_v17, 0.0  ;;  %2535 = vst [vmem:[#allocation3 + $0xa0] sm:$0xff] %v5397_v42  ;;  %2536 = vst [vmem:[#allocation3 + $0xf8] sm:$0xff] %v5397_v42 }
 0x565   : > { %v7585_v30 = vpop.eup %5068  ;;  %2352 = vadd.xlane.f32.xlu0 %v2351_v51  ;;  %2537 = vst [vmem:[#allocation3 + $0x20] sm:$0xff] %v5397_v42  ;;  %2538 = vst [vmem:[#allocation3 + $0x98] sm:$0xff] %v5397_v42 }
 0x566   : > { %v2360_v15 = vsel %vm682_vm0, %v7585_v30, 0.0 }
 0x567   : > { %v7589_v14 = vpop.eup %5070  ;;  %2361 = vadd.xlane.f32.xlu1 %v2360_v15 }
 0x568   : > { %v2399_v54 = vsel %vm682_vm0, %v7589_v14, 0.0 }
 0x569   : > { %v7593_v47 = vpop.eup %5072  ;;  %2400 = vadd.xlane.f32.xlu0 %v2399_v54 }
 0x56a   : > { %v2408_v53 = vsel %vm682_vm0, %v7593_v47, 0.0 }
 0x56b   : > { %v7597_v36 = vpop.eup %5074  ;;  %2409 = vadd.xlane.f32.xlu1 %v2408_v53 }
 0x56c   : > { %v2357_v61 = vsel %vm682_vm0, %v7597_v36, 0.0 }
 0x56d   : > { %2358 = vadd.xlane.f32.xlu0 %v2357_v61 }
 0x56f   : > { %v7601_v35 = vpop.eup %5076 }
 0x570   : > { %v2405_v25 = vsel %vm682_vm0, %v7601_v35, 0.0 }
 0x571   : > { %2406 = vadd.xlane.f32.xlu0 %v2405_v25 }
 0x5b8   : > { %v2320_v6 = vpop.xlane.xlu1 %2319 }
 0x5b9   : > { %5078 = vrcp.f32 %v2320_v6 }
 0x5bc   : > { %v2368_v28 = vpop.xlane.xlu1 %2367 }
 0x5bd   : > { %5080 = vrcp.f32 %v2368_v28 }
 0x5be   : > { %v2317_v10 = vpop.xlane.xlu0 %2316 }
 0x5bf   : > { %5082 = vrcp.f32 %v2317_v10 }
 0x5c0   : > { %v2326_v21 = vpop.xlane.xlu1 %2325 }
 0x5c1   : > { %5084 = vrcp.f32 %v2326_v21 }
 0x5c2   : > { %v2365_v32 = vpop.xlane.xlu0 %2364 }
 0x5c3   : > { %5086 = vrcp.f32 %v2365_v32 }
 0x5c4   : > { %v2374_v48 = vpop.xlane.xlu1 %2373 }
 0x5c5   : > { %5088 = vrcp.f32 %v2374_v48 }
 0x5c6   : > { %v5079_v62 = vpop.eup %5078  ;;  %v2323_v59 = vpop.xlane.xlu0 %2322 }
 0x5c7   : > { %v2414_v41 = vmul.f32 %v5079_v62, %v7453_v18  ;;  %5090 = vrcp.f32 %v2323_v59 }
 0x5c8   : > { %v2332_v22 = vpop.xlane.xlu1 %2331 }
 0x5c9   : > { %2476 = vst.msk [vmem:[#allocation2 + $0x8] sm:$0xff] %vm682_vm0, %v2414_v41  ;;  %5092 = vrcp.f32 %v2332_v22 }
 0x5ca   : > { %v5081_v38 = vpop.eup %5080  ;;  %v2371_v44 = vpop.xlane.xlu0 %2370 }
 0x5cb   : > { %v2446_v39 = vmul.f32 %v5081_v38, %v7459_v63  ;;  %5094 = vrcp.f32 %v2371_v44 }
 0x5cc   : > { %v5083_v26 = vpop.eup %5082  ;;  %v2380_v52 = vpop.xlane.xlu1 %2379 }
 0x5cd   : > { %2492 = vst.msk [vmem:[#allocation2 + $0x88] sm:$0xff] %vm682_vm0, %v2446_v39  ;;  %v2412_v13 = vmul.f32 %v5083_v26, %v7464_v2  ;;  %5096 = vrcp.f32 %v2380_v52 }
 0x5ce   : > { %v5085_v46 = vpop.eup %5084  ;;  %v2329_v34 = vpop.xlane.xlu0 %2328 }
 0x5cf   : > { %2475 = vst.msk [vmem:[#allocation2] sm:$0xff] %vm682_vm0, %v2412_v13  ;;  %v2418_v18 = vmul.f32 %v5085_v46, %v7469_v31  ;;  %5098 = vrcp.f32 %v2329_v34 }
 0x5d0   : > { %v5087_v55 = vpop.eup %5086  ;;  %v2338_v5 = vpop.xlane.xlu1 %2337 }
 0x5d1   : > { %2478 = vst.msk [vmem:[#allocation2 + $0x18] sm:$0xff] %vm682_vm0, %v2418_v18  ;;  %v2444_v63 = vmul.f32 %v5087_v55, %v7474_v0  ;;  %5100 = vrcp.f32 %v2338_v5 }
 0x5d2   : > { %v5089_v58 = vpop.eup %5088  ;;  %v2377_v16 = vpop.xlane.xlu0 %2376 }
 0x5d3   : > { %2491 = vst.msk [vmem:[#allocation2 + $0x80] sm:$0xff] %vm682_vm0, %v2444_v63  ;;  %v2450_v2 = vmul.f32 %v5089_v58, %v7479_v4  ;;  %5102 = vrcp.f32 %v2377_v16 }
 0x5d4   : > { %v5091_v23 = vpop.eup %5090  ;;  %v2386_v12 = vpop.xlane.xlu1 %2385 }
 0x5d5   : > { %2494 = vst.msk [vmem:[#allocation2 + $0x98] sm:$0xff] %vm682_vm0, %v2450_v2  ;;  %v2416_v31 = vmul.f32 %v5091_v23, %v7484_v33  ;;  %5104 = vrcp.f32 %v2386_v12 }
 0x5d6   : > { %v5093_v29 = vpop.eup %5092  ;;  %v2335_v51 = vpop.xlane.xlu0 %2334 }
 0x5d7   : > { %2477 = vst.msk [vmem:[#allocation2 + $0x10] sm:$0xff] %vm682_vm0, %v2416_v31  ;;  %v2422_v0 = vmul.f32 %v5093_v29, %v7489_v3  ;;  %5106 = vrcp.f32 %v2335_v51 }
 0x5d8   : > { %v5095_v15 = vpop.eup %5094  ;;  %v2344_v54 = vpop.xlane.xlu1 %2343 }
 0x5d9   : > { %2480 = vst.msk [vmem:[#allocation2 + $0x28] sm:$0xff] %vm682_vm0, %v2422_v0  ;;  %v2448_v4 = vmul.f32 %v5095_v15, %v7494_v1  ;;  %5108 = vrcp.f32 %v2344_v54 }
 0x5da   : > { %v5097_v53 = vpop.eup %5096  ;;  %v2383_v61 = vpop.xlane.xlu0 %2382 }
 0x5db   : > { %2493 = vst.msk [vmem:[#allocation2 + $0x90] sm:$0xff] %vm682_vm0, %v2448_v4  ;;  %v2454_v33 = vmul.f32 %v5097_v53, %v7499_v50  ;;  %5110 = vrcp.f32 %v2383_v61 }
 0x5dc   : > { %v5099_v25 = vpop.eup %5098  ;;  %v2392_v42 = vpop.xlane.xlu1 %2391 }
 0x5dd   : > { %2496 = vst.msk [vmem:[#allocation2 + $0xa8] sm:$0xff] %vm682_vm0, %v2454_v33  ;;  %v2420_v3 = vmul.f32 %v5099_v25, %v7504_v19  ;;  %5112 = vrcp.f32 %v2392_v42 }
 0x5de   : > { %v5101_v6 = vpop.eup %5100  ;;  %v2341_v28 = vpop.xlane.xlu0 %2340 }
 0x5df   : > { %2479 = vst.msk [vmem:[#allocation2 + $0x20] sm:$0xff] %vm682_vm0, %v2420_v3  ;;  %v2426_v1 = vmul.f32 %v5101_v6, %v7509_v11  ;;  %5114 = vrcp.f32 %v2341_v28 }
 0x5e0   : > { %v5103_v10 = vpop.eup %5102  ;;  %v2350_v21 = vpop.xlane.xlu1 %2349 }
 0x5e1   : > { %2482 = vst.msk [vmem:[#allocation2 + $0x38] sm:$0xff] %vm682_vm0, %v2426_v1  ;;  %v2452_v50 = vmul.f32 %v5103_v10, %v7514_v45  ;;  %5116 = vrcp.f32 %v2350_v21 }
 0x5e2   : > { %v5105_v32 = vpop.eup %5104  ;;  %v2389_v48 = vpop.xlane.xlu0 %2388 }
 0x5e3   : > { %2495 = vst.msk [vmem:[#allocation2 + $0xa0] sm:$0xff] %vm682_vm0, %v2452_v50  ;;  %v2458_v19 = vmul.f32 %v5105_v32, %v7519_v57  ;;  %5118 = vrcp.f32 %v2389_v48 }
 0x5e4   : > { %v5107_v62 = vpop.eup %5106  ;;  %v2398_v59 = vpop.xlane.xlu1 %2397 }
 0x5e5   : > { %2498 = vst.msk [vmem:[#allocation2 + $0xb8] sm:$0xff] %vm682_vm0, %v2458_v19  ;;  %v2424_v11 = vmul.f32 %v5107_v62, %v7524_v7  ;;  %5120 = vrcp.f32 %v2398_v59 }
 0x5e6   : > { %v5109_v41 = vpop.eup %5108  ;;  %v2347_v22 = vpop.xlane.xlu0 %2346 }
 0x5e7   : > { %2481 = vst.msk [vmem:[#allocation2 + $0x30] sm:$0xff] %vm682_vm0, %v2424_v11  ;;  %v2430_v45 = vmul.f32 %v5109_v41, %v7529_v24  ;;  %5122 = vrcp.f32 %v2347_v22 }
 0x5e8   : > { %v5111_v38 = vpop.eup %5110  ;;  %v2356_v44 = vpop.xlane.xlu1 %2355 }
 0x5e9   : > { %2484 = vst.msk [vmem:[#allocation2 + $0x48] sm:$0xff] %vm682_vm0, %v2430_v45  ;;  %v2456_v57 = vmul.f32 %v5111_v38, %v7534_v27  ;;  %5124 = vrcp.f32 %v2356_v44 }
 0x5ea   : > { %v5113_v39 = vpop.eup %5112  ;;  %v2395_v26 = vpop.xlane.xlu0 %2394 }
 0x5eb   : > { %2497 = vst.msk [vmem:[#allocation2 + $0xb0] sm:$0xff] %vm682_vm0, %v2456_v57  ;;  %v2462_v7 = vmul.f32 %v5113_v39, %v7539_v20  ;;  %5126 = vrcp.f32 %v2395_v26 }
 0x5ec   : > { %v5115_v52 = vpop.eup %5114  ;;  %v2404_v13 = vpop.xlane.xlu1 %2403 }
 0x5ed   : > { %2500 = vst.msk [vmem:[#allocation2 + $0xc8] sm:$0xff] %vm682_vm0, %v2462_v7  ;;  %v2428_v24 = vmul.f32 %v5115_v52, %v7544_v9  ;;  %5128 = vrcp.f32 %v2404_v13 }
 0x5ee   : > { %v5117_v46 = vpop.eup %5116  ;;  %v2353_v34 = vpop.xlane.xlu0 %2352 }
 0x5ef   : > { %2483 = vst.msk [vmem:[#allocation2 + $0x40] sm:$0xff] %vm682_vm0, %v2428_v24  ;;  %v2434_v27 = vmul.f32 %v5117_v46, %v7549_v37  ;;  %5130 = vrcp.f32 %v2353_v34 }
 0x5f0   : > { %v5119_v18 = vpop.eup %5118  ;;  %v2362_v55 = vpop.xlane.xlu1 %2361 }
 0x5f1   : > { %2486 = vst.msk [vmem:[#allocation2 + $0x58] sm:$0xff] %vm682_vm0, %v2434_v27  ;;  %v2460_v20 = vmul.f32 %v5119_v18, %v7554_v49  ;;  %5132 = vrcp.f32 %v2362_v55 }
 0x5f2   : > { %v5121_v5 = vpop.eup %5120  ;;  %v2401_v63 = vpop.xlane.xlu0 %2400 }
 0x5f3   : > { %2499 = vst.msk [vmem:[#allocation2 + $0xc0] sm:$0xff] %vm682_vm0, %v2460_v20  ;;  %v2466_v9 = vmul.f32 %v5121_v5, %v7559_v43  ;;  %5134 = vrcp.f32 %v2401_v63 }
 0x5f4   : > { %v5123_v58 = vpop.eup %5122  ;;  %v2410_v16 = vpop.xlane.xlu1 %2409 }
 0x5f5   : > { %2502 = vst.msk [vmem:[#allocation2 + $0xd8] sm:$0xff] %vm682_vm0, %v2466_v9  ;;  %v2432_v37 = vmul.f32 %v5123_v58, %v7564_v60  ;;  %5136 = vrcp.f32 %v2410_v16 }
 0x5f6   : > { %v5125_v2 = vpop.eup %5124  ;;  %v2359_v23 = vpop.xlane.xlu0 %2358 }
 0x5f7   : > { %2485 = vst.msk [vmem:[#allocation2 + $0x50] sm:$0xff] %vm682_vm0, %v2432_v37  ;;  %v2438_v49 = vmul.f32 %v5125_v2, %v7568_v56  ;;  %5138 = vrcp.f32 %v2359_v23 }
 0x5f8   : > { %v5127_v12 = vpop.eup %5126 }
 0x5f9   : > { %2488 = vst.msk [vmem:[#allocation2 + $0x68] sm:$0xff] %vm682_vm0, %v2438_v49  ;;  %v2464_v43 = vmul.f32 %v5127_v12, %v7573_v8 }
 0x5fa   : > { %v5129_v31 = vpop.eup %5128  ;;  %v2407_v29 = vpop.xlane.xlu0 %2406 }
 0x5fb   : > { %2501 = vst.msk [vmem:[#allocation2 + $0xd0] sm:$0xff] %vm682_vm0, %v2464_v43  ;;  %v2470_v51 = vmul.f32 %v5129_v31, %v7577_v40  ;;  %5140 = vrcp.f32 %v2407_v29 }
 0x5fc   : > { %v5131_v60 = vpop.eup %5130 }
 0x5fd   : > { %2504 = vst.msk [vmem:[#allocation2 + $0xe8] sm:$0xff] %vm682_vm0, %v2470_v51  ;;  %v2436_v0 = vmul.f32 %v5131_v60, %v7581_v17 }
 0x5fe   : > { %v5133_v15 = vpop.eup %5132 }
 0x5ff   : > { %2487 = vst.msk [vmem:[#allocation2 + $0x60] sm:$0xff] %vm682_vm0, %v2436_v0  ;;  %v2442_v56 = vmul.f32 %v5133_v15, %v7585_v30 }
 0x600   : > { %v5135_v54 = vpop.eup %5134 }
 0x601   : > { %2490 = vst.msk [vmem:[#allocation2 + $0x78] sm:$0xff] %vm682_vm0, %v2442_v56  ;;  %v2468_v8 = vmul.f32 %v5135_v54, %v7589_v14 }
 0x602   : > { %v5137_v4 = vpop.eup %5136 }
 0x603   : > { %2503 = vst.msk [vmem:[#allocation2 + $0xe0] sm:$0xff] %vm682_vm0, %v2468_v8  ;;  %v2474_v40 = vmul.f32 %v5137_v4, %v7593_v47 }
 0x604   : > { %v5139_v53 = vpop.eup %5138 }
 0x605   : > { %2506 = vst.msk [vmem:[#allocation2 + $0xf8] sm:$0xff] %vm682_vm0, %v2474_v40  ;;  %v2440_v17 = vmul.f32 %v5139_v53, %v7597_v36 }
 0x607   : > { %2489 = vst.msk [vmem:[#allocation2 + $0x70] sm:$0xff] %vm682_vm0, %v2440_v17 }
 0x608   : > { %v5141_v61 = vpop.eup %5140 }
 0x609   : > { %v2472_v30 = vmul.f32 %v5141_v61, %v7601_v35 }
 0x60b   : > { %2505 = vst.msk [vmem:[#allocation2 + $0xf0] sm:$0xff] %vm682_vm0, %v2472_v30 }
 0x60c PF: > { %v5142_v14 = vld [vmem:[%s5575_s15 + $0xe4] ss:$16 sps:$4 sm:$0xff]   ;;  %v5144_v47 = vld [vmem:[%s5575_s15 + $0xec] ss:$16 sps:$4 sm:$0xff]   ;;  %v5398_v36 = vmov 0   ;;  %vm4032_vm8 = vcmask 31744  }
 0x60d   : > { %2898 = vmatprep.mubr.bf16.mxu0 %v5398_v36  ;;  %3091 = vmatprep.mubr.bf16.mxu1 %v5398_v36  ;;  %v5146_v35 = vld [vmem:[%s5575_s15 + $0xe0] ss:$16 sps:$4 sm:$0xff]   ;;  %v5147_v33 = vld [vmem:[%s5575_s15 + $0xe8] ss:$16 sps:$4 sm:$0xff]   ;;  %v5148_v25 = vld [vmem:[%s5575_s15 + $0xc4] ss:$16 sps:$4 sm:$0xff]  }
 0x60e   : > { %2866 = vmatprep.subr.bf16.mxu0 %v5142_v14  ;;  %3059 = vmatprep.subr.bf16.mxu1 %v5144_v47  ;;  %v5150_v42 = vld [vmem:[%s5575_s15 + $0xcc] ss:$16 sps:$4 sm:$0xff]   ;;  %v5152_v3 = vld [vmem:[%s5575_s15 + $0xc0] ss:$16 sps:$4 sm:$0xff]   ;;  %v5153_v6 = vld [vmem:[%s5575_s15 + $0xc8] ss:$16 sps:$4 sm:$0xff]  }
 0x60f   : > { %2867 = vmatpush1.bf16.msra.mxu0 %v5146_v35  ;;  %3060 = vmatpush1.bf16.msra.mxu1 %v5147_v33  ;;  %v5154_v28 = vld [vmem:[%s5575_s15 + $0xa4] ss:$16 sps:$4 sm:$0xff]   ;;  %v5156_v1 = vld [vmem:[%s5575_s15 + $0xac] ss:$16 sps:$4 sm:$0xff]   ;;  %v5158_v10 = vld [vmem:[%s5575_s15 + $0xa0] ss:$16 sps:$4 sm:$0xff]  }
 0x610   : > { %2868 = vmatprep.subr.bf16.mxu0 %v5148_v25  ;;  %3061 = vmatprep.subr.bf16.mxu1 %v5150_v42  ;;  %v5159_v21 = vld [vmem:[%s5575_s15 + $0xa8] ss:$16 sps:$4 sm:$0xff]   ;;  %v5160_v50 = vld [vmem:[%s5575_s15 + $0x84] ss:$16 sps:$4 sm:$0xff]   ;;  %v5162_v32 = vld [vmem:[%s5575_s15 + $0x8c] ss:$16 sps:$4 sm:$0xff]  }
 0x611   : > { %v5164_v48 = vld [vmem:[%s5575_s15 + $0x80] ss:$16 sps:$4 sm:$0xff]   ;;  %v5165_v19 = vld [vmem:[%s5575_s15 + $0x88] ss:$16 sps:$4 sm:$0xff]   ;;  %v5166_v62 = vld [vmem:[%s5575_s15 + $0x64] ss:$16 sps:$4 sm:$0xff]  }
 0x612   : > { %v5168_v59 = vld [vmem:[%s5575_s15 + $0x6c] ss:$16 sps:$4 sm:$0xff]   ;;  %v5170_v11 = vld [vmem:[%s5575_s15 + $0x60] ss:$16 sps:$4 sm:$0xff]   ;;  %v5171_v41 = vld [vmem:[%s5575_s15 + $0x68] ss:$16 sps:$4 sm:$0xff]  }
 0x613   : > { %2869 = vmatpush1.bf16.msra.mxu0 %v5152_v3  ;;  %3062 = vmatpush1.bf16.msra.mxu1 %v5153_v6  ;;  %v5172_v22 = vld [vmem:[%s5575_s15 + $0x44] ss:$16 sps:$4 sm:$0xff]   ;;  %v5174_v45 = vld [vmem:[%s5575_s15 + $0x4c] ss:$16 sps:$4 sm:$0xff]   ;;  %v5176_v38 = vld [vmem:[%s5575_s15 + $0x40] ss:$16 sps:$4 sm:$0xff]  }
 0x614   : > { %2870 = vmatprep.subr.bf16.mxu0 %v5154_v28  ;;  %3063 = vmatprep.subr.bf16.mxu1 %v5156_v1  ;;  %v5177_v44 = vld [vmem:[%s5575_s15 + $0x48] ss:$16 sps:$4 sm:$0xff]   ;;  %v5178_v57 = vld [vmem:[%s5575_s15 + $0x24] ss:$16 sps:$4 sm:$0xff]   ;;  %v5180_v39 = vld [vmem:[%s5575_s15 + $0x2c] ss:$16 sps:$4 sm:$0xff]  }
 0x615   : > { %v5182_v26 = vld [vmem:[%s5575_s15 + $0x20] ss:$16 sps:$4 sm:$0xff]   ;;  %v5183_v7 = vld [vmem:[%s5575_s15 + $0x28] ss:$16 sps:$4 sm:$0xff]   ;;  %v5184_v52 = vld [vmem:[%s5575_s15 + $0x4] ss:$16 sps:$4 sm:$0xff]  }
 0x616   : > { %v5186_v13 = vld [vmem:[%s5575_s15 + $0xc] ss:$16 sps:$4 sm:$0xff]   ;;  %v5188_v24 = vld [vmem:[%s5575_s15] ss:$16 sps:$4 sm:$0xff]   ;;  %v5189_v46 = vld [vmem:[%s5575_s15 + $0x8] ss:$16 sps:$4 sm:$0xff]  }
 0x617   : > { %2871 = vmatpush1.bf16.msra.mxu0 %v5158_v10  ;;  %3064 = vmatpush1.bf16.msra.mxu1 %v5159_v21  ;;  %v2539_v34 = vld [vmem:[#allocation4] sm:$0xff]  ;;  %v2540_v27 = vld [vmem:[#allocation4 + $0x8] sm:$0xff]  ;;  %v5190_v18 = vld [vmem:[%s5595_s18 + $0x78] sm:$0xff]   ;;  %p4535_p5 = scmp.ne.s32.totalorder %s5378_s27, 3 }
 0x618   : > { %2872 = vmatprep.subr.bf16.mxu0 %v5160_v50  ;;  %3065 = vmatprep.subr.bf16.mxu1 %v5162_v32  ;;  %v5192_v55 = vld [vmem:[%s5595_s18 + $0xf8] sm:$0xff]   ;;  %v2571_v20 = vpack.c.bf16 %v2540_v27, %v2539_v34  ;;  %v5194_v9 = vld [vmem:[%s5595_s18 + $0x70] sm:$0xff]   ;;  %v5198_v12 = vld [vmem:[%s5595_s18 + $0x68] sm:$0xff]  }
 0x619   : > { %v5191_v5 = vld [vmem:[%s5595_s18 + $0x38] sm:$0xff]   ;;  %v2541_v58 = vld [vmem:[#allocation4 + $0x10] sm:$0xff]  ;;  %v5199_v43 = vld [vmem:[%s5595_s18 + $0x28] sm:$0xff]  }
 0x61a   : > { %v5193_v63 = vld [vmem:[%s5595_s18 + $0xb8] sm:$0xff]   ;;  %v5195_v37 = vld [vmem:[%s5595_s18 + $0x30] sm:$0xff]   ;;  %v5200_v31 = vld [vmem:[%s5595_s18 + $0xe8] sm:$0xff]  }
 0x61b   : > { %2873 = vmatpush1.bf16.msra.mxu0 %v5164_v48  ;;  %3066 = vmatpush1.bf16.msra.mxu1 %v5165_v19  ;;  %v2542_v16 = vld [vmem:[#allocation4 + $0x18] sm:$0xff]  ;;  %v5196_v2 = vld [vmem:[%s5595_s18 + $0xf0] sm:$0xff]   ;;  %v2543_v29 = vld [vmem:[#allocation4 + $0x20] sm:$0xff] }
 0x61c   : > { %2874 = vmatprep.subr.bf16.mxu0 %v5166_v62  ;;  %3067 = vmatprep.subr.bf16.mxu1 %v5168_v59  ;;  %v5197_v23 = vld [vmem:[%s5595_s18 + $0xb0] sm:$0xff]   ;;  %v2572_v49 = vpack.c.bf16 %v2542_v16, %v2541_v58  ;;  %v2544_v51 = vld [vmem:[#allocation4 + $0x28] sm:$0xff]  ;;  %v5202_v0 = vld [vmem:[%s5595_s18 + $0x60] sm:$0xff]  }
 0x61d   : > { %v5201_v60 = vld [vmem:[%s5595_s18 + $0xa8] sm:$0xff]   ;;  %v5203_v15 = vld [vmem:[%s5595_s18 + $0x20] sm:$0xff]   ;;  %v2573_v54 = vpack.c.bf16 %v2544_v51, %v2543_v29  ;;  %v5206_v4 = vld [vmem:[%s5595_s18 + $0x58] sm:$0xff]   ;;  %v2686_v29 = vlaneseq }
 0x61e   : > { %v5204_v56 = vld [vmem:[%s5595_s18 + $0xe0] sm:$0xff]   ;;  %v5207_v40 = vld [vmem:[%s5595_s18 + $0x18] sm:$0xff]   ;;  %v2545_v53 = vld [vmem:[#allocation4 + $0x30] sm:$0xff] }
 0x61f   : > { %2875 = vmatpush1.bf16.msra.mxu0 %v5170_v11  ;;  %3068 = vmatpush1.bf16.msra.mxu1 %v5171_v41  ;;  %v5205_v8 = vld [vmem:[%s5595_s18 + $0xa0] sm:$0xff]   ;;  %v2546_v17 = vld [vmem:[#allocation4 + $0x38] sm:$0xff]  ;;  %v5210_v14 = vld [vmem:[%s5595_s18 + $0x50] sm:$0xff]   ;;  %v3965_v51 = vand.u32 127, %v2686_v29 }
 0x620   : > { %2876 = vmatprep.subr.bf16.mxu0 %v5172_v22  ;;  %3069 = vmatprep.subr.bf16.mxu1 %v5174_v45  ;;  %v5208_v61 = vld [vmem:[%s5595_s18 + $0xd8] sm:$0xff]   ;;  %v5211_v47 = vld [vmem:[%s5595_s18 + $0x10] sm:$0xff]   ;;  %v2574_v33 = vpack.c.bf16 %v2546_v17, %v2545_v53  ;;  %v5214_v42 = vld [vmem:[%s5595_s18 + $0x48] sm:$0xff]  }
 0x621   : > { %v5209_v30 = vld [vmem:[%s5595_s18 + $0x98] sm:$0xff]   ;;  %v5212_v35 = vld [vmem:[%s5595_s18 + $0xd0] sm:$0xff]   ;;  %v5215_v3 = vld [vmem:[%s5595_s18 + $0x8] sm:$0xff]  }
 0x622   : > { %v5213_v25 = vld [vmem:[%s5595_s18 + $0x90] sm:$0xff]   ;;  %v2547_v6 = vld [vmem:[#allocation4 + $0x40] sm:$0xff]  ;;  %v2548_v28 = vld [vmem:[#allocation4 + $0x48] sm:$0xff] }
 0x623   : > { %2877 = vmatpush1.bf16.msra.mxu0 %v5176_v38  ;;  %3070 = vmatpush1.bf16.msra.mxu1 %v5177_v44  ;;  %v5216_v1 = vld [vmem:[%s5595_s18 + $0xc8] sm:$0xff]   ;;  %v5218_v21 = vld [vmem:[%s5595_s18 + $0x40] sm:$0xff]   ;;  %v2575_v48 = vpack.c.bf16 %v2548_v28, %v2547_v6  ;;  %v2549_v19 = vld [vmem:[#allocation4 + $0x50] sm:$0xff] }
 0x624   : > { %2878 = vmatprep.subr.bf16.mxu0 %v5178_v57  ;;  %3071 = vmatprep.subr.bf16.mxu1 %v5180_v39  ;;  %v5217_v10 = vld [vmem:[%s5595_s18 + $0x88] sm:$0xff]   ;;  %v5219_v50 = vld [vmem:[%s5595_s18] sm:$0xff]   ;;  %v2550_v62 = vld [vmem:[#allocation4 + $0x58] sm:$0xff] }
 0x625   : > { %v5220_v32 = vld [vmem:[%s5595_s18 + $0xc0] sm:$0xff]   ;;  %v2576_v59 = vpack.c.bf16 %v2550_v62, %v2549_v19  ;;  %v2552_v41 = vld [vmem:[#allocation4 + $0x68] sm:$0xff]  ;;  %v2553_v45 = vld [vmem:[#allocation4 + $0x70] sm:$0xff] }
 0x626   : > { %v2551_v11 = vld [vmem:[#allocation4 + $0x60] sm:$0xff]  ;;  %v2554_v38 = vld [vmem:[#allocation4 + $0x78] sm:$0xff]  ;;  %v2556_v39 = vld [vmem:[#allocation4 + $0x88] sm:$0xff] }
 0x627   : > { %2879 = vmatpush1.bf16.msra.mxu0 %v5182_v26  ;;  %3072 = vmatpush1.bf16.msra.mxu1 %v5183_v7  ;;  %v2577_v22 = vpack.c.bf16 %v2552_v41, %v2551_v11  ;;  %v2578_v44 = vpack.c.bf16 %v2554_v38, %v2553_v45  ;;  %v2555_v57 = vld [vmem:[#allocation4 + $0x80] sm:$0xff]  ;;  %v2557_v7 = vld [vmem:[#allocation4 + $0x90] sm:$0xff]  ;;  %v2560_v34 = vld [vmem:[#allocation4 + $0xa8] sm:$0xff]  ;;  %v2687_v38 = vshrl.u32 %v2686_v29, 7 }
 0x628   : > { %2880 = vmatprep.subr.bf16.mxu0 %v5184_v52  ;;  %3073 = vmatprep.subr.bf16.mxu1 %v5186_v13  ;;  %v2579_v26 = vpack.c.bf16 %v2556_v39, %v2555_v57  ;;  %v2558_v52 = vld [vmem:[#allocation4 + $0x98] sm:$0xff]  ;;  %v5221_v13 = vld [vmem:[%s5595_s18 + $0x80] sm:$0xff]   ;;  %v2565_v58 = vld [vmem:[#allocation4 + $0xd0] sm:$0xff] }
 0x629   : > { %v2566_v16 = vld [vmem:[#allocation4 + $0xd8] sm:$0xff]  ;;  %v3974_v6 = vld [vmem:[#allocation2 + $0x30] sm:$0xff]  ;;  %v3977_v62 = vld [vmem:[#allocation2 + $0x48] sm:$0xff] }
 0x62a   : > { %v3978_v41 = vld [vmem:[#allocation2 + $0x50] sm:$0xff] }
 0x62b   : > { %2881 = vmatpush1.bf16.msra.mxu0 %v5188_v24  ;;  %3074 = vmatpush1.bf16.msra.mxu1 %v5189_v46  ;;  %v2580_v24 = vpack.c.bf16 %v2558_v52, %v2557_v7  ;;  %v2559_v46 = vld [vmem:[#allocation4 + $0xa0] sm:$0xff]  ;;  %v2692_v7 = vsub.s32 1, %v2687_v38 }
 0x62c   : > { %4590 = vmatprep.subr.bf16.mxu0 %v5190_v18  ;;  %4702 = vmatprep.subr.bf16.mxu1 %v5192_v55  ;;  %v2581_v27 = vpack.c.bf16 %v2560_v34, %v2559_v46  ;;  %v2561_v18 = vld [vmem:[#allocation4 + $0xb0] sm:$0xff]  ;;  %v2562_v55 = vld [vmem:[#allocation4 + $0xb8] sm:$0xff]  ;;  %v3980_v52 = vld [vmem:[#allocation2 + $0x60] sm:$0xff]  ;;  %v2700_v46 = vsub.s32 3, %v2687_v38 }
 0x62e   : > { %2899 = vmatmul.mubr.bf16.vlgmr.msra.gmra.mxu0 %v2571_v20  ;;  %3092 = vmatmul.mubr.bf16.vlgmr.msra.gmra.mxu1 %v2571_v20  ;;  %v2582_v20 = vpack.c.bf16 %v2562_v55, %v2561_v18 }
 0x62f   : > { %2908 = vmatprep.mubr.bf16.mxu0 %v5398_v36  ;;  %3101 = vmatprep.mubr.bf16.mxu1 %v5398_v36 }
 0x630   : > { %4591 = vmatpush3.bf16.msra.mxu0 %v5191_v5  ;;  %4703 = vmatpush3.bf16.msra.mxu1 %v5193_v63  ;;  %v2563_v5 = vld [vmem:[#allocation4 + $0xc0] sm:$0xff]  ;;  %v2564_v63 = vld [vmem:[#allocation4 + $0xc8] sm:$0xff] }
 0x631   : > { %4592 = vmatprep.subr.bf16.mxu0 %v5194_v9  ;;  %4704 = vmatprep.subr.bf16.mxu1 %v5196_v2  ;;  %v2583_v9 = vpack.c.bf16 %v2564_v63, %v2563_v5  ;;  %v2567_v2 = vld [vmem:[#allocation4 + $0xe0] sm:$0xff] }
 0x634   : > { %4593 = vmatpush3.bf16.msra.mxu0 %v5195_v37  ;;  %4705 = vmatpush3.bf16.msra.mxu1 %v5197_v23  ;;  %v2584_v37 = vpack.c.bf16 %v2566_v16, %v2565_v58  ;;  %v2568_v23 = vld [vmem:[#allocation4 + $0xe8] sm:$0xff] }
 0x635   : > { %4594 = vmatprep.subr.bf16.mxu0 %v5198_v12  ;;  %4706 = vmatprep.subr.bf16.mxu1 %v5200_v31  ;;  %v2569_v12 = vld [vmem:[#allocation4 + $0xf0] sm:$0xff] }
 0x636   : > { %2909 = vmatmul.mubr.bf16.gmra.mxu0 %v2572_v49  ;;  %3102 = vmatmul.mubr.bf16.gmra.mxu1 %v2572_v49  ;;  %v2585_v49 = vpack.c.bf16 %v2568_v23, %v2567_v2 }
 0x637   : > { %2918 = vmatprep.mubr.bf16.mxu0 %v5398_v36  ;;  %3111 = vmatprep.mubr.bf16.mxu1 %v5398_v36 }
 0x638   : > { %4595 = vmatpush3.bf16.msra.mxu0 %v5199_v43  ;;  %4707 = vmatpush3.bf16.msra.mxu1 %v5201_v60  ;;  %v2570_v43 = vld [vmem:[#allocation4 + $0xf8] sm:$0xff]  ;;  %v3966_v60 = vstv %s5378_s27 }
 0x639   : > { %4596 = vmatprep.subr.bf16.mxu0 %v5202_v0  ;;  %4708 = vmatprep.subr.bf16.mxu1 %v5204_v56  ;;  %v2586_v31 = vpack.c.bf16 %v2570_v43, %v2569_v12  ;;  %vm7766_vm0 = vcmp.eq.s32.totalorder %v3965_v51, %v3966_v60  ;;  %v3982_v43 = vld [vmem:[#allocation2 + $0x70] sm:$0xff] }
 0x63a   : > { %v4006_v28 = vsel %vm7766_vm0, %v3974_v6, 0.0  ;;  %v4014_v51 = vsel %vm7766_vm0, %v3982_v43, 0.0 }
 0x63c   : > { %4597 = vmatpush3.bf16.msra.mxu0 %v5203_v15  ;;  %4709 = vmatpush3.bf16.msra.mxu1 %v5205_v8  ;;  %v3968_v15 = vld [vmem:[#allocation2] sm:$0xff] }
 0x63d   : > { %4598 = vmatprep.subr.bf16.mxu0 %v5206_v4  ;;  %4710 = vmatprep.subr.bf16.mxu1 %v5208_v61  ;;  %v4000_v56 = vsel %vm7766_vm0, %v3968_v15, 0.0  ;;  %v3971_v61 = vld [vmem:[#allocation2 + $0x18] sm:$0xff] }
 0x63e   : > { %2919 = vmatmul.mubr.bf16.gmra.mxu0 %v2573_v54  ;;  %3112 = vmatmul.mubr.bf16.gmra.mxu1 %v2573_v54  ;;  %v4033_v54 = vsel %vm4032_vm8, %v4000_v56, 0.0 }
 0x63f   : > { %2928 = vmatprep.mubr.bf16.mxu0 %v5398_v36  ;;  %3121 = vmatprep.mubr.bf16.mxu1 %v5398_v36 }
 0x640   : > { %4599 = vmatpush3.bf16.msra.mxu0 %v5207_v40  ;;  %4711 = vmatpush3.bf16.msra.mxu1 %v5209_v30  ;;  %v3970_v40 = vld [vmem:[#allocation2 + $0x10] sm:$0xff]  ;;  %v4003_v30 = vsel %vm7766_vm0, %v3971_v61, 0.0 }
 0x641   : > { %4600 = vmatprep.subr.bf16.mxu0 %v5210_v14  ;;  %4712 = vmatprep.subr.bf16.mxu1 %v5212_v35  ;;  %v4002_v53 = vsel %vm7766_vm0, %v3970_v40, 0.0  ;;  %v4042_v14 = vsel %vm4032_vm8, %v4003_v30, 0.0  ;;  %v3983_v40 = vld [vmem:[#allocation2 + $0x78] sm:$0xff] }
 0x642   : > { %4034 = vadd.xlane.f32.xlu0 %v4033_v54  ;;  %v4039_v17 = vsel %vm4032_vm8, %v4002_v53, 0.0  ;;  %v3984_v53 = vld [vmem:[#allocation2 + $0x80] sm:$0xff]  ;;  %v4015_v6 = vsel %vm7766_vm0, %v3983_v40, 0.0 }
 0x643   : > { %4040 = vadd.xlane.f32.xlu1 %v4039_v17  ;;  %v3985_v17 = vld [vmem:[#allocation2 + $0x88] sm:$0xff] }
 0x644   : > { %4601 = vmatpush3.bf16.msra.mxu0 %v5211_v47  ;;  %4713 = vmatpush3.bf16.msra.mxu1 %v5213_v25  ;;  %v3972_v47 = vld [vmem:[#allocation2 + $0x20] sm:$0xff]  ;;  %v3973_v25 = vld [vmem:[#allocation2 + $0x28] sm:$0xff] }
 0x645   : > { %4602 = vmatprep.subr.bf16.mxu0 %v5214_v42  ;;  %4714 = vmatprep.subr.bf16.mxu1 %v5216_v1  ;;  %v4004_v35 = vsel %vm7766_vm0, %v3972_v47, 0.0  ;;  %v4005_v42 = vsel %vm7766_vm0, %v3973_v25, 0.0  ;;  %v4051_v1 = vsel %vm4032_vm8, %v4006_v28, 0.0  ;;  %v4016_v28 = vsel %vm7766_vm0, %v3984_v53, 0.0  ;;  %v3991_v53 = vld [vmem:[#allocation2 + $0xb8] sm:$0xff] }
 0x646   : > { %2929 = vmatmul.mubr.bf16.gmra.mxu0 %v2574_v33  ;;  %3122 = vmatmul.mubr.bf16.gmra.mxu1 %v2574_v33  ;;  %v4045_v33 = vsel %vm4032_vm8, %v4004_v35, 0.0  ;;  %v3986_v35 = vld [vmem:[#allocation2 + $0x90] sm:$0xff] }
 0x647   : > { %2938 = vmatprep.mubr.bf16.mxu0 %v5398_v36  ;;  %3131 = vmatprep.mubr.bf16.mxu1 %v5398_v36 }
 0x648   : > { %4603 = vmatpush3.bf16.msra.mxu0 %v5215_v3  ;;  %4715 = vmatpush3.bf16.msra.mxu1 %v5217_v10  ;;  %v4048_v3 = vsel %vm4032_vm8, %v4005_v42, 0.0  ;;  %v3975_v10 = vld [vmem:[#allocation2 + $0x38] sm:$0xff] }
 0x649   : > { %4604 = vmatprep.subr.bf16.mxu0 %v5218_v21  ;;  %4716 = vmatprep.subr.bf16.mxu1 %v5220_v32  ;;  %v4007_v21 = vsel %vm7766_vm0, %v3975_v10, 0.0  ;;  %v3976_v32 = vld [vmem:[#allocation2 + $0x40] sm:$0xff] }
 0x64a   : > { %4043 = vadd.xlane.f32.xlu1 %v4042_v14 }
 0x64c   : > { %4605 = vmatpush3.bf16.msra.mxu0 %v5219_v50  ;;  %4717 = vmatpush3.bf16.msra.mxu1 %v5221_v13  ;;  %v4054_v50 = vsel %vm4032_vm8, %v4007_v21, 0.0  ;;  %v2683_v13 = vld [vmem:[%s5593_s10] sm:$0xf] }
 0x64d   : > { %v7812_v55 = vrot.slane %v2683_v13, %v2692_v7  ;;  %v7816_v58 = vrot.slane %v2683_v13, %v2700_v46 }
 0x64e   : > { %2939 = vmatmul.mubr.bf16.gmra.mxu0 %v2575_v48  ;;  %3132 = vmatmul.mubr.bf16.gmra.mxu1 %v2575_v48  ;;  %v4008_v48 = vsel %vm7766_vm0, %v3976_v32, 0.0 }
 0x64f   : > { %2948 = vmatprep.mubr.bf16.mxu0 %v5398_v36  ;;  %3141 = vmatprep.mubr.bf16.mxu1 %v5398_v36  ;;  %v4057_v19 = vsel %vm4032_vm8, %v4008_v48, 0.0 }
 0x650   : > { %4049 = vadd.xlane.f32.xlu1 %v4048_v3 }
 0x654   : > { %4055 = vadd.xlane.f32.xlu1 %v4054_v50  ;;  %v4017_v50 = vsel %vm7766_vm0, %v3985_v17, 0.0 }
 0x656   : > { %2949 = vmatmul.mubr.bf16.gmra.mxu0 %v2576_v59  ;;  %3142 = vmatmul.mubr.bf16.gmra.mxu1 %v2576_v59  ;;  %v4009_v59 = vsel %vm7766_vm0, %v3977_v62, 0.0  ;;  %v4078_v62 = vsel %vm4032_vm8, %v4015_v6, 0.0 }
 0x657   : > { %2958 = vmatprep.mubr.bf16.mxu0 %v5398_v36  ;;  %3151 = vmatprep.mubr.bf16.mxu1 %v5398_v36  ;;  %v4060_v11 = vsel %vm4032_vm8, %v4009_v59, 0.0  ;;  %v4081_v59 = vsel %vm4032_vm8, %v4016_v28, 0.0 }
 0x658   : > { %4061 = vadd.xlane.f32.xlu1 %v4060_v11  ;;  %v4018_v11 = vsel %vm7766_vm0, %v3986_v35, 0.0 }
 0x65e   : > { %2959 = vmatmul.mubr.bf16.gmra.mxu0 %v2577_v22  ;;  %3152 = vmatmul.mubr.bf16.gmra.mxu1 %v2577_v22  ;;  %v4010_v22 = vsel %vm7766_vm0, %v3978_v41, 0.0 }
 0x65f   : > { %2968 = vmatprep.mubr.bf16.mxu0 %v5398_v36  ;;  %3161 = vmatprep.mubr.bf16.mxu1 %v5398_v36  ;;  %v4063_v45 = vsel %vm4032_vm8, %v4010_v22, 0.0 }
 0x666   : > { %2969 = vmatmul.mubr.bf16.gmra.mxu0 %v2578_v44  ;;  %3162 = vmatmul.mubr.bf16.gmra.mxu1 %v2578_v44  ;;  %v3979_v44 = vld [vmem:[#allocation2 + $0x58] sm:$0xff] }
 0x667   : > { %2978 = vmatprep.mubr.bf16.mxu0 %v5398_v36  ;;  %3171 = vmatprep.mubr.bf16.mxu1 %v5398_v36  ;;  %v4011_v57 = vsel %vm7766_vm0, %v3979_v44, 0.0  ;;  %v3988_v44 = vld [vmem:[#allocation2 + $0xa0] sm:$0xff] }
 0x668   : > { %v4066_v39 = vsel %vm4032_vm8, %v4011_v57, 0.0 }
 0x669   : > { %4067 = vadd.xlane.f32.xlu1 %v4066_v39 }
 0x66e   : > { %2979 = vmatmul.mubr.bf16.gmra.mxu0 %v2579_v26  ;;  %3172 = vmatmul.mubr.bf16.gmra.mxu1 %v2579_v26  ;;  %v2688_v26 = vsub.s32 0, %v2687_v38 }
 0x66f   : > { %2988 = vmatprep.mubr.bf16.mxu0 %v5398_v36  ;;  %3181 = vmatprep.mubr.bf16.mxu1 %v5398_v36 }
 0x670   : > { %v7810_v18 = vrot.slane %v2683_v13, %v2688_v26 }
 0x676   : > { %2989 = vmatmul.mubr.bf16.gmra.mxu0 %v2580_v24  ;;  %3182 = vmatmul.mubr.bf16.gmra.mxu1 %v2580_v24  ;;  %v4012_v24 = vsel %vm7766_vm0, %v3980_v52, 0.0  ;;  %v4084_v52 = vsel %vm4032_vm8, %v4017_v50, 0.0 }
 0x677   : > { %2998 = vmatprep.mubr.bf16.mxu0 %v5398_v36  ;;  %3191 = vmatprep.mubr.bf16.mxu1 %v5398_v36  ;;  %v4069_v34 = vsel %vm4032_vm8, %v4012_v24, 0.0 }
 0x67e   : > { %2999 = vmatmul.mubr.bf16.gmra.mxu0 %v2581_v27  ;;  %3192 = vmatmul.mubr.bf16.gmra.mxu1 %v2581_v27  ;;  %v2696_v27 = vsub.s32 2, %v2687_v38  ;;  %v3987_v38 = vld [vmem:[#allocation2 + $0x98] sm:$0xff] }
 0x67f   : > { %3008 = vmatprep.mubr.bf16.mxu0 %v5398_v36  ;;  %3201 = vmatprep.mubr.bf16.mxu1 %v5398_v36 }
 0x686   : > { %3009 = vmatmul.mubr.bf16.gmra.mxu0 %v2582_v20  ;;  %3202 = vmatmul.mubr.bf16.gmra.mxu1 %v2582_v20  ;;  %v3981_v20 = vld [vmem:[#allocation2 + $0x68] sm:$0xff] }
 0x687   : > { %3018 = vmatprep.mubr.bf16.mxu0 %v5398_v36  ;;  %3211 = vmatprep.mubr.bf16.mxu1 %v5398_v36 }
 0x68e   : > { %3019 = vmatmul.mubr.bf16.gmra.mxu0 %v2583_v9  ;;  %3212 = vmatmul.mubr.bf16.gmra.mxu1 %v2583_v9  ;;  %v4013_v9 = vsel %vm7766_vm0, %v3981_v20, 0.0  ;;  %v3990_v20 = vld [vmem:[#allocation2 + $0xb0] sm:$0xff] }
 0x68f   : > { %3028 = vmatprep.mubr.bf16.mxu0 %v5398_v36  ;;  %3221 = vmatprep.mubr.bf16.mxu1 %v5398_v36  ;;  %v4072_v16 = vsel %vm4032_vm8, %v4013_v9, 0.0 }
 0x690   : > { %4073 = vadd.xlane.f32.xlu1 %v4072_v16 }
 0x694   : > { %4079 = vadd.xlane.f32.xlu1 %v4078_v62 }
 0x696   : > { %3029 = vmatmul.mubr.bf16.gmra.mxu0 %v2584_v37  ;;  %3222 = vmatmul.mubr.bf16.gmra.mxu1 %v2584_v37  ;;  %v7819_v37 = vrot.slane %v2683_v13, %v2696_v27  ;;  %v3989_v13 = vld [vmem:[#allocation2 + $0xa8] sm:$0xff]  ;;  %v4087_v27 = vsel %vm4032_vm8, %v4018_v11, 0.0 }
 0x697   : > { %3038 = vmatprep.mubr.bf16.mxu0 %v5398_v36  ;;  %3231 = vmatprep.mubr.bf16.mxu1 %v5398_v36 }
 0x698   : > { %4085 = vadd.xlane.f32.xlu1 %v4084_v52 }
 0x69e   : > { %3039 = vmatmul.mubr.bf16.gmra.mxu0 %v2585_v49  ;;  %3232 = vmatmul.mubr.bf16.gmra.mxu1 %v2585_v49 }
 0x69f   : > { %3048 = vmatprep.mubr.bf16.mxu0 %v5398_v36  ;;  %3241 = vmatprep.mubr.bf16.mxu1 %v5398_v36  ;;  %v3969_v36 = vld [vmem:[#allocation2 + $0x8] sm:$0xff] }
 0x6a0   : > { %v4001_v8 = vsel %vm7766_vm0, %v3969_v36, 0.0 }
 0x6a1   : > { %v4036_v4 = vsel %vm4032_vm8, %v4001_v8, 0.0 }
 0x6a2   : > { %4037 = vadd.xlane.f32.xlu0 %v4036_v4  ;;  %v4075_v4 = vsel %vm4032_vm8, %v4014_v51, 0.0 }
 0x6a6   : > { %3049 = vmatmul.mubr.bf16.gmra.mxu0 %v2586_v31  ;;  %3242 = vmatmul.mubr.bf16.gmra.mxu1 %v2586_v31 }
 0x6a7   : > { %4046 = vadd.xlane.f32.xlu0 %v4045_v33 }
 0x6ab   : > { %4052 = vadd.xlane.f32.xlu0 %v4051_v1 }
 0x6af   : > { %4058 = vadd.xlane.f32.xlu0 %v4057_v19 }
 0x6b3   : > { %4064 = vadd.xlane.f32.xlu0 %v4063_v45 }
 0x6b7   : > { %4070 = vadd.xlane.f32.xlu0 %v4069_v34 }
 0x6bb   : > { %4076 = vadd.xlane.f32.xlu0 %v4075_v4 }
 0x6bf   : > { %4082 = vadd.xlane.f32.xlu0 %v4081_v59 }
 0x6c3   : > { %4088 = vadd.xlane.f32.xlu0 %v4087_v27 }
 0x6ee   : > { %v2900_v5 = vpop.f32.mrf.mxu0  ;;  %v3093_v63 = vpop.f32.mrf.mxu1 }
 0x6ef   : > { %v2901_v49 = vadd.f32 %v2900_v5, %v7810_v18  ;;  %v3094_v54 = vadd.f32 %v3093_v63, %v7819_v37 }
 0x6f0   : > { %v2902_v2 = vpop.f32.mrf.mxu0  ;;  %v3095_v23 = vpop.f32.mrf.mxu1 }
 0x6f1   : > { %v2903_v12 = vadd.f32 %v2902_v2, %v7812_v55  ;;  %v3096_v60 = vadd.f32 %v3095_v23, %v7816_v58  ;;  %v3252_v61 = vmax.f32 %v2901_v49, 0.0  ;;  %v3254_v32 = vmax.f32 %v3094_v54, 0.0 }
 0x6f2   : > { %v2904_v31 = vpop.f32.mrf.mxu0  ;;  %v3097_v29 = vpop.f32.mrf.mxu1  ;;  %v4019_v2 = vsel %vm7766_vm0, %v3987_v38, 0.0  ;;  %v4020_v23 = vsel %vm7766_vm0, %v3988_v44, 0.0  ;;  %v4022_v54 = vsel %vm7766_vm0, %v3990_v20, 0.0 }
 0x6f3   : > { %v2905_v15 = vadd.f32 %v2904_v31, %v7810_v18  ;;  %v3098_v56 = vadd.f32 %v3097_v29, %v7819_v37  ;;  %v3253_v30 = vmax.f32 %v2903_v12, 0.0  ;;  %v3255_v1 = vmax.f32 %v3096_v60, 0.0 }
 0x6f4   : > { %v2906_v36 = vpop.f32.mrf.mxu0  ;;  %v3099_v8 = vpop.f32.mrf.mxu1  ;;  %v4021_v31 = vsel %vm7766_vm0, %v3989_v13, 0.0  ;;  %v4093_v40 = vsel %vm4032_vm8, %v4020_v23, 0.0 }
 0x6f5   : > { %v2907_v14 = vadd.f32 %v2906_v36, %v7812_v55  ;;  %v3100_v47 = vadd.f32 %v3099_v8, %v7816_v58  ;;  %v3256_v33 = vmax.f32 %v2905_v15, 0.0  ;;  %v3258_v25 = vmax.f32 %v3098_v56, 0.0  ;;  %4094 = vadd.xlane.f32.xlu0 %v4093_v40 }
 0x6f6   : > { %v2910_v42 = vpop.f32.mrf.mxu0  ;;  %v3103_v3 = vpop.f32.mrf.mxu1  ;;  %v4090_v56 = vsel %vm4032_vm8, %v4019_v2, 0.0 }
 0x6f7   : > { %v3257_v10 = vmax.f32 %v2907_v14, 0.0  ;;  %v3259_v21 = vmax.f32 %v3100_v47, 0.0  ;;  %v3380_v57 = vpack.c.bf16 %v3256_v33, %v3252_v61  ;;  %v3382_v39 = vpack.c.bf16 %v3258_v25, %v3254_v32  ;;  %v3992_v47 = vld [vmem:[#allocation2 + $0xc0] sm:$0xff]  ;;  %4091 = vadd.xlane.f32.xlu1 %v4090_v56 }
 0x6f8   : > { %v2912_v48 = vpop.f32.mrf.mxu0  ;;  %v3105_v19 = vpop.f32.mrf.mxu1  ;;  %v2911_v5 = vadd.f32 %v2910_v42, %v7810_v18  ;;  %v3104_v63 = vadd.f32 %v3103_v3, %v7819_v37  ;;  %v4096_v25 = vsel %vm4032_vm8, %v4021_v31, 0.0  ;;  %v4099_v42 = vsel %vm4032_vm8, %v4022_v54, 0.0 }
 0x6f9   : > { %v2913_v41 = vadd.f32 %v2912_v48, %v7812_v55  ;;  %v3381_v22 = vpack.c.bf16 %v3257_v10, %v3253_v30  ;;  %v3383_v45 = vpack.c.bf16 %v3259_v21, %v3255_v1  ;;  %v3106_v24 = vadd.f32 %v3105_v19, %v7816_v58  ;;  %4100 = vadd.xlane.f32.xlu0 %v4099_v42 }
 0x6fa   : > { %v2914_v26 = vpop.f32.mrf.mxu0  ;;  %v3107_v7 = vpop.f32.mrf.mxu1  ;;  %v3260_v17 = vmax.f32 %v2911_v5, 0.0  ;;  %v3262_v61 = vmax.f32 %v3104_v63, 0.0  ;;  %v4023_v21 = vsel %vm7766_vm0, %v3991_v53, 0.0  ;;  %v4024_v19 = vsel %vm7766_vm0, %v3992_v47, 0.0 }
 0x6fb   : > { %v2915_v46 = vadd.f32 %v2914_v26, %v7810_v18  ;;  %v3108_v34 = vadd.f32 %v3107_v7, %v7819_v37  ;;  %3674 = vmatprep.mubr.bf16.mxu0 %v3381_v22  ;;  %3835 = vmatprep.mubr.bf16.mxu1 %v3383_v45  ;;  %v3261_v49 = vmax.f32 %v2913_v41, 0.0  ;;  %v3263_v36 = vmax.f32 %v3106_v24, 0.0  ;;  %v3993_v22 = vld [vmem:[#allocation2 + $0xc8] sm:$0xff] }
 0x6fc   : > { %v2916_v9 = vpop.f32.mrf.mxu0  ;;  %v3109_v16 = vpop.f32.mrf.mxu1  ;;  %3675 = vmatmul.mubr.bf16.vlgmr.msra.gmra.mxu0 %v3380_v57  ;;  %3836 = vmatmul.mubr.bf16.vlgmr.msra.gmra.mxu1 %v3382_v39  ;;  %v4102_v44 = vsel %vm4032_vm8, %v4023_v21, 0.0  ;;  %v3994_v57 = vld [vmem:[#allocation2 + $0xd0] sm:$0xff]  ;;  %v4105_v24 = vsel %vm4032_vm8, %v4024_v19, 0.0  ;;  %v4025_v63 = vsel %vm7766_vm0, %v3993_v22, 0.0 }
 0x6fd   : > { %v2917_v12 = vadd.f32 %v2916_v9, %v7812_v55  ;;  %v3110_v43 = vadd.f32 %v3109_v16, %v7816_v58  ;;  %v3264_v29 = vmax.f32 %v2915_v46, 0.0  ;;  %v3266_v51 = vmax.f32 %v3108_v34, 0.0  ;;  %4097 = vadd.xlane.f32.xlu1 %v4096_v25  ;;  %v3995_v46 = vld [vmem:[#allocation2 + $0xd8] sm:$0xff]  ;;  %v3996_v34 = vld [vmem:[#allocation2 + $0xe0] sm:$0xff]  ;;  %4106 = vadd.xlane.f32.xlu0 %v4105_v24 }
 0x6fe   : > { %v2920_v60 = vpop.f32.mrf.mxu0  ;;  %v3113_v15 = vpop.f32.mrf.mxu1  ;;  %v4027_v31 = vsel %vm7766_vm0, %v3995_v46, 0.0 }
 0x6ff   : > { %v3265_v8 = vmax.f32 %v2917_v12, 0.0  ;;  %v3267_v4 = vmax.f32 %v3110_v43, 0.0  ;;  %v3384_v3 = vpack.c.bf16 %v3264_v29, %v3260_v17  ;;  %v3386_v6 = vpack.c.bf16 %v3266_v51, %v3262_v61  ;;  %v3997_v17 = vld [vmem:[#allocation2 + $0xe8] sm:$0xff]  ;;  %v3998_v61 = vld [vmem:[#allocation2 + $0xf0] sm:$0xff] }
 0x700   : > { %v2922_v30 = vpop.f32.mrf.mxu0  ;;  %v3115_v14 = vpop.f32.mrf.mxu1  ;;  %v2921_v62 = vadd.f32 %v2920_v60, %v7810_v18  ;;  %v3114_v59 = vadd.f32 %v3113_v15, %v7819_v37  ;;  %v4028_v29 = vsel %vm7766_vm0, %v3996_v34, 0.0  ;;  %v4114_v42 = vsel %vm4032_vm8, %v4027_v31, 0.0 }
 0x701   : > { %v3385_v35 = vpack.c.bf16 %v3265_v8, %v3261_v49  ;;  %v3387_v33 = vpack.c.bf16 %v3267_v4, %v3263_v36  ;;  %v2923_v28 = vadd.f32 %v2922_v30, %v7812_v55  ;;  %v3116_v50 = vadd.f32 %v3115_v14, %v7816_v58  ;;  %4103 = vadd.xlane.f32.xlu1 %v4102_v44 }
 0x702   : > { %v2924_v1 = vpop.f32.mrf.mxu0  ;;  %v3117_v10 = vpop.f32.mrf.mxu1  ;;  %v3268_v9 = vmax.f32 %v2921_v62, 0.0  ;;  %v3270_v16 = vmax.f32 %v3114_v59, 0.0  ;;  %v4026_v49 = vsel %vm7766_vm0, %v3994_v57, 0.0  ;;  %v4108_v36 = vsel %vm4032_vm8, %v4025_v63, 0.0 }
 0x703   : > { %v2925_v32 = vadd.f32 %v2924_v1, %v7810_v18  ;;  %v3118_v48 = vadd.f32 %v3117_v10, %v7819_v37  ;;  %3682 = vmatprep.mubr.bf16.mxu0 %v3385_v35  ;;  %3843 = vmatprep.mubr.bf16.mxu1 %v3387_v33  ;;  %v3269_v39 = vmax.f32 %v2923_v28, 0.0  ;;  %v3271_v27 = vmax.f32 %v3116_v50, 0.0 }
 0x704   : > { %v2926_v11 = vpop.f32.mrf.mxu0  ;;  %v3119_v41 = vpop.f32.mrf.mxu1  ;;  %3683 = vmatmul.mubr.bf16.gmra.mxu0 %v3384_v3  ;;  %3844 = vmatmul.mubr.bf16.gmra.mxu1 %v3386_v6  ;;  %v4111_v53 = vsel %vm4032_vm8, %v4026_v49, 0.0  ;;  %v4117_v3 = vsel %vm4032_vm8, %v4028_v29, 0.0  ;;  %v4029_v21 = vsel %vm7766_vm0, %v3997_v17, 0.0  ;;  %v4030_v50 = vsel %vm7766_vm0, %v3998_v61, 0.0 }
 0x705   : > { %v2927_v45 = vadd.f32 %v2926_v11, %v7812_v55  ;;  %v3120_v38 = vadd.f32 %v3119_v41, %v7816_v58  ;;  %v3272_v26 = vmax.f32 %v2925_v32, 0.0  ;;  %v3274_v7 = vmax.f32 %v3118_v48, 0.0  ;;  %4109 = vadd.xlane.f32.xlu1 %v4108_v36  ;;  %4112 = vadd.xlane.f32.xlu0 %v4111_v53 }
 0x706   : > { %v2930_v52 = vpop.f32.mrf.mxu0  ;;  %v3123_v13 = vpop.f32.mrf.mxu1  ;;  %v4120_v57 = vsel %vm4032_vm8, %v4029_v21, 0.0  ;;  %v4123_v24 = vsel %vm4032_vm8, %v4030_v50, 0.0 }
 0x707   : > { %v3273_v20 = vmax.f32 %v2927_v45, 0.0  ;;  %v3275_v5 = vmax.f32 %v3120_v38, 0.0  ;;  %v3388_v51 = vpack.c.bf16 %v3272_v26, %v3268_v9  ;;  %v3390_v60 = vpack.c.bf16 %v3274_v7, %v3270_v16  ;;  %v3999_v45 = vld [vmem:[#allocation2 + $0xf8] sm:$0xff] }
 0x708   : > { %v2932_v2 = vpop.f32.mrf.mxu0  ;;  %v3125_v23 = vpop.f32.mrf.mxu1  ;;  %v2931_v30 = vadd.f32 %v2930_v52, %v7810_v18  ;;  %v3124_v14 = vadd.f32 %v3123_v13, %v7819_v37 }
 0x709   : > { %v3389_v12 = vpack.c.bf16 %v3273_v20, %v3269_v39  ;;  %v3391_v43 = vpack.c.bf16 %v3275_v5, %v3271_v27  ;;  %v2933_v15 = vadd.f32 %v2932_v2, %v7812_v55  ;;  %v3126_v8 = vadd.f32 %v3125_v23, %v7816_v58  ;;  %4115 = vadd.xlane.f32.xlu1 %v4114_v42 }
 0x70a   : > { %v2934_v56 = vpop.f32.mrf.mxu0  ;;  %v3127_v54 = vpop.f32.mrf.mxu1  ;;  %v3276_v59 = vmax.f32 %v2931_v30, 0.0  ;;  %v3278_v11 = vmax.f32 %v3124_v14, 0.0  ;;  %4118 = vadd.xlane.f32.xlu0 %v4117_v3  ;;  %v4031_v20 = vsel %vm7766_vm0, %v3999_v45, 0.0 }
 0x70b   : > { %v2935_v4 = vadd.f32 %v2934_v56, %v7810_v18  ;;  %v3128_v40 = vadd.f32 %v3127_v54, %v7819_v37  ;;  %3690 = vmatprep.mubr.bf16.mxu0 %v3389_v12  ;;  %3851 = vmatprep.mubr.bf16.mxu1 %v3391_v43  ;;  %v3277_v32 = vmax.f32 %v2933_v15, 0.0  ;;  %v3279_v48 = vmax.f32 %v3126_v8, 0.0 }
 0x70c   : > { %v2936_v47 = vpop.f32.mrf.mxu0  ;;  %v3129_v35 = vpop.f32.mrf.mxu1  ;;  %3691 = vmatmul.mubr.bf16.gmra.mxu0 %v3388_v51  ;;  %3852 = vmatmul.mubr.bf16.gmra.mxu1 %v3390_v60  ;;  %v4126_v0 = vsel %vm4032_vm8, %v4031_v20, 0.0 }
 0x70d   : > { %v2937_v33 = vadd.f32 %v2936_v47, %v7812_v55  ;;  %v3130_v25 = vadd.f32 %v3129_v35, %v7816_v58  ;;  %v3280_v6 = vmax.f32 %v2935_v4, 0.0  ;;  %v3282_v28 = vmax.f32 %v3128_v40, 0.0  ;;  %4121 = vadd.xlane.f32.xlu1 %v4120_v57 }
 0x70e   : > { %v2940_v1 = vpop.f32.mrf.mxu0  ;;  %v3133_v10 = vpop.f32.mrf.mxu1  ;;  %4124 = vadd.xlane.f32.xlu0 %v4123_v24 }
 0x70f   : > { %v3281_v19 = vmax.f32 %v2937_v33, 0.0  ;;  %v3283_v62 = vmax.f32 %v3130_v25, 0.0  ;;  %v3392_v39 = vpack.c.bf16 %v3280_v6, %v3276_v59  ;;  %v3394_v26 = vpack.c.bf16 %v3282_v28, %v3278_v11 }
 0x710   : > { %v2942_v41 = vpop.f32.mrf.mxu0  ;;  %v3135_v22 = vpop.f32.mrf.mxu1  ;;  %v2941_v5 = vadd.f32 %v2940_v1, %v7810_v18  ;;  %v3134_v63 = vadd.f32 %v3133_v10, %v7819_v37 }
 0x711   : > { %v3393_v38 = vpack.c.bf16 %v3281_v19, %v3277_v32  ;;  %v3395_v44 = vpack.c.bf16 %v3283_v62, %v3279_v48  ;;  %v2943_v7 = vadd.f32 %v2942_v41, %v7812_v55  ;;  %v3136_v46 = vadd.f32 %v3135_v22, %v7816_v58  ;;  %4127 = vadd.xlane.f32.xlu1 %v4126_v0 }
 0x712   : > { %v2944_v52 = vpop.f32.mrf.mxu0  ;;  %v3137_v13 = vpop.f32.mrf.mxu1  ;;  %v3284_v56 = vmax.f32 %v2941_v5, 0.0  ;;  %v3286_v54 = vmax.f32 %v3134_v63, 0.0 }
 0x713   : > { %v2945_v34 = vadd.f32 %v2944_v52, %v7810_v18  ;;  %v3138_v27 = vadd.f32 %v3137_v13, %v7819_v37  ;;  %3698 = vmatprep.mubr.bf16.mxu0 %v3393_v38  ;;  %3859 = vmatprep.mubr.bf16.mxu1 %v3395_v44  ;;  %v3285_v29 = vmax.f32 %v2943_v7, 0.0  ;;  %v3287_v51 = vmax.f32 %v3136_v46, 0.0 }
 0x714   : > { %v2946_v9 = vpop.f32.mrf.mxu0  ;;  %v3139_v16 = vpop.f32.mrf.mxu1  ;;  %3699 = vmatmul.mubr.bf16.gmra.mxu0 %v3392_v39  ;;  %3860 = vmatmul.mubr.bf16.gmra.mxu1 %v3394_v26 }
 0x715   : > { %v2947_v2 = vadd.f32 %v2946_v9, %v7812_v55  ;;  %v3140_v23 = vadd.f32 %v3139_v16, %v7816_v58  ;;  %v3288_v49 = vmax.f32 %v2945_v34, 0.0  ;;  %v3290_v12 = vmax.f32 %v3138_v27, 0.0 }
 0x716   : > { %v2950_v43 = vpop.f32.mrf.mxu0  ;;  %v3143_v31 = vpop.f32.mrf.mxu1 }
 0x717   : > { %v3289_v60 = vmax.f32 %v2947_v2, 0.0  ;;  %v3291_v15 = vmax.f32 %v3140_v23, 0.0  ;;  %v3396_v53 = vpack.c.bf16 %v3288_v49, %v3284_v56  ;;  %v3398_v17 = vpack.c.bf16 %v3290_v12, %v3286_v54 }
 0x718   : > { %v2952_v36 = vpop.f32.mrf.mxu0  ;;  %v3145_v8 = vpop.f32.mrf.mxu1  ;;  %v2951_v25 = vadd.f32 %v2950_v43, %v7810_v18  ;;  %v3144_v42 = vadd.f32 %v3143_v31, %v7819_v37 }
 0x719   : > { %v3397_v4 = vpack.c.bf16 %v3289_v60, %v3285_v29  ;;  %v3399_v40 = vpack.c.bf16 %v3291_v15, %v3287_v51  ;;  %v2953_v61 = vadd.f32 %v2952_v36, %v7812_v55  ;;  %v3146_v47 = vadd.f32 %v3145_v8, %v7816_v58 }
 0x71a   : > { %v2954_v30 = vpop.f32.mrf.mxu0  ;;  %v3147_v14 = vpop.f32.mrf.mxu1  ;;  %v3292_v11 = vmax.f32 %v2951_v25, 0.0  ;;  %v3294_v41 = vmax.f32 %v3144_v42, 0.0 }
 0x71b   : > { %v2955_v35 = vadd.f32 %v2954_v30, %v7810_v18  ;;  %v3148_v33 = vadd.f32 %v3147_v14, %v7819_v37  ;;  %3706 = vmatprep.mubr.bf16.mxu0 %v3397_v4  ;;  %3867 = vmatprep.mubr.bf16.mxu1 %v3399_v40  ;;  %v3293_v48 = vmax.f32 %v2953_v61, 0.0  ;;  %v3295_v19 = vmax.f32 %v3146_v47, 0.0 }
 0x71c   : > { %v2956_v3 = vpop.f32.mrf.mxu0  ;;  %v3149_v6 = vpop.f32.mrf.mxu1  ;;  %3707 = vmatmul.mubr.bf16.gmra.mxu0 %v3396_v53  ;;  %3868 = vmatmul.mubr.bf16.gmra.mxu1 %v3398_v17 }
 0x71d   : > { %v2957_v28 = vadd.f32 %v2956_v3, %v7812_v55  ;;  %v3150_v1 = vadd.f32 %v3149_v6, %v7816_v58  ;;  %v3296_v10 = vmax.f32 %v2955_v35, 0.0  ;;  %v3298_v21 = vmax.f32 %v3148_v33, 0.0 }
 0x71e   : > { %v2960_v50 = vpop.f32.mrf.mxu0  ;;  %v3153_v32 = vpop.f32.mrf.mxu1 }
 0x71f   : > { %v3297_v62 = vmax.f32 %v2957_v28, 0.0  ;;  %v3299_v59 = vmax.f32 %v3150_v1, 0.0  ;;  %v3400_v57 = vpack.c.bf16 %v3296_v10, %v3292_v11  ;;  %v3402_v39 = vpack.c.bf16 %v3298_v21, %v3294_v41 }
 0x720   : > { %v2962_v22 = vpop.f32.mrf.mxu0  ;;  %v3155_v45 = vpop.f32.mrf.mxu1  ;;  %v2961_v34 = vadd.f32 %v2960_v50, %v7810_v18  ;;  %v3154_v27 = vadd.f32 %v3153_v32, %v7819_v37 }
 0x721   : > { %v3401_v38 = vpack.c.bf16 %v3297_v62, %v3293_v48  ;;  %v3403_v44 = vpack.c.bf16 %v3299_v59, %v3295_v19  ;;  %v2963_v26 = vadd.f32 %v2962_v22, %v7812_v55  ;;  %v3156_v13 = vadd.f32 %v3155_v45, %v7816_v58 }
 0x722   : > { %v2964_v7 = vpop.f32.mrf.mxu0  ;;  %v3157_v52 = vpop.f32.mrf.mxu1  ;;  %v3300_v29 = vmax.f32 %v2961_v34, 0.0  ;;  %v3302_v51 = vmax.f32 %v3154_v27, 0.0 }
 0x723   : > { %v2965_v24 = vadd.f32 %v2964_v7, %v7810_v18  ;;  %v3158_v46 = vadd.f32 %v3157_v52, %v7819_v37  ;;  %3714 = vmatprep.mubr.bf16.mxu0 %v3401_v38  ;;  %3875 = vmatprep.mubr.bf16.mxu1 %v3403_v44  ;;  %v3301_v12 = vmax.f32 %v2963_v26, 0.0  ;;  %v3303_v43 = vmax.f32 %v3156_v13, 0.0 }
 0x724   : > { %v2966_v20 = vpop.f32.mrf.mxu0  ;;  %v3159_v5 = vpop.f32.mrf.mxu1  ;;  %3715 = vmatmul.mubr.bf16.gmra.mxu0 %v3400_v57  ;;  %3876 = vmatmul.mubr.bf16.gmra.mxu1 %v3402_v39 }
 0x725   : > { %v2967_v63 = vadd.f32 %v2966_v20, %v7812_v55  ;;  %v3160_v9 = vadd.f32 %v3159_v5, %v7816_v58  ;;  %v3304_v16 = vmax.f32 %v2965_v24, 0.0  ;;  %v3306_v2 = vmax.f32 %v3158_v46, 0.0 }
 0x726   : > { %v2970_v23 = vpop.f32.mrf.mxu0  ;;  %v3163_v49 = vpop.f32.mrf.mxu1 }
 0x727   : > { %v3305_v31 = vmax.f32 %v2967_v63, 0.0  ;;  %v3307_v0 = vmax.f32 %v3160_v9, 0.0  ;;  %v3404_v36 = vpack.c.bf16 %v3304_v16, %v3300_v29  ;;  %v3406_v8 = vpack.c.bf16 %v3306_v2, %v3302_v51 }
 0x728   : > { %v2972_v60 = vpop.f32.mrf.mxu0  ;;  %v3165_v15 = vpop.f32.mrf.mxu1  ;;  %v2971_v14 = vadd.f32 %v2970_v23, %v7810_v18  ;;  %v3164_v47 = vadd.f32 %v3163_v49, %v7819_v37 }
 0x729   : > { %v3405_v56 = vpack.c.bf16 %v3305_v31, %v3301_v12  ;;  %v3407_v54 = vpack.c.bf16 %v3307_v0, %v3303_v43  ;;  %v2973_v4 = vadd.f32 %v2972_v60, %v7812_v55  ;;  %v3166_v17 = vadd.f32 %v3165_v15, %v7816_v58 }
 0x72a   : > { %v2974_v40 = vpop.f32.mrf.mxu0  ;;  %v3167_v53 = vpop.f32.mrf.mxu1  ;;  %v3308_v48 = vmax.f32 %v2971_v14, 0.0  ;;  %v3310_v19 = vmax.f32 %v3164_v47, 0.0 }
 0x72b   : > { %v2975_v61 = vadd.f32 %v2974_v40, %v7810_v18  ;;  %v3168_v30 = vadd.f32 %v3167_v53, %v7819_v37  ;;  %3722 = vmatprep.mubr.bf16.mxu0 %v3405_v56  ;;  %3883 = vmatprep.mubr.bf16.mxu1 %v3407_v54  ;;  %v3309_v10 = vmax.f32 %v2973_v4, 0.0  ;;  %v3311_v21 = vmax.f32 %v3166_v17, 0.0 }
 0x72c   : > { %v2976_v35 = vpop.f32.mrf.mxu0  ;;  %v3169_v33 = vpop.f32.mrf.mxu1  ;;  %3723 = vmatmul.mubr.bf16.gmra.mxu0 %v3404_v36  ;;  %3884 = vmatmul.mubr.bf16.gmra.mxu1 %v3406_v8 }
 0x72d   : > { %v2977_v25 = vadd.f32 %v2976_v35, %v7812_v55  ;;  %v3170_v42 = vadd.f32 %v3169_v33, %v7816_v58  ;;  %v3312_v3 = vmax.f32 %v2975_v61, 0.0  ;;  %v3314_v6 = vmax.f32 %v3168_v30, 0.0 }
 0x72e   : > { %v2980_v28 = vpop.f32.mrf.mxu0  ;;  %v3173_v1 = vpop.f32.mrf.mxu1 }
 0x72f   : > { %v3313_v50 = vmax.f32 %v2977_v25, 0.0  ;;  %v3315_v32 = vmax.f32 %v3170_v42, 0.0  ;;  %v3408_v22 = vpack.c.bf16 %v3312_v3, %v3308_v48  ;;  %v3410_v45 = vpack.c.bf16 %v3314_v6, %v3310_v19 }
 0x730   : > { %v2982_v62 = vpop.f32.mrf.mxu0  ;;  %v3175_v59 = vpop.f32.mrf.mxu1  ;;  %v2981_v52 = vadd.f32 %v2980_v28, %v7810_v18  ;;  %v3174_v13 = vadd.f32 %v3173_v1, %v7819_v37 }
 0x731   : > { %v3409_v11 = vpack.c.bf16 %v3313_v50, %v3309_v10  ;;  %v3411_v41 = vpack.c.bf16 %v3315_v32, %v3311_v21  ;;  %v2983_v38 = vadd.f32 %v2982_v62, %v7812_v55  ;;  %v3176_v39 = vadd.f32 %v3175_v59, %v7816_v58 }
 0x732   : > { %v2984_v44 = vpop.f32.mrf.mxu0  ;;  %v3177_v57 = vpop.f32.mrf.mxu1  ;;  %v3316_v12 = vmax.f32 %v2981_v52, 0.0  ;;  %v3318_v43 = vmax.f32 %v3174_v13, 0.0 }
 0x733   : > { %v2985_v26 = vadd.f32 %v2984_v44, %v7810_v18  ;;  %v3178_v7 = vadd.f32 %v3177_v57, %v7819_v37  ;;  %3730 = vmatprep.mubr.bf16.mxu0 %v3409_v11  ;;  %3891 = vmatprep.mubr.bf16.mxu1 %v3411_v41  ;;  %v3317_v16 = vmax.f32 %v2983_v38, 0.0  ;;  %v3319_v2 = vmax.f32 %v3176_v39, 0.0 }
 0x734   : > { %v2986_v24 = vpop.f32.mrf.mxu0  ;;  %v3179_v46 = vpop.f32.mrf.mxu1  ;;  %3731 = vmatmul.mubr.bf16.gmra.mxu0 %v3408_v22  ;;  %3892 = vmatmul.mubr.bf16.gmra.mxu1 %v3410_v45 }
 0x735   : > { %v2987_v34 = vadd.f32 %v2986_v24, %v7812_v55  ;;  %v3180_v27 = vadd.f32 %v3179_v46, %v7816_v58  ;;  %v3320_v20 = vmax.f32 %v2985_v26, 0.0  ;;  %v3322_v5 = vmax.f32 %v3178_v7, 0.0 }
 0x736   : > { %v2990_v63 = vpop.f32.mrf.mxu0  ;;  %v3183_v9 = vpop.f32.mrf.mxu1 }
 0x737   : > { %v3321_v23 = vmax.f32 %v2987_v34, 0.0  ;;  %v3323_v49 = vmax.f32 %v3180_v27, 0.0  ;;  %v3412_v60 = vpack.c.bf16 %v3320_v20, %v3316_v12  ;;  %v3414_v15 = vpack.c.bf16 %v3322_v5, %v3318_v43 }
 0x738   : > { %v2992_v31 = vpop.f32.mrf.mxu0  ;;  %v3185_v0 = vpop.f32.mrf.mxu1  ;;  %v2991_v53 = vadd.f32 %v2990_v63, %v7810_v18  ;;  %v3184_v17 = vadd.f32 %v3183_v9, %v7819_v37 }
 0x739   : > { %v3413_v29 = vpack.c.bf16 %v3321_v23, %v3317_v16  ;;  %v3415_v51 = vpack.c.bf16 %v3323_v49, %v3319_v2  ;;  %v2993_v56 = vadd.f32 %v2992_v31, %v7812_v55  ;;  %v3186_v8 = vadd.f32 %v3185_v0, %v7816_v58 }
 0x73a   : > { %v2994_v54 = vpop.f32.mrf.mxu0  ;;  %v3187_v36 = vpop.f32.mrf.mxu1  ;;  %v3324_v10 = vmax.f32 %v2991_v53, 0.0  ;;  %v3326_v21 = vmax.f32 %v3184_v17, 0.0 }
 0x73b   : > { %v2995_v4 = vadd.f32 %v2994_v54, %v7810_v18  ;;  %v3188_v40 = vadd.f32 %v3187_v36, %v7819_v37  ;;  %3738 = vmatprep.mubr.bf16.mxu0 %v3413_v29  ;;  %3899 = vmatprep.mubr.bf16.mxu1 %v3415_v51  ;;  %v3325_v3 = vmax.f32 %v2993_v56, 0.0  ;;  %v3327_v6 = vmax.f32 %v3186_v8, 0.0 }
 0x73c   : > { %v2996_v61 = vpop.f32.mrf.mxu0  ;;  %v3189_v30 = vpop.f32.mrf.mxu1  ;;  %3739 = vmatmul.mubr.bf16.gmra.mxu0 %v3412_v60  ;;  %3900 = vmatmul.mubr.bf16.gmra.mxu1 %v3414_v15 }
 0x73d   : > { %v2997_v14 = vadd.f32 %v2996_v61, %v7812_v55  ;;  %v3190_v47 = vadd.f32 %v3189_v30, %v7816_v58  ;;  %v3328_v35 = vmax.f32 %v2995_v4, 0.0  ;;  %v3330_v33 = vmax.f32 %v3188_v40, 0.0 }
 0x73e   : > { %v3000_v25 = vpop.f32.mrf.mxu0  ;;  %v3193_v42 = vpop.f32.mrf.mxu1 }
 0x73f   : > { %v3329_v28 = vmax.f32 %v2997_v14, 0.0  ;;  %v3331_v1 = vmax.f32 %v3190_v47, 0.0  ;;  %v3416_v62 = vpack.c.bf16 %v3328_v35, %v3324_v10  ;;  %v3418_v59 = vpack.c.bf16 %v3330_v33, %v3326_v21 }
 0x740   : > { %v3002_v50 = vpop.f32.mrf.mxu0  ;;  %v3195_v32 = vpop.f32.mrf.mxu1  ;;  %v3001_v57 = vadd.f32 %v3000_v25, %v7810_v18  ;;  %v3194_v39 = vadd.f32 %v3193_v42, %v7819_v37 }
 0x741   : > { %v3417_v48 = vpack.c.bf16 %v3329_v28, %v3325_v3  ;;  %v3419_v19 = vpack.c.bf16 %v3331_v1, %v3327_v6  ;;  %v3003_v11 = vadd.f32 %v3002_v50, %v7812_v55  ;;  %v3196_v45 = vadd.f32 %v3195_v32, %v7816_v58 }
 0x742   : > { %v3004_v41 = vpop.f32.mrf.mxu0  ;;  %v3197_v22 = vpop.f32.mrf.mxu1  ;;  %v3332_v16 = vmax.f32 %v3001_v57, 0.0  ;;  %v3334_v2 = vmax.f32 %v3194_v39, 0.0 }
 0x743   : > { %v3005_v38 = vadd.f32 %v3004_v41, %v7810_v18  ;;  %v3198_v44 = vadd.f32 %v3197_v22, %v7819_v37  ;;  %3746 = vmatprep.mubr.bf16.mxu0 %v3417_v48  ;;  %3907 = vmatprep.mubr.bf16.mxu1 %v3419_v19  ;;  %v3333_v20 = vmax.f32 %v3003_v11, 0.0  ;;  %v3335_v5 = vmax.f32 %v3196_v45, 0.0 }
 0x744   : > { %v3006_v26 = vpop.f32.mrf.mxu0  ;;  %v3199_v7 = vpop.f32.mrf.mxu1  ;;  %3747 = vmatmul.mubr.bf16.gmra.mxu0 %v3416_v62  ;;  %3908 = vmatmul.mubr.bf16.gmra.mxu1 %v3418_v59 }
 0x745   : > { %v3007_v52 = vadd.f32 %v3006_v26, %v7812_v55  ;;  %v3200_v13 = vadd.f32 %v3199_v7, %v7816_v58  ;;  %v3336_v24 = vmax.f32 %v3005_v38, 0.0  ;;  %v3338_v46 = vmax.f32 %v3198_v44, 0.0 }
 0x746   : > { %v3010_v34 = vpop.f32.mrf.mxu0  ;;  %v3203_v27 = vpop.f32.mrf.mxu1 }
 0x747   : > { %v3337_v63 = vmax.f32 %v3007_v52, 0.0  ;;  %v3339_v9 = vmax.f32 %v3200_v13, 0.0  ;;  %v3420_v31 = vpack.c.bf16 %v3336_v24, %v3332_v16  ;;  %v3422_v0 = vpack.c.bf16 %v3338_v46, %v3334_v2 }
 0x748   : > { %v3012_v23 = vpop.f32.mrf.mxu0  ;;  %v3205_v49 = vpop.f32.mrf.mxu1  ;;  %v3011_v36 = vadd.f32 %v3010_v34, %v7810_v18  ;;  %v3204_v8 = vadd.f32 %v3203_v27, %v7819_v37 }
 0x749   : > { %v3421_v12 = vpack.c.bf16 %v3337_v63, %v3333_v20  ;;  %v3423_v43 = vpack.c.bf16 %v3339_v9, %v3335_v5  ;;  %v3013_v29 = vadd.f32 %v3012_v23, %v7812_v55  ;;  %v3206_v15 = vadd.f32 %v3205_v49, %v7816_v58 }
 0x74a   : > { %v3014_v51 = vpop.f32.mrf.mxu0  ;;  %v3207_v60 = vpop.f32.mrf.mxu1  ;;  %v3340_v3 = vmax.f32 %v3011_v36, 0.0  ;;  %v3342_v6 = vmax.f32 %v3204_v8, 0.0 }
 0x74b   : > { %v3015_v56 = vadd.f32 %v3014_v51, %v7810_v18  ;;  %v3208_v54 = vadd.f32 %v3207_v60, %v7819_v37  ;;  %3754 = vmatprep.mubr.bf16.mxu0 %v3421_v12  ;;  %3915 = vmatprep.mubr.bf16.mxu1 %v3423_v43  ;;  %v3341_v35 = vmax.f32 %v3013_v29, 0.0  ;;  %v3343_v33 = vmax.f32 %v3206_v15, 0.0 }
 0x74c   : > { %v3016_v4 = vpop.f32.mrf.mxu0  ;;  %v3209_v40 = vpop.f32.mrf.mxu1  ;;  %3755 = vmatmul.mubr.bf16.gmra.mxu0 %v3420_v31  ;;  %3916 = vmatmul.mubr.bf16.gmra.mxu1 %v3422_v0 }
 0x74d   : > { %v3017_v53 = vadd.f32 %v3016_v4, %v7812_v55  ;;  %v3210_v17 = vadd.f32 %v3209_v40, %v7816_v58  ;;  %v3344_v61 = vmax.f32 %v3015_v56, 0.0  ;;  %v3346_v30 = vmax.f32 %v3208_v54, 0.0 }
 0x74e   : > { %v3020_v14 = vpop.f32.mrf.mxu0  ;;  %v3213_v47 = vpop.f32.mrf.mxu1 }
 0x74f   : > { %v3345_v25 = vmax.f32 %v3017_v53, 0.0  ;;  %v3347_v42 = vmax.f32 %v3210_v17, 0.0  ;;  %v3424_v50 = vpack.c.bf16 %v3344_v61, %v3340_v3  ;;  %v3426_v32 = vpack.c.bf16 %v3346_v30, %v3342_v6 }
 0x750   : > { %v3022_v28 = vpop.f32.mrf.mxu0  ;;  %v3215_v1 = vpop.f32.mrf.mxu1  ;;  %v3021_v22 = vadd.f32 %v3020_v14, %v7810_v18  ;;  %v3214_v45 = vadd.f32 %v3213_v47, %v7819_v37 }
 0x751   : > { %v3425_v10 = vpack.c.bf16 %v3345_v25, %v3341_v35  ;;  %v3427_v21 = vpack.c.bf16 %v3347_v42, %v3343_v33  ;;  %v3023_v48 = vadd.f32 %v3022_v28, %v7812_v55  ;;  %v3216_v59 = vadd.f32 %v3215_v1, %v7816_v58 }
 0x752   : > { %v3024_v19 = vpop.f32.mrf.mxu0  ;;  %v3217_v62 = vpop.f32.mrf.mxu1  ;;  %v3348_v20 = vmax.f32 %v3021_v22, 0.0  ;;  %v3350_v5 = vmax.f32 %v3214_v45, 0.0 }
 0x753   : > { %v3025_v11 = vadd.f32 %v3024_v19, %v7810_v18  ;;  %v3218_v41 = vadd.f32 %v3217_v62, %v7819_v37  ;;  %3762 = vmatprep.mubr.bf16.mxu0 %v3425_v10  ;;  %3923 = vmatprep.mubr.bf16.mxu1 %v3427_v21  ;;  %v3349_v24 = vmax.f32 %v3023_v48, 0.0  ;;  %v3351_v46 = vmax.f32 %v3216_v59, 0.0 }
 0x754   : > { %v3026_v38 = vpop.f32.mrf.mxu0  ;;  %v3219_v44 = vpop.f32.mrf.mxu1  ;;  %3763 = vmatmul.mubr.bf16.gmra.mxu0 %v3424_v50  ;;  %3924 = vmatmul.mubr.bf16.gmra.mxu1 %v3426_v32 }
 0x755   : > { %v3027_v57 = vadd.f32 %v3026_v38, %v7812_v55  ;;  %v3220_v39 = vadd.f32 %v3219_v44, %v7816_v58  ;;  %v3352_v26 = vmax.f32 %v3025_v11, 0.0  ;;  %v3354_v7 = vmax.f32 %v3218_v41, 0.0 }
 0x756   : > { %v3030_v52 = vpop.f32.mrf.mxu0  ;;  %v3223_v13 = vpop.f32.mrf.mxu1 }
 0x757   : > { %v3353_v34 = vmax.f32 %v3027_v57, 0.0  ;;  %v3355_v27 = vmax.f32 %v3220_v39, 0.0  ;;  %v3428_v23 = vpack.c.bf16 %v3352_v26, %v3348_v20  ;;  %v3430_v49 = vpack.c.bf16 %v3354_v7, %v3350_v5 }
 0x758   : > { %v3032_v63 = vpop.f32.mrf.mxu0  ;;  %v3225_v9 = vpop.f32.mrf.mxu1  ;;  %v3031_v60 = vadd.f32 %v3030_v52, %v7810_v18  ;;  %v3224_v15 = vadd.f32 %v3223_v13, %v7819_v37 }
 0x759   : > { %v3429_v16 = vpack.c.bf16 %v3353_v34, %v3349_v24  ;;  %v3431_v2 = vpack.c.bf16 %v3355_v27, %v3351_v46  ;;  %v3033_v12 = vadd.f32 %v3032_v63, %v7812_v55  ;;  %v3226_v0 = vadd.f32 %v3225_v9, %v7816_v58 }
 0x75a   : > { %v3034_v43 = vpop.f32.mrf.mxu0  ;;  %v3227_v31 = vpop.f32.mrf.mxu1  ;;  %v3356_v35 = vmax.f32 %v3031_v60, 0.0  ;;  %v3358_v33 = vmax.f32 %v3224_v15, 0.0 }
 0x75b   : > { %v3035_v29 = vadd.f32 %v3034_v43, %v7810_v18  ;;  %v3228_v51 = vadd.f32 %v3227_v31, %v7819_v37  ;;  %3770 = vmatprep.mubr.bf16.mxu0 %v3429_v16  ;;  %3931 = vmatprep.mubr.bf16.mxu1 %v3431_v2  ;;  %v3357_v61 = vmax.f32 %v3033_v12, 0.0  ;;  %v3359_v30 = vmax.f32 %v3226_v0, 0.0 }
 0x75c   : > { %v3036_v56 = vpop.f32.mrf.mxu0  ;;  %v3229_v54 = vpop.f32.mrf.mxu1  ;;  %3771 = vmatmul.mubr.bf16.gmra.mxu0 %v3428_v23  ;;  %3932 = vmatmul.mubr.bf16.gmra.mxu1 %v3430_v49 }
 0x75d   : > { %v3037_v36 = vadd.f32 %v3036_v56, %v7812_v55  ;;  %v3230_v8 = vadd.f32 %v3229_v54, %v7816_v58  ;;  %v3360_v4 = vmax.f32 %v3035_v29, 0.0  ;;  %v3362_v40 = vmax.f32 %v3228_v51, 0.0 }
 0x75e   : > { %v3040_v53 = vpop.f32.mrf.mxu0  ;;  %v3233_v17 = vpop.f32.mrf.mxu1 }
 0x75f   : > { %v3361_v14 = vmax.f32 %v3037_v36, 0.0  ;;  %v3363_v47 = vmax.f32 %v3230_v8, 0.0  ;;  %v3432_v28 = vpack.c.bf16 %v3360_v4, %v3356_v35  ;;  %v3434_v1 = vpack.c.bf16 %v3362_v40, %v3358_v33 }
 0x760   : > { %v3042_v25 = vpop.f32.mrf.mxu0  ;;  %v3235_v42 = vpop.f32.mrf.mxu1  ;;  %v3041_v62 = vadd.f32 %v3040_v53, %v7810_v18  ;;  %v3234_v59 = vadd.f32 %v3233_v17, %v7819_v37 }
 0x761   : > { %v3433_v3 = vpack.c.bf16 %v3361_v14, %v3357_v61  ;;  %v3435_v6 = vpack.c.bf16 %v3363_v47, %v3359_v30  ;;  %v3043_v10 = vadd.f32 %v3042_v25, %v7812_v55  ;;  %v3236_v32 = vadd.f32 %v3235_v42, %v7816_v58  ;;  %v4035_v25 = vpop.xlane.xlu0 %4034 }
 0x762   : > { %v3044_v21 = vpop.f32.mrf.mxu0  ;;  %v3237_v50 = vpop.f32.mrf.mxu1  ;;  %v3364_v24 = vmax.f32 %v3041_v62, 0.0  ;;  %v3366_v46 = vmax.f32 %v3234_v59, 0.0 }
 0x763   : > { %v3045_v48 = vadd.f32 %v3044_v21, %v7810_v18  ;;  %v3238_v19 = vadd.f32 %v3237_v50, %v7819_v37  ;;  %3778 = vmatprep.mubr.bf16.mxu0 %v3433_v3  ;;  %3939 = vmatprep.mubr.bf16.mxu1 %v3435_v6  ;;  %v3365_v26 = vmax.f32 %v3043_v10, 0.0  ;;  %v3367_v7 = vmax.f32 %v3236_v32, 0.0  ;;  %v4129_v32 = vld [vmem:[#allocation3 + $0xb0] sm:$0xff] }
 0x764   : > { %v3046_v11 = vpop.f32.mrf.mxu0  ;;  %v3239_v41 = vpop.f32.mrf.mxu1  ;;  %3779 = vmatmul.mubr.bf16.gmra.mxu0 %v3432_v28  ;;  %3940 = vmatmul.mubr.bf16.gmra.mxu1 %v3434_v1 }
 0x765   : > { %v3047_v22 = vadd.f32 %v3046_v11, %v7812_v55  ;;  %v3240_v45 = vadd.f32 %v3239_v41, %v7816_v58  ;;  %v3368_v38 = vmax.f32 %v3045_v48, 0.0  ;;  %v3370_v44 = vmax.f32 %v3238_v19, 0.0  ;;  %v4038_v41 = vpop.xlane.xlu0 %4037 }
 0x766   : > { %v3050_v57 = vpop.f32.mrf.mxu0  ;;  %v3243_v39 = vpop.f32.mrf.mxu1 }
 0x767   : > { %v3369_v52 = vmax.f32 %v3047_v22, 0.0  ;;  %v3371_v13 = vmax.f32 %v3240_v45, 0.0  ;;  %v3436_v63 = vpack.c.bf16 %v3368_v38, %v3364_v24  ;;  %v3438_v9 = vpack.c.bf16 %v3370_v44, %v3366_v46 }
 0x768   : > { %v3052_v34 = vpop.f32.mrf.mxu0  ;;  %v3245_v27 = vpop.f32.mrf.mxu1  ;;  %v3051_v31 = vadd.f32 %v3050_v57, %v7810_v18  ;;  %v3244_v0 = vadd.f32 %v3243_v39, %v7819_v37 }
 0x769   : > { %v3437_v20 = vpack.c.bf16 %v3369_v52, %v3365_v26  ;;  %v3439_v5 = vpack.c.bf16 %v3371_v13, %v3367_v7  ;;  %v3053_v16 = vadd.f32 %v3052_v34, %v7812_v55  ;;  %v3246_v49 = vadd.f32 %v3245_v27, %v7816_v58  ;;  %v4041_v39 = vpop.xlane.xlu1 %4040  ;;  %v4130_v26 = vld [vmem:[#allocation3] sm:$0xff] }
 0x76a   : > { %v3054_v2 = vpop.f32.mrf.mxu0  ;;  %v3247_v23 = vpop.f32.mrf.mxu1  ;;  %v3372_v53 = vmax.f32 %v3051_v31, 0.0  ;;  %v3374_v17 = vmax.f32 %v3244_v0, 0.0 }
 0x76b   : > { %v3055_v12 = vadd.f32 %v3054_v2, %v7810_v18  ;;  %v3248_v43 = vadd.f32 %v3247_v23, %v7819_v37  ;;  %3786 = vmatprep.mubr.bf16.mxu0 %v3437_v20  ;;  %3947 = vmatprep.mubr.bf16.mxu1 %v3439_v5  ;;  %v3373_v36 = vmax.f32 %v3053_v16, 0.0  ;;  %v3375_v8 = vmax.f32 %v3246_v49, 0.0 }
 0x76c   : > { %v3056_v29 = vpop.f32.mrf.mxu0  ;;  %v3249_v51 = vpop.f32.mrf.mxu1  ;;  %3787 = vmatmul.mubr.bf16.gmra.mxu0 %v3436_v63  ;;  %3948 = vmatmul.mubr.bf16.gmra.mxu1 %v3438_v9  ;;  %v4131_v9 = vld [vmem:[#allocation3 + $0xd8] sm:$0xff] }
 0x76d   : > { %v3057_v60 = vadd.f32 %v3056_v29, %v7812_v55  ;;  %v3250_v15 = vadd.f32 %v3249_v51, %v7816_v58  ;;  %v3376_v56 = vmax.f32 %v3055_v12, 0.0  ;;  %v3378_v54 = vmax.f32 %v3248_v43, 0.0  ;;  %v8008_v58 = vld [vmem:[%s393_s17] ss:$0 sm:$0xff]  ;;  %v4044_v43 = vpop.xlane.xlu1 %4043 }
 0x76f   : > { %v3377_v4 = vmax.f32 %v3057_v60, 0.0  ;;  %v3379_v40 = vmax.f32 %v3250_v15, 0.0  ;;  %v3440_v37 = vpack.c.bf16 %v3376_v56, %v3372_v53  ;;  %v3442_v30 = vpack.c.bf16 %v3378_v54, %v3374_v17  ;;  %v4132_v15 = vld [vmem:[#allocation3 + $0x18] sm:$0xff] }
 0x771   : > { %v3441_v18 = vpack.c.bf16 %v3377_v4, %v3373_v36  ;;  %v3443_v61 = vpack.c.bf16 %v3379_v40, %v3375_v8  ;;  %v4047_v40 = vpop.xlane.xlu0 %4046 }
 0x773   : > { %3794 = vmatprep.mubr.bf16.mxu0 %v3441_v18  ;;  %3955 = vmatprep.mubr.bf16.mxu1 %v3443_v61 }
 0x774   : > { %3795 = vmatmul.mubr.bf16.gmra.mxu0 %v3440_v37  ;;  %3956 = vmatmul.mubr.bf16.gmra.mxu1 %v3442_v30  ;;  %v4133_v30 = vld [vmem:[#allocation3 + $0x50] sm:$0xff] }
 0x7bc   : > { %v4606_v55 = vpop.f32.mrf.mxu0  ;;  %v4718_v14 = vpop.f32.mrf.mxu1 }
 0x7be   : > { %v4607_v47 = vpop.f32.mrf.mxu0  ;;  %v4719_v35 = vpop.f32.mrf.mxu1 }
 0x7bf   : > { %v4608_v33 = vadd.f32 %v4607_v47, %v4606_v55  ;;  %v4720_v28 = vadd.f32 %v4719_v35, %v4718_v14 }
 0x7c0   : > { %v4609_v42 = vpop.f32.mrf.mxu0  ;;  %v4721_v3 = vpop.f32.mrf.mxu1 }
 0x7c1   : > { %v3677_v6 = vadd.f32 %v4608_v33, %v8008_v58 }
 0x7c2   : > { %v4610_v1 = vpop.f32.mrf.mxu0  ;;  %v4722_v10 = vpop.f32.mrf.mxu1 }
 0x7c3   : > { %v4611_v21 = vadd.f32 %v4610_v1, %v4609_v42  ;;  %v3838_v50 = vadd.f32 %v4720_v28, %v3677_v6  ;;  %v4723_v59 = vadd.f32 %v4722_v10, %v4721_v3  ;;  %v4134_v10 = vld [vmem:[#allocation3 + $0x68] sm:$0xff] }
 0x7c4   : > { %v4612_v48 = vpop.f32.mrf.mxu0  ;;  %v4724_v19 = vpop.f32.mrf.mxu1 }
 0x7c5   : > { %v3680_v62 = vadd.f32 %v4611_v21, %v8008_v58  ;;  %v4161_v11 = vmul.f32 %v4035_v25, %v3838_v50  ;;  %v4050_v25 = vpop.xlane.xlu1 %4049 }
 0x7c6   : > { %v4613_v22 = vpop.f32.mrf.mxu0  ;;  %v4725_v45 = vpop.f32.mrf.mxu1 }
 0x7c7   : > { %v4193_v38 = vadd.f32 %v4161_v11, %v4129_v32  ;;  %v4614_v44 = vadd.f32 %v4613_v22, %v4612_v48  ;;  %v3841_v57 = vadd.f32 %v4723_v59, %v3680_v62  ;;  %v4726_v24 = vadd.f32 %v4725_v45, %v4724_v19  ;;  %v4053_v62 = vpop.xlane.xlu0 %4052 }
 0x7c8   : > { %v4615_v7 = vpop.f32.mrf.mxu0  ;;  %v4727_v52 = vpop.f32.mrf.mxu1 }
 0x7c9   : > { %4225 = vst [vmem:[#allocation3 + $0xb0] sm:$0xff] %v4193_v38  ;;  %v3685_v13 = vadd.f32 %v4614_v44, %v8008_v58  ;;  %v4162_v46 = vmul.f32 %v4038_v41, %v3841_v57  ;;  %v4135_v38 = vld [vmem:[#allocation3 + $0x30] sm:$0xff] }
 0x7ca   : > { %v4616_v34 = vpop.f32.mrf.mxu0  ;;  %v4728_v27 = vpop.f32.mrf.mxu1 }
 0x7cb   : > { %v4194_v20 = vadd.f32 %v4162_v46, %v4130_v26  ;;  %v4617_v5 = vadd.f32 %v4616_v34, %v4615_v7  ;;  %v3846_v63 = vadd.f32 %v4726_v24, %v3685_v13  ;;  %v4729_v49 = vadd.f32 %v4728_v27, %v4727_v52  ;;  %v4056_v52 = vpop.xlane.xlu1 %4055 }
 0x7cc   : > { %v4618_v16 = vpop.f32.mrf.mxu0  ;;  %v4730_v2 = vpop.f32.mrf.mxu1 }
 0x7cd   : > { %4226 = vst [vmem:[#allocation3] sm:$0xff] %v4194_v20  ;;  %v3688_v23 = vadd.f32 %v4617_v5, %v8008_v58  ;;  %v4163_v12 = vmul.f32 %v4041_v39, %v3846_v63  ;;  %v4136_v20 = vld [vmem:[#allocation3 + $0x48] sm:$0xff] }
 0x7ce   : > { %v4619_v31 = vpop.f32.mrf.mxu0  ;;  %v4731_v0 = vpop.f32.mrf.mxu1 }
 0x7cf   : > { %v4195_v29 = vadd.f32 %v4163_v12, %v4131_v9  ;;  %v4620_v51 = vadd.f32 %v4619_v31, %v4618_v16  ;;  %v3849_v60 = vadd.f32 %v4729_v49, %v3688_v23  ;;  %v4732_v8 = vadd.f32 %v4731_v0, %v4730_v2  ;;  %v4059_v23 = vpop.xlane.xlu0 %4058 }
 0x7d0   : > { %v4621_v56 = vpop.f32.mrf.mxu0  ;;  %v4733_v54 = vpop.f32.mrf.mxu1 }
 0x7d1   : > { %4227 = vst [vmem:[#allocation3 + $0xd8] sm:$0xff] %v4195_v29  ;;  %v3693_v36 = vadd.f32 %v4620_v51, %v8008_v58  ;;  %v4164_v4 = vmul.f32 %v4044_v43, %v3849_v60  ;;  %v4137_v29 = vld [vmem:[#allocation3 + $0x80] sm:$0xff] }
 0x7d2   : > { %v4622_v53 = vpop.f32.mrf.mxu0  ;;  %v4734_v17 = vpop.f32.mrf.mxu1 }
 0x7d3   : > { %v4196_v18 = vadd.f32 %v4164_v4, %v4132_v15  ;;  %v4623_v61 = vadd.f32 %v4622_v53, %v4621_v56  ;;  %v3854_v37 = vadd.f32 %v4732_v8, %v3693_v36  ;;  %v4735_v35 = vadd.f32 %v4734_v17, %v4733_v54  ;;  %v4062_v36 = vpop.xlane.xlu1 %4061 }
 0x7d4   : > { %v4624_v55 = vpop.f32.mrf.mxu0  ;;  %v4736_v14 = vpop.f32.mrf.mxu1 }
 0x7d5   : > { %4228 = vst [vmem:[#allocation3 + $0x18] sm:$0xff] %v4196_v18  ;;  %v3696_v47 = vadd.f32 %v4623_v61, %v8008_v58  ;;  %v4165_v33 = vmul.f32 %v4047_v40, %v3854_v37  ;;  %v4138_v18 = vld [vmem:[#allocation3 + $0x88] sm:$0xff] }
 0x7d6   : > { %v4625_v42 = vpop.f32.mrf.mxu0  ;;  %v4737_v3 = vpop.f32.mrf.mxu1 }
 0x7d7   : > { %v4197_v6 = vadd.f32 %v4165_v33, %v4133_v30  ;;  %v4626_v28 = vadd.f32 %v4625_v42, %v4624_v55  ;;  %v3857_v1 = vadd.f32 %v4735_v35, %v3696_v47  ;;  %v4738_v48 = vadd.f32 %v4737_v3, %v4736_v14  ;;  %v4065_v47 = vpop.xlane.xlu0 %4064 }
 0x7d8   : > { %v4627_v21 = vpop.f32.mrf.mxu0  ;;  %v4739_v50 = vpop.f32.mrf.mxu1 }
 0x7d9   : > { %4229 = vst [vmem:[#allocation3 + $0x50] sm:$0xff] %v4197_v6  ;;  %v3701_v32 = vadd.f32 %v4626_v28, %v8008_v58  ;;  %v4166_v19 = vmul.f32 %v4050_v25, %v3857_v1  ;;  %v4139_v6 = vld [vmem:[#allocation3 + $0xe8] sm:$0xff] }
 0x7da   : > { %v4628_v59 = vpop.f32.mrf.mxu0  ;;  %v4740_v11 = vpop.f32.mrf.mxu1 }
 0x7db   : > { %v4198_v41 = vadd.f32 %v4166_v19, %v4134_v10  ;;  %v4629_v22 = vadd.f32 %v4628_v59, %v4627_v21  ;;  %v3862_v45 = vadd.f32 %v4738_v48, %v3701_v32  ;;  %v4741_v26 = vadd.f32 %v4740_v11, %v4739_v50  ;;  %v4068_v32 = vpop.xlane.xlu1 %4067 }
 0x7dc   : > { %v4630_v44 = vpop.f32.mrf.mxu0  ;;  %v4742_v57 = vpop.f32.mrf.mxu1 }
 0x7dd   : > { %4230 = vst [vmem:[#allocation3 + $0x68] sm:$0xff] %v4198_v41  ;;  %v3704_v39 = vadd.f32 %v4629_v22, %v8008_v58  ;;  %v4167_v7 = vmul.f32 %v4053_v62, %v3862_v45  ;;  %v4140_v41 = vld [vmem:[#allocation3 + $0xb8] sm:$0xff] }
 0x7de   : > { %v4631_v13 = vpop.f32.mrf.mxu0  ;;  %v4743_v24 = vpop.f32.mrf.mxu1 }
 0x7df   : > { %v4199_v46 = vadd.f32 %v4167_v7, %v4135_v38  ;;  %v4632_v34 = vadd.f32 %v4631_v13, %v4630_v44  ;;  %v3865_v27 = vadd.f32 %v4741_v26, %v3704_v39  ;;  %v4744_v16 = vadd.f32 %v4743_v24, %v4742_v57  ;;  %v4071_v39 = vpop.xlane.xlu0 %4070 }
 0x7e0   : > { %v4633_v5 = vpop.f32.mrf.mxu0  ;;  %v4745_v63 = vpop.f32.mrf.mxu1 }
 0x7e1   : > { %4231 = vst [vmem:[#allocation3 + $0x30] sm:$0xff] %v4199_v46  ;;  %v3709_v9 = vadd.f32 %v4632_v34, %v8008_v58  ;;  %v4168_v2 = vmul.f32 %v4056_v52, %v3865_v27  ;;  %v4141_v46 = vld [vmem:[#allocation3 + $0x60] sm:$0xff] }
 0x7e2   : > { %v4634_v49 = vpop.f32.mrf.mxu0  ;;  %v4746_v12 = vpop.f32.mrf.mxu1 }
 0x7e3   : > { %v4200_v43 = vadd.f32 %v4168_v2, %v4136_v20  ;;  %v4635_v31 = vadd.f32 %v4634_v49, %v4633_v5  ;;  %v3870_v0 = vadd.f32 %v4744_v16, %v3709_v9  ;;  %v4747_v56 = vadd.f32 %v4746_v12, %v4745_v63  ;;  %v4074_v9 = vpop.xlane.xlu1 %4073 }
 0x7e4   : > { %v4636_v51 = vpop.f32.mrf.mxu0  ;;  %v4748_v60 = vpop.f32.mrf.mxu1 }
 0x7e5   : > { %4232 = vst [vmem:[#allocation3 + $0x48] sm:$0xff] %v4200_v43  ;;  %v3712_v15 = vadd.f32 %v4635_v31, %v8008_v58  ;;  %v4169_v54 = vmul.f32 %v4059_v23, %v3870_v0  ;;  %v4142_v43 = vld [vmem:[#allocation3 + $0xf0] sm:$0xff] }
 0x7e6   : > { %v4637_v8 = vpop.f32.mrf.mxu0  ;;  %v4749_v4 = vpop.f32.mrf.mxu1 }
 0x7e7   : > { %v4201_v40 = vadd.f32 %v4169_v54, %v4137_v29  ;;  %v4638_v53 = vadd.f32 %v4637_v8, %v4636_v51  ;;  %v3873_v17 = vadd.f32 %v4747_v56, %v3712_v15  ;;  %v4750_v55 = vadd.f32 %v4749_v4, %v4748_v60  ;;  %v4077_v15 = vpop.xlane.xlu0 %4076 }
 0x7e8   : > { %v4639_v61 = vpop.f32.mrf.mxu0  ;;  %v4751_v37 = vpop.f32.mrf.mxu1 }
 0x7e9   : > { %4233 = vst [vmem:[#allocation3 + $0x80] sm:$0xff] %v4201_v40  ;;  %v3717_v30 = vadd.f32 %v4638_v53, %v8008_v58  ;;  %v4170_v14 = vmul.f32 %v4062_v36, %v3873_v17  ;;  %v4143_v40 = vld [vmem:[#allocation3 + $0x8] sm:$0xff] }
 0x7ea   : > { %v4640_v35 = vpop.f32.mrf.mxu0  ;;  %v4752_v33 = vpop.f32.mrf.mxu1 }
 0x7eb   : > { %v4202_v25 = vadd.f32 %v4170_v14, %v4138_v18  ;;  %v4641_v42 = vadd.f32 %v4640_v35, %v4639_v61  ;;  %v3878_v3 = vadd.f32 %v4750_v55, %v3717_v30  ;;  %v4753_v21 = vadd.f32 %v4752_v33, %v4751_v37  ;;  %v4080_v30 = vpop.xlane.xlu1 %4079 }
 0x7ec   : > { %v4642_v28 = vpop.f32.mrf.mxu0  ;;  %v4754_v1 = vpop.f32.mrf.mxu1 }
 0x7ed   : > { %4234 = vst [vmem:[#allocation3 + $0x88] sm:$0xff] %v4202_v25  ;;  %v3720_v10 = vadd.f32 %v4641_v42, %v8008_v58  ;;  %v4171_v50 = vmul.f32 %v4065_v47, %v3878_v3  ;;  %v4144_v25 = vld [vmem:[#allocation3 + $0x78] sm:$0xff] }
 0x7ee   : > { %v4643_v48 = vpop.f32.mrf.mxu0  ;;  %v4755_v19 = vpop.f32.mrf.mxu1 }
 0x7ef   : > { %v4203_v62 = vadd.f32 %v4171_v50, %v4139_v6  ;;  %v4644_v59 = vadd.f32 %v4643_v48, %v4642_v28  ;;  %v3881_v11 = vadd.f32 %v4753_v21, %v3720_v10  ;;  %v4756_v44 = vadd.f32 %v4755_v19, %v4754_v1  ;;  %v4083_v10 = vpop.xlane.xlu0 %4082 }
 0x7f0   : > { %v4645_v22 = vpop.f32.mrf.mxu0  ;;  %v4757_v45 = vpop.f32.mrf.mxu1 }
 0x7f1   : > { %4235 = vst [vmem:[#allocation3 + $0xe8] sm:$0xff] %v4203_v62  ;;  %v3725_v38 = vadd.f32 %v4644_v59, %v8008_v58  ;;  %v4172_v57 = vmul.f32 %v4068_v32, %v3881_v11  ;;  %v4145_v62 = vld [vmem:[#allocation3 + $0x38] sm:$0xff] }
 0x7f2   : > { %v4646_v26 = vpop.f32.mrf.mxu0  ;;  %v4758_v7 = vpop.f32.mrf.mxu1 }
 0x7f3   : > { %v4204_v52 = vadd.f32 %v4172_v57, %v4140_v41  ;;  %v4647_v13 = vadd.f32 %v4646_v26, %v4645_v22  ;;  %v3886_v24 = vadd.f32 %v4756_v44, %v3725_v38  ;;  %v4759_v5 = vadd.f32 %v4758_v7, %v4757_v45  ;;  %v4086_v38 = vpop.xlane.xlu1 %4085 }
 0x7f4   : > { %v4648_v34 = vpop.f32.mrf.mxu0  ;;  %v4760_v27 = vpop.f32.mrf.mxu1 }
 0x7f5   : > { %4236 = vst [vmem:[#allocation3 + $0xb8] sm:$0xff] %v4204_v52  ;;  %v3728_v20 = vadd.f32 %v4647_v13, %v8008_v58  ;;  %v4173_v63 = vmul.f32 %v4071_v39, %v3886_v24  ;;  %v4146_v52 = vld [vmem:[#allocation3 + $0x58] sm:$0xff] }
 0x7f6   : > { %v4649_v16 = vpop.f32.mrf.mxu0  ;;  %v4761_v2 = vpop.f32.mrf.mxu1 }
 0x7f7   : > { %v4205_v23 = vadd.f32 %v4173_v63, %v4141_v46  ;;  %v4650_v49 = vadd.f32 %v4649_v16, %v4648_v34  ;;  %v3889_v12 = vadd.f32 %v4759_v5, %v3728_v20  ;;  %v4762_v51 = vadd.f32 %v4761_v2, %v4760_v27  ;;  %v4089_v20 = vpop.xlane.xlu0 %4088 }
 0x7f8   : > { %v4651_v31 = vpop.f32.mrf.mxu0  ;;  %v4763_v0 = vpop.f32.mrf.mxu1 }
 0x7f9   : > { %4237 = vst [vmem:[#allocation3 + $0x60] sm:$0xff] %v4205_v23  ;;  %v3733_v29 = vadd.f32 %v4650_v49, %v8008_v58  ;;  %v4174_v60 = vmul.f32 %v4074_v9, %v3889_v12  ;;  %v4147_v23 = vld [vmem:[#allocation3 + $0x40] sm:$0xff] }
 0x7fa   : > { %v4652_v56 = vpop.f32.mrf.mxu0  ;;  %v4764_v54 = vpop.f32.mrf.mxu1 }
 0x7fb   : > { %v4206_v36 = vadd.f32 %v4174_v60, %v4142_v43  ;;  %v4653_v8 = vadd.f32 %v4652_v56, %v4651_v31  ;;  %v3894_v4 = vadd.f32 %v4762_v51, %v3733_v29  ;;  %v4765_v61 = vadd.f32 %v4764_v54, %v4763_v0  ;;  %v4092_v29 = vpop.xlane.xlu1 %4091 }
 0x7fc   : > { %v4654_v53 = vpop.f32.mrf.mxu0  ;;  %v4766_v17 = vpop.f32.mrf.mxu1 }
 0x7fd   : > { %4238 = vst [vmem:[#allocation3 + $0xf0] sm:$0xff] %v4206_v36  ;;  %v3736_v18 = vadd.f32 %v4653_v8, %v8008_v58  ;;  %v4175_v37 = vmul.f32 %v4077_v15, %v3894_v4  ;;  %v4148_v36 = vld [vmem:[#allocation3 + $0xc8] sm:$0xff] }
 0x7fe   : > { %v4655_v55 = vpop.f32.mrf.mxu0  ;;  %v4767_v14 = vpop.f32.mrf.mxu1 }
 0x7ff   : > { %v4207_v47 = vadd.f32 %v4175_v37, %v4143_v40  ;;  %v4656_v35 = vadd.f32 %v4655_v55, %v4654_v53  ;;  %v3897_v33 = vadd.f32 %v4765_v61, %v3736_v18  ;;  %v4768_v28 = vadd.f32 %v4767_v14, %v4766_v17  ;;  %v4095_v18 = vpop.xlane.xlu0 %4094 }
 0x800   : > { %v4657_v42 = vpop.f32.mrf.mxu0  ;;  %v4769_v3 = vpop.f32.mrf.mxu1 }
 0x801   : > { %4239 = vst [vmem:[#allocation3 + $0x8] sm:$0xff] %v4207_v47  ;;  %v3741_v6 = vadd.f32 %v4656_v35, %v8008_v58  ;;  %v4176_v1 = vmul.f32 %v4080_v30, %v3897_v33  ;;  %v4149_v47 = vld [vmem:[#allocation3 + $0xe0] sm:$0xff] }
 0x802   : > { %v4658_v21 = vpop.f32.mrf.mxu0  ;;  %v4770_v50 = vpop.f32.mrf.mxu1 }
 0x803   : > { %v4208_v32 = vadd.f32 %v4176_v1, %v4144_v25  ;;  %v4659_v48 = vadd.f32 %v4658_v21, %v4657_v42  ;;  %v3902_v19 = vadd.f32 %v4768_v28, %v3741_v6  ;;  %v4771_v22 = vadd.f32 %v4770_v50, %v4769_v3  ;;  %v4098_v6 = vpop.xlane.xlu1 %4097 }
 0x804   : > { %v4660_v59 = vpop.f32.mrf.mxu0  ;;  %v4772_v11 = vpop.f32.mrf.mxu1 }
 0x805   : > { %4240 = vst [vmem:[#allocation3 + $0x78] sm:$0xff] %v4208_v32  ;;  %v3744_v41 = vadd.f32 %v4659_v48, %v8008_v58  ;;  %v4177_v45 = vmul.f32 %v4083_v10, %v3902_v19  ;;  %v4150_v32 = vld [vmem:[#allocation3 + $0x90] sm:$0xff] }
 0x806   : > { %v4661_v44 = vpop.f32.mrf.mxu0  ;;  %v4773_v57 = vpop.f32.mrf.mxu1 }
 0x807   : > { %v4209_v39 = vadd.f32 %v4177_v45, %v4145_v62  ;;  %v4662_v26 = vadd.f32 %v4661_v44, %v4660_v59  ;;  %v3905_v7 = vadd.f32 %v4771_v22, %v3744_v41  ;;  %v4774_v34 = vadd.f32 %v4773_v57, %v4772_v11  ;;  %v4101_v41 = vpop.xlane.xlu0 %4100 }
 0x808   : > { %v4663_v13 = vpop.f32.mrf.mxu0  ;;  %v4775_v24 = vpop.f32.mrf.mxu1 }
 0x809   : > { %4241 = vst [vmem:[#allocation3 + $0x38] sm:$0xff] %v4209_v39  ;;  %v3749_v46 = vadd.f32 %v4662_v26, %v8008_v58  ;;  %v4178_v27 = vmul.f32 %v4086_v38, %v3905_v7  ;;  %v4151_v39 = vld [vmem:[#allocation3 + $0x70] sm:$0xff] }
 0x80a   : > { %v4664_v5 = vpop.f32.mrf.mxu0  ;;  %v4776_v63 = vpop.f32.mrf.mxu1 }
 0x80b   : > { %v4210_v9 = vadd.f32 %v4178_v27, %v4146_v52  ;;  %v4665_v16 = vadd.f32 %v4664_v5, %v4663_v13  ;;  %v3910_v2 = vadd.f32 %v4774_v34, %v3749_v46  ;;  %v4777_v31 = vadd.f32 %v4776_v63, %v4775_v24  ;;  %v4104_v46 = vpop.xlane.xlu1 %4103 }
 0x80c   : > { %v4666_v49 = vpop.f32.mrf.mxu0  ;;  %v4778_v12 = vpop.f32.mrf.mxu1 }
 0x80d   : > { %4242 = vst [vmem:[#allocation3 + $0x58] sm:$0xff] %v4210_v9  ;;  %v3752_v43 = vadd.f32 %v4665_v16, %v8008_v58  ;;  %v4179_v0 = vmul.f32 %v4089_v20, %v3910_v2  ;;  %v4152_v9 = vld [vmem:[#allocation3 + $0xc0] sm:$0xff] }
 0x80e   : > { %v4667_v51 = vpop.f32.mrf.mxu0  ;;  %v4779_v60 = vpop.f32.mrf.mxu1 }
 0x80f   : > { %v4211_v15 = vadd.f32 %v4179_v0, %v4147_v23  ;;  %v4668_v56 = vadd.f32 %v4667_v51, %v4666_v49  ;;  %v3913_v54 = vadd.f32 %v4777_v31, %v3752_v43  ;;  %v4780_v53 = vadd.f32 %v4779_v60, %v4778_v12  ;;  %v4107_v43 = vpop.xlane.xlu0 %4106 }
 0x810   : > { %v4669_v8 = vpop.f32.mrf.mxu0  ;;  %v4781_v4 = vpop.f32.mrf.mxu1 }
 0x811   : > { %4243 = vst [vmem:[#allocation3 + $0x40] sm:$0xff] %v4211_v15  ;;  %v3757_v40 = vadd.f32 %v4668_v56, %v8008_v58  ;;  %v4180_v17 = vmul.f32 %v4092_v29, %v3913_v54  ;;  %v4153_v15 = vld [vmem:[#allocation3 + $0xa8] sm:$0xff] }
 0x812   : > { %v4670_v61 = vpop.f32.mrf.mxu0  ;;  %v4782_v37 = vpop.f32.mrf.mxu1 }
 0x813   : > { %v4212_v30 = vadd.f32 %v4180_v17, %v4148_v36  ;;  %v4671_v55 = vadd.f32 %v4670_v61, %v4669_v8  ;;  %v3918_v14 = vadd.f32 %v4780_v53, %v3757_v40  ;;  %v4783_v42 = vadd.f32 %v4782_v37, %v4781_v4  ;;  %v4110_v40 = vpop.xlane.xlu1 %4109 }
 0x814   : > { %v4672_v35 = vpop.f32.mrf.mxu0  ;;  %v4784_v33 = vpop.f32.mrf.mxu1 }
 0x815   : > { %4244 = vst [vmem:[#allocation3 + $0xc8] sm:$0xff] %v4212_v30  ;;  %v3760_v25 = vadd.f32 %v4671_v55, %v8008_v58  ;;  %v4181_v3 = vmul.f32 %v4095_v18, %v3918_v14  ;;  %v4154_v30 = vld [vmem:[#allocation3 + $0xd0] sm:$0xff] }
 0x816   : > { %v4673_v28 = vpop.f32.mrf.mxu0  ;;  %v4785_v1 = vpop.f32.mrf.mxu1 }
 0x817   : > { %v4213_v10 = vadd.f32 %v4181_v3, %v4149_v47  ;;  %v4674_v21 = vadd.f32 %v4673_v28, %v4672_v35  ;;  %v3921_v50 = vadd.f32 %v4783_v42, %v3760_v25  ;;  %v4786_v59 = vadd.f32 %v4785_v1, %v4784_v33  ;;  %v4113_v25 = vpop.xlane.xlu0 %4112 }
 0x818   : > { %v4675_v48 = vpop.f32.mrf.mxu0  ;;  %v4787_v19 = vpop.f32.mrf.mxu1 }
 0x819   : > { %4245 = vst [vmem:[#allocation3 + $0xe0] sm:$0xff] %v4213_v10  ;;  %v3765_v62 = vadd.f32 %v4674_v21, %v8008_v58  ;;  %v4182_v11 = vmul.f32 %v4098_v6, %v3921_v50  ;;  %v4155_v10 = vld [vmem:[#allocation3 + $0x10] sm:$0xff] }
 0x81a   : > { %v4676_v22 = vpop.f32.mrf.mxu0  ;;  %v4788_v45 = vpop.f32.mrf.mxu1 }
 0x81b   : > { %v4214_v38 = vadd.f32 %v4182_v11, %v4150_v32  ;;  %v4677_v44 = vadd.f32 %v4676_v22, %v4675_v48  ;;  %v3926_v57 = vadd.f32 %v4786_v59, %v3765_v62  ;;  %v4789_v13 = vadd.f32 %v4788_v45, %v4787_v19  ;;  %v4116_v62 = vpop.xlane.xlu1 %4115 }
 0x81c   : > { %v4678_v26 = vpop.f32.mrf.mxu0  ;;  %v4790_v7 = vpop.f32.mrf.mxu1 }
 0x81d   : > { %4246 = vst [vmem:[#allocation3 + $0x90] sm:$0xff] %v4214_v38  ;;  %v3768_v52 = vadd.f32 %v4677_v44, %v8008_v58  ;;  %v4183_v24 = vmul.f32 %v4101_v41, %v3926_v57  ;;  %v4156_v38 = vld [vmem:[#allocation3 + $0x28] sm:$0xff] }
 0x81e   : > { %v4679_v34 = vpop.f32.mrf.mxu0  ;;  %v4791_v27 = vpop.f32.mrf.mxu1 }
 0x81f   : > { %v4215_v20 = vadd.f32 %v4183_v24, %v4151_v39  ;;  %v4680_v5 = vadd.f32 %v4679_v34, %v4678_v26  ;;  %v3929_v63 = vadd.f32 %v4789_v13, %v3768_v52  ;;  %v4792_v49 = vadd.f32 %v4791_v27, %v4790_v7  ;;  %v4119_v52 = vpop.xlane.xlu0 %4118 }
 0x820   : > { %v4681_v16 = vpop.f32.mrf.mxu0  ;;  %v4793_v2 = vpop.f32.mrf.mxu1 }
 0x821   : > { %4247 = vst [vmem:[#allocation3 + $0x70] sm:$0xff] %v4215_v20  ;;  %v3773_v23 = vadd.f32 %v4680_v5, %v8008_v58  ;;  %v4184_v12 = vmul.f32 %v4104_v46, %v3929_v63  ;;  %v4157_v20 = vld [vmem:[#allocation3 + $0xa0] sm:$0xff] }
 0x822   : > { %v4682_v31 = vpop.f32.mrf.mxu0  ;;  %v4794_v0 = vpop.f32.mrf.mxu1 }
 0x823   : > { %v4216_v29 = vadd.f32 %v4184_v12, %v4152_v9  ;;  %v4683_v51 = vadd.f32 %v4682_v31, %v4681_v16  ;;  %v3934_v60 = vadd.f32 %v4792_v49, %v3773_v23  ;;  %v4795_v8 = vadd.f32 %v4794_v0, %v4793_v2  ;;  %v4122_v23 = vpop.xlane.xlu1 %4121 }
 0x824   : > { %v4684_v56 = vpop.f32.mrf.mxu0  ;;  %v4796_v54 = vpop.f32.mrf.mxu1 }
 0x825   : > { %4248 = vst [vmem:[#allocation3 + $0xc0] sm:$0xff] %v4216_v29  ;;  %v3776_v36 = vadd.f32 %v4683_v51, %v8008_v58  ;;  %v4185_v4 = vmul.f32 %v4107_v43, %v3934_v60  ;;  %v4158_v29 = vld [vmem:[#allocation3 + $0xf8] sm:$0xff] }
 0x826   : > { %v4685_v53 = vpop.f32.mrf.mxu0  ;;  %v4797_v17 = vpop.f32.mrf.mxu1 }
 0x827   : > { %v4217_v18 = vadd.f32 %v4185_v4, %v4153_v15  ;;  %v4686_v61 = vadd.f32 %v4685_v53, %v4684_v56  ;;  %v3937_v37 = vadd.f32 %v4795_v8, %v3776_v36  ;;  %v4798_v35 = vadd.f32 %v4797_v17, %v4796_v54  ;;  %v4125_v36 = vpop.xlane.xlu0 %4124 }
 0x828   : > { %v4687_v55 = vpop.f32.mrf.mxu0  ;;  %v4799_v14 = vpop.f32.mrf.mxu1 }
 0x829   : > { %4249 = vst [vmem:[#allocation3 + $0xa8] sm:$0xff] %v4217_v18  ;;  %v3781_v47 = vadd.f32 %v4686_v61, %v8008_v58  ;;  %v4186_v33 = vmul.f32 %v4110_v40, %v3937_v37  ;;  %v4159_v18 = vld [vmem:[#allocation3 + $0x20] sm:$0xff] }
 0x82a   : > { %v4688_v42 = vpop.f32.mrf.mxu0  ;;  %v4800_v3 = vpop.f32.mrf.mxu1 }
 0x82b   : > { %v4218_v6 = vadd.f32 %v4186_v33, %v4154_v30  ;;  %v4689_v28 = vadd.f32 %v4688_v42, %v4687_v55  ;;  %v3942_v1 = vadd.f32 %v4798_v35, %v3781_v47  ;;  %v4801_v48 = vadd.f32 %v4800_v3, %v4799_v14  ;;  %v4128_v55 = vpop.xlane.xlu1 %4127  ;;  %v4160_v35 = vld [vmem:[#allocation3 + $0x98] sm:$0xff] }
 0x82c   : > { %v4690_v21 = vpop.f32.mrf.mxu0  ;;  %v4802_v50 = vpop.f32.mrf.mxu1 }
 0x82d   : > { %4250 = vst [vmem:[#allocation3 + $0xd0] sm:$0xff] %v4218_v6  ;;  %v3784_v32 = vadd.f32 %v4689_v28, %v8008_v58  ;;  %v4187_v19 = vmul.f32 %v4113_v25, %v3942_v1 }
 0x82e   : > { %v4691_v59 = vpop.f32.mrf.mxu0  ;;  %v4803_v11 = vpop.f32.mrf.mxu1 }
 0x82f   : > { %v4219_v41 = vadd.f32 %v4187_v19, %v4155_v10  ;;  %v4692_v22 = vadd.f32 %v4691_v59, %v4690_v21  ;;  %v3945_v45 = vadd.f32 %v4801_v48, %v3784_v32  ;;  %v4804_v26 = vadd.f32 %v4803_v11, %v4802_v50 }
 0x830   : > { %v4693_v44 = vpop.f32.mrf.mxu0  ;;  %v4805_v57 = vpop.f32.mrf.mxu1 }
 0x831   : > { %4251 = vst [vmem:[#allocation3 + $0x10] sm:$0xff] %v4219_v41  ;;  %v3789_v39 = vadd.f32 %v4692_v22, %v8008_v58  ;;  %v4188_v7 = vmul.f32 %v4116_v62, %v3945_v45 }
 0x832   : > { %v4694_v13 = vpop.f32.mrf.mxu0  ;;  %v4806_v24 = vpop.f32.mrf.mxu1 }
 0x833   : > { %v4220_v46 = vadd.f32 %v4188_v7, %v4156_v38  ;;  %v4695_v34 = vadd.f32 %v4694_v13, %v4693_v44  ;;  %v3950_v27 = vadd.f32 %v4804_v26, %v3789_v39  ;;  %v4807_v16 = vadd.f32 %v4806_v24, %v4805_v57 }
 0x834   : > { %v4696_v5 = vpop.f32.mrf.mxu0  ;;  %v4808_v63 = vpop.f32.mrf.mxu1 }
 0x835   : > { %4252 = vst [vmem:[#allocation3 + $0x28] sm:$0xff] %v4220_v46  ;;  %v3792_v9 = vadd.f32 %v4695_v34, %v8008_v58  ;;  %v4189_v2 = vmul.f32 %v4119_v52, %v3950_v27 }
 0x836   : > { %v4697_v49 = vpop.f32.mrf.mxu0  ;;  %v4809_v12 = vpop.f32.mrf.mxu1 }
 0x837   : > { %v4221_v43 = vadd.f32 %v4189_v2, %v4157_v20  ;;  %v4698_v31 = vadd.f32 %v4697_v49, %v4696_v5  ;;  %v3953_v0 = vadd.f32 %v4807_v16, %v3792_v9  ;;  %v4810_v56 = vadd.f32 %v4809_v12, %v4808_v63 }
 0x838   : > { %v4699_v51 = vpop.f32.mrf.mxu0  ;;  %v4811_v60 = vpop.f32.mrf.mxu1 }
 0x839   : > { %4253 = vst [vmem:[#allocation3 + $0xa0] sm:$0xff] %v4221_v43  ;;  %v3797_v15 = vadd.f32 %v4698_v31, %v8008_v58  ;;  %v4190_v54 = vmul.f32 %v4122_v23, %v3953_v0 }
 0x83a   : > { %v4700_v8 = vpop.f32.mrf.mxu0  ;;  %v4812_v4 = vpop.f32.mrf.mxu1 }
 0x83b   : > { %v4222_v40 = vadd.f32 %v4190_v54, %v4158_v29  ;;  %v4701_v53 = vadd.f32 %v4700_v8, %v4699_v51  ;;  %v3958_v17 = vadd.f32 %v4810_v56, %v3797_v15  ;;  %v4813_v37 = vadd.f32 %v4812_v4, %v4811_v60 }
 0x83d   : > { %4254 = vst [vmem:[#allocation3 + $0xf8] sm:$0xff] %v4222_v40  ;;  %v3800_v61 = vadd.f32 %v4701_v53, %v8008_v58  ;;  %v4191_v30 = vmul.f32 %v4125_v36, %v3958_v17 }
 0x83f   : > { %v4223_v14 = vadd.f32 %v4191_v30, %v4159_v18  ;;  %v3961_v47 = vadd.f32 %v4813_v37, %v3800_v61 }
 0x841   : > { %4255 = vst [vmem:[#allocation3 + $0x20] sm:$0xff] %v4223_v14  ;;  %v4192_v33 = vmul.f32 %v4128_v55, %v3961_v47  ;;  %4260 = sbr.rel (%p4535_p5) target bundleno = 2135 (0x857), region = 68 }
 0x843   : > { %v4224_v25 = vadd.f32 %v4192_v33, %v4160_v35 }
 0x845   : > { %4256 = vst [vmem:[#allocation3 + $0x98] sm:$0xff] %v4224_v25 }
 0x846   : > { %v4261_v42 = vld [vmem:[#allocation3 + $0xb0] sm:$0xff]  ;;  %v4262_v3 = vld [vmem:[#allocation3] sm:$0xff]  ;;  %v4263_v6 = vld [vmem:[#allocation3 + $0xd8] sm:$0xff] }
 0x847   : > { %4293 = vst [vmem:[#allocation10] sm:$0xff] %v4261_v42  ;;  %4294 = vst [vmem:[#allocation10 + $0x8] sm:$0xff] %v4262_v3  ;;  %v4264_v58 = vld [vmem:[#allocation3 + $0x18] sm:$0xff]  ;;  %v4265_v28 = vld [vmem:[#allocation3 + $0x50] sm:$0xff] }
 0x848   : > { %4295 = vst [vmem:[#allocation10 + $0x10] sm:$0xff] %v4263_v6  ;;  %v4266_v1 = vld [vmem:[#allocation3 + $0x68] sm:$0xff]  ;;  %4296 = vst [vmem:[#allocation10 + $0x18] sm:$0xff] %v4264_v58  ;;  %v4267_v10 = vld [vmem:[#allocation3 + $0x30] sm:$0xff] }
 0x849   : > { %4297 = vst [vmem:[#allocation10 + $0x20] sm:$0xff] %v4265_v28  ;;  %4298 = vst [vmem:[#allocation10 + $0x28] sm:$0xff] %v4266_v1  ;;  %v4268_v21 = vld [vmem:[#allocation3 + $0x48] sm:$0xff]  ;;  %v4269_v50 = vld [vmem:[#allocation3 + $0x80] sm:$0xff] }
 0x84a   : > { %4299 = vst [vmem:[#allocation10 + $0x30] sm:$0xff] %v4267_v10  ;;  %4300 = vst [vmem:[#allocation10 + $0x38] sm:$0xff] %v4268_v21  ;;  %v4270_v32 = vld [vmem:[#allocation3 + $0x88] sm:$0xff]  ;;  %v4272_v19 = vld [vmem:[#allocation3 + $0xb8] sm:$0xff] }
 0x84b   : > { %4301 = vst [vmem:[#allocation10 + $0x40] sm:$0xff] %v4269_v50  ;;  %v4271_v48 = vld [vmem:[#allocation3 + $0xe8] sm:$0xff]  ;;  %4302 = vst [vmem:[#allocation10 + $0x48] sm:$0xff] %v4270_v32  ;;  %v4273_v62 = vld [vmem:[#allocation3 + $0x60] sm:$0xff] }
 0x84c   : > { %4303 = vst [vmem:[#allocation10 + $0x50] sm:$0xff] %v4271_v48  ;;  %4304 = vst [vmem:[#allocation10 + $0x58] sm:$0xff] %v4272_v19  ;;  %v4274_v59 = vld [vmem:[#allocation3 + $0xf0] sm:$0xff]  ;;  %v4275_v11 = vld [vmem:[#allocation3 + $0x8] sm:$0xff] }
 0x84d   : > { %4305 = vst [vmem:[#allocation10 + $0x60] sm:$0xff] %v4273_v62  ;;  %4306 = vst [vmem:[#allocation10 + $0x68] sm:$0xff] %v4274_v59  ;;  %v4276_v41 = vld [vmem:[#allocation3 + $0x78] sm:$0xff]  ;;  %v4279_v38 = vld [vmem:[#allocation3 + $0x40] sm:$0xff] }
 0x84e   : > { %4307 = vst [vmem:[#allocation10 + $0x70] sm:$0xff] %v4275_v11  ;;  %v4277_v22 = vld [vmem:[#allocation3 + $0x38] sm:$0xff]  ;;  %4308 = vst [vmem:[#allocation10 + $0x78] sm:$0xff] %v4276_v41  ;;  %v4280_v44 = vld [vmem:[#allocation3 + $0xc8] sm:$0xff] }
 0x84f   : > { %v4278_v45 = vld [vmem:[#allocation3 + $0x58] sm:$0xff]  ;;  %4309 = vst [vmem:[#allocation10 + $0x80] sm:$0xff] %v4277_v22  ;;  %v4281_v57 = vld [vmem:[#allocation3 + $0xe0] sm:$0xff]  ;;  %4311 = vst [vmem:[#allocation10 + $0x90] sm:$0xff] %v4279_v38 }
 0x850   : > { %4310 = vst [vmem:[#allocation10 + $0x88] sm:$0xff] %v4278_v45  ;;  %4312 = vst [vmem:[#allocation10 + $0x98] sm:$0xff] %v4280_v44  ;;  %v4282_v39 = vld [vmem:[#allocation3 + $0x90] sm:$0xff]  ;;  %v4284_v7 = vld [vmem:[#allocation3 + $0xc0] sm:$0xff] }
 0x851   : > { %4313 = vst [vmem:[#allocation10 + $0xa0] sm:$0xff] %v4281_v57  ;;  %v4283_v26 = vld [vmem:[#allocation3 + $0x70] sm:$0xff]  ;;  %4314 = vst [vmem:[#allocation10 + $0xa8] sm:$0xff] %v4282_v39  ;;  %v4285_v52 = vld [vmem:[#allocation3 + $0xa8] sm:$0xff] }
 0x852   : > { %4315 = vst [vmem:[#allocation10 + $0xb0] sm:$0xff] %v4283_v26  ;;  %4316 = vst [vmem:[#allocation10 + $0xb8] sm:$0xff] %v4284_v7  ;;  %v4286_v13 = vld [vmem:[#allocation3 + $0xd0] sm:$0xff]  ;;  %v4288_v46 = vld [vmem:[#allocation3 + $0x28] sm:$0xff] }
 0x853   : > { %v4287_v24 = vld [vmem:[#allocation3 + $0x10] sm:$0xff]  ;;  %4317 = vst [vmem:[#allocation10 + $0xc0] sm:$0xff] %v4285_v52  ;;  %4318 = vst [vmem:[#allocation10 + $0xc8] sm:$0xff] %v4286_v13  ;;  %v4289_v34 = vld [vmem:[#allocation3 + $0xa0] sm:$0xff] }
 0x854   : > { %4319 = vst [vmem:[#allocation10 + $0xd0] sm:$0xff] %v4287_v24  ;;  %v4290_v27 = vld [vmem:[#allocation3 + $0xf8] sm:$0xff]  ;;  %4320 = vst [vmem:[#allocation10 + $0xd8] sm:$0xff] %v4288_v46  ;;  %v4291_v20 = vld [vmem:[#allocation3 + $0x20] sm:$0xff] }
 0x855   : > { %4321 = vst [vmem:[#allocation10 + $0xe0] sm:$0xff] %v4289_v34  ;;  %4322 = vst [vmem:[#allocation10 + $0xe8] sm:$0xff] %v4290_v27  ;;  %v4292_v5 = vld [vmem:[#allocation3 + $0x98] sm:$0xff] }
 0x856   : > { %4323 = vst [vmem:[#allocation10 + $0xf0] sm:$0xff] %v4291_v20  ;;  %4324 = vst [vmem:[#allocation10 + $0xf8] sm:$0xff] %v4292_v5 }
 0x857 PF: > { %p4952_p8 = scmp.eq.s32.totalorder %s5517_s8, 3  ;;  %s5399_s27 = smov [#allocation10]  }
 0x858   : > { %s4334_s14 = sshll.u32 %s5399_s27, 4  ;;  %s4335_s14 = int_to_ptr.vmem [resolvable:$true] %s4334_s14 }
 0x859   : > { %s5304_s17 = scalar_lea.vmem %s4335_s14, 4096  ;;  %p5311_p9 = scmp.lt.s32.totalorder %s4335_s14, %s4335_s14 }
 0x85a   : > { %p5305_p10 = scmp.ne.s32.totalorder %s4335_s14, %s5304_s17  ;;  %p5312_p11 = scmp.lt.s32.totalorder %s5304_s17, %s5304_s17 }
 0x85c   : > { %p5306_p4 = pnand %p5305_p10, %p4952_p8  ;;  %p5313_p12 = por %p5312_p11, %p5311_p9 }
 0x85e   : > { %p5307_p7 = pneg %p5306_p4 }
 0x860   : > { %p5314_p13 = pnand %p5313_p12, %p5307_p7 }
 0x862   : > { %5317 = shalt.err (!%p5314_p13)
}
 0x863   : > { %s5400_s18 = smov 128   ;;  %s5401_s16 = smov 8  }
 0x864   : > { %4935 = dma.vmem_to_hbm [thread:$0]  (%p4952_p8), %s4335_s14, 4096, %s8080_s7, [#allocation6], %s5400_s18, %s5400_s18, %s5401_s16  }
 0x865   : > { %5361 = dma.done.wait (%p4952_p8), [#allocation6], 4096  }
 0x866   : > { %5363 = vsyncadd (%p4952_p8), [#allocation6], 4294963200 }
 0x867 PF: > { %s22_s29 = sadd.s32 1, %s5386_s29   ;;  %s8457_s24 = smov %s5370_s25 }
 0x868   : > { %p19_p0 = scmp.ge.s32.totalorder %s22_s29, 6   ;;  %s8458_s25 = smov %s5374_s26 }
 0x869   : > { %s8459_s26 = smov %s5486_s13  ;;  %s8460_s27 = smov %s5382_s28 }
 0x86a   : > { %s8461_s28 = smov %s8463_s30  ;;  %21 = sbr.rel (!%p19_p0) target bundleno = 6 (0x6), region = 117 }
 0x86f   :  { %4350 = vsyncpa [#allocation5], 1 }
 0x870   :  { %4352 = vsyncpa [#allocation5 + $0x1], 1 }
 0x871   :  { %4353 = vsyncpa [#allocation8], 1 }
 0x872   :  { %4355 = vsyncpa [#allocation8 + $0x1], 1 }
 0x873   :  { %4356 = vsyncpa [#allocation6], 1 }
 0x874   :  { %4358 = vsyncpa [#allocation6 + $0x1], 1 }

</bundles_post_ra>
